<compile_context>
chip_gen: v7x
topology: tpu7x:2x2x1
jax: 0.10.0
libtpu: 0.0.40
codegen_flags: <defaults>
</compile_context>

<pallas_src>
import functools

import jax
import jax.numpy as jnp
import numpy as np
from jax.experimental import pallas as pl
from jax.experimental.pallas import tpu as pltpu

_PRELU_SLOPE = 0.2  # PReLU(num_parameters=1) slope -> compile-time constant.

_WEIGHT_ORDER = ("s_shift", "w_cin", "b_cin", "w_ut", "b_ut", "w_up", "b_up",
                 "w_dt", "b_dt", "w_dn", "b_dn", "w_cout", "b_cout")


# -----------------------------------------------------------------------------
# In-kernel helpers
# -----------------------------------------------------------------------------
def _prelu(x):
    return jnp.where(x >= 0.0, x, _PRELU_SLOPE * x)


def _conv3x3_taps(feat, s_ref, w_ref, g, bias):
    """3x3 'same' conv over the flattened HxW grid, entirely on the MXU.

    feat : (P, Cin)            flattened (row-major) feature map, P = H*W
    s_ref: (9, P, P)           0/1 spatial-shift matrices (one per tap), host-built
    w_ref: (G, 9, Cin, Cout)   per-group, per-tap weights
    bias : (1, Cout)
    """
    acc = None
    for t in range(9):
        if t == 4:                                     # centre tap: no shift needed
            shifted = feat
        else:
            shifted = jnp.dot(s_ref[t], feat, preferred_element_type=jnp.float32)
        y = jnp.dot(shifted, w_ref[g, t], preferred_element_type=jnp.float32)
        acc = y if acc is None else acc + y
    return _prelu(acc + bias)


def _feedback_kernel(F, G, x_ref, s_ref, w_cin_ref, b_cin_ref,
                     w_ut_ref, b_ut_ref, w_up_ref, b_up_ref,
                     w_dt_ref, b_dt_ref, w_dn_ref, b_dn_ref,
                     w_cout_ref, b_cout_ref, o_ref):
    P = x_ref.shape[1]          # H*W
    C16 = 16 * F                # phase-major HR channel width (lane-dense: 128)

    # compress_in on cat(x, last_hidden=x): weight folded on the host, so the
    # concat never materializes.
    x = x_ref[0]                                                       # (P, F)
    lr = [_prelu(jnp.dot(x, w_cin_ref[...],
                         preferred_element_type=jnp.float32) + b_cin_ref[...])]
    # HR feature maps stay VMEM-resident in phase-major layout (P, 16*F):
    # column (rh*4+rw)*F + c  <->  HR pixel (4*oh+rh, 4*ow+rw), channel c.
    hr = []

    for idx in range(G):
        # ---------------- up path: LD_L -> uptran -> deconv(k8,s4,p2) ----------------
        if idx == 0:
            # Spec: LD_L = torch.empty(...) and NO slab is written at idx == 0.
            # TODO(synk): torch.empty reads uninitialized memory; we substitute zeros,
            # so the deconv collapses to its (PReLU'd) bias.
            hr_new = _prelu(jnp.zeros((P, C16), jnp.float32) + b_up_ref[idx])
        else:
            # Spec writes lr_features[i] for every i<idx into the SAME channel slab
            # [F*idx : F*(idx+1)] (last write wins = lr[idx-1]); all other channels
            # stay zero, so the 1x1 uptran reduces to an (F,F) matmul against the
            # matching F weight columns (pre-sliced on the host).
            ld_l = _prelu(jnp.dot(lr[idx - 1], w_ut_ref[idx - 1],
                                  preferred_element_type=jnp.float32)
                          + b_ut_ref[idx - 1])
            # Transposed conv == 3x3 conv on the LR grid with phase-packed weights;
            # output stays phase-major (lane-dense 16*F), no pixel shuffle.
            hr_new = _conv3x3_taps(ld_l, s_ref, w_up_ref, idx, b_up_ref[idx])
        hr.append(hr_new)

        # ---------------- down path: LD_H agg -> downtran -> conv(k8,s4,p2) ----------
        if idx == 0:
            lr_new = _prelu(jnp.zeros((P, F), jnp.float32) + b_dn_ref[idx])
        else:
            # Same slab semantics: only hr[idx-1] survives; the 1x1 downtran on the
            # HR map is a per-phase (block-diagonal) matmul in phase-major layout.
            ld_h = _prelu(jnp.dot(hr[idx - 1], w_dt_ref[idx - 1],
                                  preferred_element_type=jnp.float32)
                          + b_dt_ref[idx - 1])
            # Strided 8x8/s4 conv on phase-major HR == 3x3 conv on the LR grid.
            lr_new = _conv3x3_taps(ld_h, s_ref, w_dn_ref, idx, b_dn_ref[idx])
        lr.append(lr_new)

    # compress_out over cat(lr_features[1:]): sum of per-slice (F,F) matmuls
    # (avoids an in-kernel lane-dim concatenate).
    out = b_cout_ref[...]
    for g in range(G):
        out = out + jnp.dot(lr[g + 1], w_cout_ref[g],
                            preferred_element_type=jnp.float32)
    o_ref[0] = _prelu(out)


# -----------------------------------------------------------------------------
# Fused forward (wrapper)
# -----------------------------------------------------------------------------
def feedback_block_forward(x_nchw, packed, F, G):
    """x_nchw: (B, F, H, W) float32 -> (B, F, H, W). Fresh call == should_reset=True."""
    B, C, H, W = x_nchw.shape
    assert C == F, (C, F)
    P = H * W
    x2 = jnp.transpose(x_nchw, (0, 2, 3, 1)).reshape(B, P, F).astype(jnp.float32)

    weights = [packed[k] for k in _WEIGHT_ORDER]

    def _full_spec(a):
        zeros = (0,) * a.ndim
        return pl.BlockSpec(a.shape, lambda b, _z=zeros: _z)

    out = pl.pallas_call(
        functools.partial(_feedback_kernel, F, G),
        out_shape=jax.ShapeDtypeStruct((B, P, F), jnp.float32),
        grid_spec=pltpu.PrefetchScalarGridSpec(
            num_scalar_prefetch=0,
            grid=(B,),  # everything per-image stays in VMEM; only batch is gridded
            in_specs=[pl.BlockSpec((1, P, F), lambda b: (b, 0, 0))]
                     + [_full_spec(w) for w in weights],
            out_specs=pl.BlockSpec((1, P, F), lambda b: (b, 0, 0)),
        ),
        compiler_params=pltpu.CompilerParams(
            # parallel batch axis -> sharded across the two TensorCores on v7x.
            dimension_semantics=("parallel",),
        ),
    )(x2, *weights)
    return jnp.transpose(out.reshape(B, H, W, F), (0, 3, 1, 2))


# -----------------------------------------------------------------------------
# Host-side weight packing (numpy, done once)
# -----------------------------------------------------------------------------
def _shift_matrices(H, W):
    """S[t] realizes the 3x3-tap spatial shift (dr,dc)=(t//3-1, t%3-1) on the
    flattened row-major HxW grid, with zero fill at the borders."""
    P = H * W
    s = np.zeros((9, P, P), np.float32)
    for dr in (-1, 0, 1):
        for dc in (-1, 0, 1):
            t = (dr + 1) * 3 + (dc + 1)
            for r in range(H):
                for c in range(W):
                    rr, cc = r + dr, c + dc
                    if 0 <= rr < H and 0 <= cc < W:
                        s[t, r * W + c, rr * W + cc] = 1.0
    return s


def _pack_deconv_taps(wt, F):
    """ConvTranspose2d(k=8,s=4,p=2) weight (Cin,Cout,8,8) -> per-tap phase-major
    matmul weights (9, F, 16*F): out phase (rh,rw) at LR pixel p gets tap (e,e2)
    of the LR patch times Wt[:, :, 4*(1-e)+rh+2, 4*(1-e2)+rw+2]."""
    w = np.zeros((9, F, 16 * F), np.float32)
    for e in range(3):
        for e2 in range(3):
            for rh in range(4):
                kh = 4 * (1 - e) + rh + 2
                if not 0 <= kh < 8:
                    continue
                for rw in range(4):
                    kw = 4 * (1 - e2) + rw + 2
                    if not 0 <= kw < 8:
                        continue
                    ph = rh * 4 + rw
                    w[e * 3 + e2, :, ph * F:(ph + 1) * F] = wt[:, :, kh, kw]
    return w


def _pack_conv_taps(wc, F):
    """Conv2d(k=8,s=4,p=2) weight (Cout,Cin,8,8) acting on a phase-major HR map ->
    per-tap weights (9, 16*F, F): tap (e,e2), phase (rh,rw), channel ci multiplies
    Wc[co, ci, 4*(e-1)+rh+2, 4*(e2-1)+rw+2]."""
    w = np.zeros((9, 16 * F, F), np.float32)
    for e in range(3):
        for e2 in range(3):
            for rh in range(4):
                kh = 4 * (e - 1) + rh + 2
                if not 0 <= kh < 8:
                    continue
                for rw in range(4):
                    kw = 4 * (e2 - 1) + rw + 2
                    if not 0 <= kw < 8:
                        continue
                    ph = rh * 4 + rw
                    w[e * 3 + e2, ph * F:(ph + 1) * F, :] = wc[:, :, kh, kw].T
    return w


def _block_diag16(v):
    """(F,F) 1x1-conv matrix -> (16F,16F) block-diagonal (one block per HR phase)."""
    F = v.shape[0]
    w = np.zeros((16 * F, 16 * F), np.float32)
    for ph in range(16):
        w[ph * F:(ph + 1) * F, ph * F:(ph + 1) * F] = v
    return w


def pack_params(raw, F, G, H, W):
    """Repack torch-layout weights for the fused kernel."""
    p = {"s_shift": jnp.asarray(_shift_matrices(H, W))}

    w_cin = np.asarray(raw["compress_in"][0])[:, :, 0, 0]           # (F, 2F) [co, ci]
    # forward concatenates (x, last_hidden) with last_hidden == x on a fresh call:
    # cat(x, x) @ W  ==  x @ (W_a + W_b), folded here.
    p["w_cin"] = jnp.asarray((w_cin[:, :F] + w_cin[:, F:]).T)       # (F, F)  [ci, co]
    p["b_cin"] = jnp.asarray(np.asarray(raw["compress_in"][1])[None, :])

    n_tr = max(G - 1, 1)
    w_ut = np.zeros((n_tr, F, F), np.float32)
    b_ut = np.zeros((n_tr, 1, F), np.float32)
    w_dt = np.zeros((n_tr, 16 * F, 16 * F), np.float32)
    b_dt = np.zeros((n_tr, 1, 16 * F), np.float32)
    for idx in range(1, G):
        wu = np.asarray(raw["uptran"][idx - 1][0])[:, :, 0, 0]      # (F, F*(idx+1))
        w_ut[idx - 1] = wu[:, F * idx:F * (idx + 1)].T              # only slab ever written
        b_ut[idx - 1, 0] = np.asarray(raw["uptran"][idx - 1][1])
        wd = np.asarray(raw["downtran"][idx - 1][0])[:, :, 0, 0]
        w_dt[idx - 1] = _block_diag16(wd[:, F * idx:F * (idx + 1)].T)
        b_dt[idx - 1, 0] = np.tile(np.asarray(raw["downtran"][idx - 1][1]), 16)
    p["w_ut"], p["b_ut"] = jnp.asarray(w_ut), jnp.asarray(b_ut)
    p["w_dt"], p["b_dt"] = jnp.asarray(w_dt), jnp.asarray(b_dt)

    p["w_up"] = jnp.asarray(np.stack(
        [_pack_deconv_taps(np.asarray(raw["up"][i][0]), F) for i in range(G)]))
    p["b_up"] = jnp.asarray(np.stack(
        [np.tile(np.asarray(raw["up"][i][1]), 16)[None, :] for i in range(G)]))
    p["w_dn"] = jnp.asarray(np.stack(
        [_pack_conv_taps(np.asarray(raw["down"][i][0]), F) for i in range(G)]))
    p["b_dn"] = jnp.asarray(np.stack(
        [np.asarray(raw["down"][i][1])[None, :] for i in range(G)]))

    w_co = np.asarray(raw["compress_out"][0])[:, :, 0, 0]           # (F, G*F)
    p["w_cout"] = jnp.asarray(np.stack(
        [w_co[:, g * F:(g + 1) * F].T for g in range(G)]))          # (G, F, F)
    p["b_cout"] = jnp.asarray(np.asarray(raw["compress_out"][1])[None, :])
    return p


# -----------------------------------------------------------------------------
# Synthetic torch-layout parameters (same shapes as the module __init__)
# -----------------------------------------------------------------------------
def init_raw_params(key, F, G):
    keys = iter(jax.random.split(key, 8 + 8 * G))

    def nrm(shape, scale):
        return jax.random.normal(next(keys), shape, jnp.float32) * scale

    ws, bs = 0.1, 0.05
    raw = {
        "compress_in": (nrm((F, 2 * F, 1, 1), ws), nrm((F,), bs)),
        "compress_out": (nrm((F, G * F, 1, 1), ws), nrm((F,), bs)),
        "uptran": [], "downtran": [], "up": [], "down": [],
    }
    for idx in range(G):
        if idx > 0:
            raw["uptran"].append((nrm((F, F * (idx + 1), 1, 1), ws), nrm((F,), bs)))
            raw["downtran"].append((nrm((F, F * (idx + 1), 1, 1), ws), nrm((F,), bs)))
        raw["up"].append((nrm((F, F, 8, 8), ws), nrm((F,), bs)))    # ConvTranspose2d (Cin,Cout,kh,kw)
        raw["down"].append((nrm((F, F, 8, 8), ws), nrm((F,), bs)))  # Conv2d (Cout,Cin,kh,kw)
    return raw


# -----------------------------------------------------------------------------
# Pure-JAX (XLA) reference of the same forward, for numerical validation
# -----------------------------------------------------------------------------
_HI = jax.lax.Precision.HIGHEST


def _ref_prelu(x):
    return jnp.where(x >= 0.0, x, _PRELU_SLOPE * x)


def _ref_conv1x1(x, w, b):
    return _ref_prelu(jnp.einsum("bhwi,oi->bhwo", x, w[:, :, 0, 0], precision=_HI) + b)


def _ref_deconv8s4(x, w, b):
    # ConvTranspose2d(k=8,s=4,p=2): dilate input by 4, pad by k-1-p=5, correlate
    # with the spatially flipped kernel.
    wf = jnp.transpose(w[:, :, ::-1, ::-1], (2, 3, 0, 1))           # (kh, kw, ci, co)
    y = jax.lax.conv_general_dilated(
        x, wf, window_strides=(1, 1), padding=[(5, 5), (5, 5)],
        lhs_dilation=(4, 4), dimension_numbers=("NHWC", "HWIO", "NHWC"),
        precision=_HI)
    return _ref_prelu(y + b)


def _ref_conv8s4(x, w, b):
    wh = jnp.transpose(w, (2, 3, 1, 0))                             # (kh, kw, ci, co)
    y = jax.lax.conv_general_dilated(
        x, wh, window_strides=(4, 4), padding=[(2, 2), (2, 2)],
        dimension_numbers=("NHWC", "HWIO", "NHWC"), precision=_HI)
    return _ref_prelu(y + b)


def ref_forward(x_nchw, raw, F, G):
    """Mirror of FeedbackBlock.forward (torch.empty substituted by zeros)."""
    x = jnp.transpose(x_nchw, (0, 2, 3, 1)).astype(jnp.float32)
    last_hidden = x                                     # should_reset: copy of x
    x = jnp.concatenate([x, last_hidden], axis=-1)
    x = _ref_conv1x1(x, *raw["compress_in"])
    B, H, W, _ = x.shape
    lr, hr = [x], []
    for idx in range(G):
        ld_l = jnp.zeros((B, H, W, F * (idx + 1)), jnp.float32)
        for i in range(idx):                            # same slab for every i, as in the spec
            ld_l = ld_l.at[..., F * idx:F * (idx + 1)].set(lr[i])
        if idx > 0:
            ld_l = _ref_conv1x1(ld_l, *raw["uptran"][idx - 1])
        hr.append(_ref_deconv8s4(ld_l, *raw["up"][idx]))
        ld_hc = jnp.zeros((B, 4 * H, 4 * W, F * (idx + 1)), jnp.float32)
        for i in range(idx):
            ld_hc = ld_hc.at[..., F * idx:F * (idx + 1)].set(hr[i])
        if idx > 0:
            ld_hc = _ref_conv1x1(ld_hc, *raw["downtran"][idx - 1])
        lr.append(_ref_conv8s4(ld_hc, *raw["down"][idx]))
    out = jnp.concatenate(lr[1:], axis=-1)
    out = _ref_conv1x1(out, *raw["compress_out"])
    return jnp.transpose(out, (0, 3, 1, 2))


# -----------------------------------------------------------------------------
if __name__ == "__main__":
    F, G = 8, 3              # num_features, num_groups
    B, H, W = 2, 8, 8        # NCHW input; LR grid 8x8 (HR is 32x32)

    root = jax.random.PRNGKey(0)
    k_in, k_par = jax.random.split(root)
    x = jax.random.normal(k_in, (B, F, H, W), jnp.float32)

    raw = init_raw_params(k_par, F, G)
    packed = pack_params(raw, F, G, H, W)

    fwd = jax.jit(lambda xx: feedback_block_forward(xx, packed, F, G))
    out = jax.block_until_ready(fwd(x))
    assert out.shape == (B, F, H, W), out.shape

    # Validate the sub-pixel deconv decomposition, phase-major packing and slab
    # semantics against the XLA reference.  Tolerance is loose enough for MXU f32
    # pass / reassociation differences; any mis-packed tap or phase produces O(10%)
    # errors and would be caught.
    ref = jax.block_until_ready(ref_forward(x, raw, F, G))
    np.testing.assert_allclose(np.asarray(out), np.asarray(ref), rtol=1e-2, atol=1e-3)

    print("KERNEL_OK")
</pallas_src>

<mosaic_0001>
module attributes {stable_mosaic.version = 11 : i64} {
  func.func @_feedback_kernel(%arg0: i32, %arg1: memref<1x64x8xf32, #tpu.memory_space<vmem>>, %arg2: memref<9x64x64xf32, #tpu.memory_space<vmem>>, %arg3: memref<8x8xf32, #tpu.memory_space<vmem>>, %arg4: memref<1x8xf32, #tpu.memory_space<vmem>>, %arg5: memref<2x8x8xf32, #tpu.memory_space<vmem>>, %arg6: memref<2x1x8xf32, #tpu.memory_space<vmem>>, %arg7: memref<3x9x8x128xf32, #tpu.memory_space<vmem>>, %arg8: memref<3x1x128xf32, #tpu.memory_space<vmem>>, %arg9: memref<2x128x128xf32, #tpu.memory_space<vmem>>, %arg10: memref<2x1x128xf32, #tpu.memory_space<vmem>>, %arg11: memref<3x9x128x8xf32, #tpu.memory_space<vmem>>, %arg12: memref<3x1x8xf32, #tpu.memory_space<vmem>>, %arg13: memref<3x8x8xf32, #tpu.memory_space<vmem>>, %arg14: memref<1x8xf32, #tpu.memory_space<vmem>>, %arg15: memref<1x64x8xf32, #tpu.memory_space<vmem>>) attributes {dimension_semantics = [#tpu.dimension_semantics<parallel>], iteration_bounds = array<i64: 2>, scalar_prefetch = 0 : i64, scratch_operands = 0 : i64, tpu.core_type = #tpu.core_type<tc>, window_params = [{transform_indices = @transform_0, window_bounds = array<i64: 1, 64, 8>}, {pipeline_mode = #tpu.pipeline_mode<synchronous>, transform_indices = @transform_1, window_bounds = array<i64: 9, 64, 64>}, {pipeline_mode = #tpu.pipeline_mode<synchronous>, transform_indices = @transform_2, window_bounds = array<i64: 8, 8>}, {pipeline_mode = #tpu.pipeline_mode<synchronous>, transform_indices = @transform_3, window_bounds = array<i64: 1, 8>}, {pipeline_mode = #tpu.pipeline_mode<synchronous>, transform_indices = @transform_4, window_bounds = array<i64: 2, 8, 8>}, {pipeline_mode = #tpu.pipeline_mode<synchronous>, transform_indices = @transform_5, window_bounds = array<i64: 2, 1, 8>}, {pipeline_mode = #tpu.pipeline_mode<synchronous>, transform_indices = @transform_6, window_bounds = array<i64: 3, 9, 8, 128>}, {pipeline_mode = #tpu.pipeline_mode<synchronous>, transform_indices = @transform_7, window_bounds = array<i64: 3, 1, 128>}, {pipeline_mode = #tpu.pipeline_mode<synchronous>, transform_indices = @transform_8, window_bounds = array<i64: 2, 128, 128>}, {pipeline_mode = #tpu.pipeline_mode<synchronous>, transform_indices = @transform_9, window_bounds = array<i64: 2, 1, 128>}, {pipeline_mode = #tpu.pipeline_mode<synchronous>, transform_indices = @transform_10, window_bounds = array<i64: 3, 9, 128, 8>}, {pipeline_mode = #tpu.pipeline_mode<synchronous>, transform_indices = @transform_11, window_bounds = array<i64: 3, 1, 8>}, {pipeline_mode = #tpu.pipeline_mode<synchronous>, transform_indices = @transform_12, window_bounds = array<i64: 3, 8, 8>}, {pipeline_mode = #tpu.pipeline_mode<synchronous>, transform_indices = @transform_13, window_bounds = array<i64: 1, 8>}, {transform_indices = @transform_14, window_bounds = array<i64: 1, 64, 8>}]} {
    %c0 = arith.constant 0 : index
    %c0_0 = arith.constant 0 : index
    %c0_1 = arith.constant 0 : index
    %0 = vector.load %arg1[%c0, %c0_0, %c0_1] : memref<1x64x8xf32, #tpu.memory_space<vmem>>, vector<1x64x8xf32>
    %1 = vector.shape_cast %0 : vector<1x64x8xf32> to vector<64x8xf32>
    %c0_2 = arith.constant 0 : index
    %c0_3 = arith.constant 0 : index
    %2 = vector.load %arg3[%c0_2, %c0_3] : memref<8x8xf32, #tpu.memory_space<vmem>>, vector<8x8xf32>
    %cst = arith.constant dense<0.000000e+00> : vector<64x8xf32>
    %3 = tpu.matmul %1, %2, %cst {dimension_numbers = #tpu.dot_dimension_numbers<[1], [0], [0], [1], [0, 0, 1, 1], [], []>} : vector<64x8xf32>, vector<8x8xf32>, vector<64x8xf32> -> vector<64x8xf32>
    %c0_4 = arith.constant 0 : index
    %c0_5 = arith.constant 0 : index
    %4 = vector.load %arg4[%c0_4, %c0_5] : memref<1x8xf32, #tpu.memory_space<vmem>>, vector<1x8xf32>
    %5 = vector.broadcast %4 : vector<1x8xf32> to vector<64x8xf32>
    %6 = arith.addf %3, %5 : vector<64x8xf32>
    %cst_6 = arith.constant 0.000000e+00 : f32
    %7 = vector.broadcast %cst_6 : f32 to vector<64x8xf32>
    %8 = arith.cmpf oge, %6, %7 : vector<64x8xf32>
    %cst_7 = arith.constant 2.000000e-01 : f32
    %9 = vector.broadcast %cst_7 : f32 to vector<64x8xf32>
    %10 = arith.mulf %9, %6 : vector<64x8xf32>
    %11 = arith.select %8, %6, %10 : vector<64x8xi1>, vector<64x8xf32>
    %cst_8 = arith.constant 0.000000e+00 : f32
    %12 = vector.broadcast %cst_8 : f32 to vector<64x128xf32>
    %c0_9 = arith.constant 0 : index
    %c0_10 = arith.constant 0 : index
    %c0_11 = arith.constant 0 : index
    %13 = vector.load %arg8[%c0_9, %c0_10, %c0_11] : memref<3x1x128xf32, #tpu.memory_space<vmem>>, vector<1x1x128xf32>
    %14 = vector.shape_cast %13 : vector<1x1x128xf32> to vector<1x128xf32>
    %15 = vector.broadcast %14 : vector<1x128xf32> to vector<64x128xf32>
    %16 = arith.addf %12, %15 : vector<64x128xf32>
    %cst_12 = arith.constant 0.000000e+00 : f32
    %17 = vector.broadcast %cst_12 : f32 to vector<64x128xf32>
    %18 = arith.cmpf oge, %16, %17 : vector<64x128xf32>
    %cst_13 = arith.constant 2.000000e-01 : f32
    %19 = vector.broadcast %cst_13 : f32 to vector<64x128xf32>
    %20 = arith.mulf %19, %16 : vector<64x128xf32>
    %21 = arith.select %18, %16, %20 : vector<64x128xi1>, vector<64x128xf32>
    %cst_14 = arith.constant 0.000000e+00 : f32
    %22 = vector.broadcast %cst_14 : f32 to vector<64x8xf32>
    %c0_15 = arith.constant 0 : index
    %c0_16 = arith.constant 0 : index
    %c0_17 = arith.constant 0 : index
    %23 = vector.load %arg12[%c0_15, %c0_16, %c0_17] : memref<3x1x8xf32, #tpu.memory_space<vmem>>, vector<1x1x8xf32>
    %24 = vector.shape_cast %23 : vector<1x1x8xf32> to vector<1x8xf32>
    %25 = vector.broadcast %24 : vector<1x8xf32> to vector<64x8xf32>
    %26 = arith.addf %22, %25 : vector<64x8xf32>
    %cst_18 = arith.constant 0.000000e+00 : f32
    %27 = vector.broadcast %cst_18 : f32 to vector<64x8xf32>
    %28 = arith.cmpf oge, %26, %27 : vector<64x8xf32>
    %cst_19 = arith.constant 2.000000e-01 : f32
    %29 = vector.broadcast %cst_19 : f32 to vector<64x8xf32>
    %30 = arith.mulf %29, %26 : vector<64x8xf32>
    %31 = arith.select %28, %26, %30 : vector<64x8xi1>, vector<64x8xf32>
    %c0_20 = arith.constant 0 : index
    %c0_21 = arith.constant 0 : index
    %c0_22 = arith.constant 0 : index
    %32 = vector.load %arg5[%c0_20, %c0_21, %c0_22] : memref<2x8x8xf32, #tpu.memory_space<vmem>>, vector<1x8x8xf32>
    %33 = vector.shape_cast %32 : vector<1x8x8xf32> to vector<8x8xf32>
    %cst_23 = arith.constant dense<0.000000e+00> : vector<64x8xf32>
    %34 = tpu.matmul %11, %33, %cst_23 {dimension_numbers = #tpu.dot_dimension_numbers<[1], [0], [0], [1], [0, 0, 1, 1], [], []>} : vector<64x8xf32>, vector<8x8xf32>, vector<64x8xf32> -> vector<64x8xf32>
    %c0_24 = arith.constant 0 : index
    %c0_25 = arith.constant 0 : index
    %c0_26 = arith.constant 0 : index
    %35 = vector.load %arg6[%c0_24, %c0_25, %c0_26] : memref<2x1x8xf32, #tpu.memory_space<vmem>>, vector<1x1x8xf32>
    %36 = vector.shape_cast %35 : vector<1x1x8xf32> to vector<1x8xf32>
    %37 = vector.broadcast %36 : vector<1x8xf32> to vector<64x8xf32>
    %38 = arith.addf %34, %37 : vector<64x8xf32>
    %cst_27 = arith.constant 0.000000e+00 : f32
    %39 = vector.broadcast %cst_27 : f32 to vector<64x8xf32>
    %40 = arith.cmpf oge, %38, %39 : vector<64x8xf32>
    %cst_28 = arith.constant 2.000000e-01 : f32
    %41 = vector.broadcast %cst_28 : f32 to vector<64x8xf32>
    %42 = arith.mulf %41, %38 : vector<64x8xf32>
    %43 = arith.select %40, %38, %42 : vector<64x8xi1>, vector<64x8xf32>
    %c1 = arith.constant 1 : index
    %c0_29 = arith.constant 0 : index
    %c0_30 = arith.constant 0 : index
    %44 = vector.load %arg8[%c1, %c0_29, %c0_30] : memref<3x1x128xf32, #tpu.memory_space<vmem>>, vector<1x1x128xf32>
    %45 = vector.shape_cast %44 : vector<1x1x128xf32> to vector<1x128xf32>
    %c0_31 = arith.constant 0 : index
    %c0_32 = arith.constant 0 : index
    %c0_33 = arith.constant 0 : index
    %46 = vector.load %arg2[%c0_31, %c0_32, %c0_33] : memref<9x64x64xf32, #tpu.memory_space<vmem>>, vector<1x64x64xf32>
    %47 = vector.shape_cast %46 : vector<1x64x64xf32> to vector<64x64xf32>
    %cst_34 = arith.constant dense<0.000000e+00> : vector<64x8xf32>
    %48 = tpu.matmul %47, %43, %cst_34 {dimension_numbers = #tpu.dot_dimension_numbers<[1], [0], [0], [1], [0, 0, 1, 1], [], []>} : vector<64x64xf32>, vector<64x8xf32>, vector<64x8xf32> -> vector<64x8xf32>
    %c1_35 = arith.constant 1 : index
    %c0_36 = arith.constant 0 : index
    %c0_37 = arith.constant 0 : index
    %c0_38 = arith.constant 0 : index
    %49 = vector.load %arg7[%c1_35, %c0_36, %c0_37, %c0_38] : memref<3x9x8x128xf32, #tpu.memory_space<vmem>>, vector<1x1x8x128xf32>
    %50 = vector.shape_cast %49 : vector<1x1x8x128xf32> to vector<8x128xf32>
    %cst_39 = arith.constant dense<0.000000e+00> : vector<64x128xf32>
    %51 = tpu.matmul %48, %50, %cst_39 {dimension_numbers = #tpu.dot_dimension_numbers<[1], [0], [0], [1], [0, 0, 1, 1], [], []>} : vector<64x8xf32>, vector<8x128xf32>, vector<64x128xf32> -> vector<64x128xf32>
    %c1_40 = arith.constant 1 : index
    %c0_41 = arith.constant 0 : index
    %c0_42 = arith.constant 0 : index
    %52 = vector.load %arg2[%c1_40, %c0_41, %c0_42] : memref<9x64x64xf32, #tpu.memory_space<vmem>>, vector<1x64x64xf32>
    %53 = vector.shape_cast %52 : vector<1x64x64xf32> to vector<64x64xf32>
    %cst_43 = arith.constant dense<0.000000e+00> : vector<64x8xf32>
    %54 = tpu.matmul %53, %43, %cst_43 {dimension_numbers = #tpu.dot_dimension_numbers<[1], [0], [0], [1], [0, 0, 1, 1], [], []>} : vector<64x64xf32>, vector<64x8xf32>, vector<64x8xf32> -> vector<64x8xf32>
    %c1_44 = arith.constant 1 : index
    %c1_45 = arith.constant 1 : index
    %c0_46 = arith.constant 0 : index
    %c0_47 = arith.constant 0 : index
    %55 = vector.load %arg7[%c1_44, %c1_45, %c0_46, %c0_47] : memref<3x9x8x128xf32, #tpu.memory_space<vmem>>, vector<1x1x8x128xf32>
    %56 = vector.shape_cast %55 : vector<1x1x8x128xf32> to vector<8x128xf32>
    %cst_48 = arith.constant dense<0.000000e+00> : vector<64x128xf32>
    %57 = tpu.matmul %54, %56, %cst_48 {dimension_numbers = #tpu.dot_dimension_numbers<[1], [0], [0], [1], [0, 0, 1, 1], [], []>} : vector<64x8xf32>, vector<8x128xf32>, vector<64x128xf32> -> vector<64x128xf32>
    %58 = arith.addf %51, %57 : vector<64x128xf32>
    %c2 = arith.constant 2 : index
    %c0_49 = arith.constant 0 : index
    %c0_50 = arith.constant 0 : index
    %59 = vector.load %arg2[%c2, %c0_49, %c0_50] : memref<9x64x64xf32, #tpu.memory_space<vmem>>, vector<1x64x64xf32>
    %60 = vector.shape_cast %59 : vector<1x64x64xf32> to vector<64x64xf32>
    %cst_51 = arith.constant dense<0.000000e+00> : vector<64x8xf32>
    %61 = tpu.matmul %60, %43, %cst_51 {dimension_numbers = #tpu.dot_dimension_numbers<[1], [0], [0], [1], [0, 0, 1, 1], [], []>} : vector<64x64xf32>, vector<64x8xf32>, vector<64x8xf32> -> vector<64x8xf32>
    %c1_52 = arith.constant 1 : index
    %c2_53 = arith.constant 2 : index
    %c0_54 = arith.constant 0 : index
    %c0_55 = arith.constant 0 : index
    %62 = vector.load %arg7[%c1_52, %c2_53, %c0_54, %c0_55] : memref<3x9x8x128xf32, #tpu.memory_space<vmem>>, vector<1x1x8x128xf32>
    %63 = vector.shape_cast %62 : vector<1x1x8x128xf32> to vector<8x128xf32>
    %cst_56 = arith.constant dense<0.000000e+00> : vector<64x128xf32>
    %64 = tpu.matmul %61, %63, %cst_56 {dimension_numbers = #tpu.dot_dimension_numbers<[1], [0], [0], [1], [0, 0, 1, 1], [], []>} : vector<64x8xf32>, vector<8x128xf32>, vector<64x128xf32> -> vector<64x128xf32>
    %65 = arith.addf %58, %64 : vector<64x128xf32>
    %c3 = arith.constant 3 : index
    %c0_57 = arith.constant 0 : index
    %c0_58 = arith.constant 0 : index
    %66 = vector.load %arg2[%c3, %c0_57, %c0_58] : memref<9x64x64xf32, #tpu.memory_space<vmem>>, vector<1x64x64xf32>
    %67 = vector.shape_cast %66 : vector<1x64x64xf32> to vector<64x64xf32>
    %cst_59 = arith.constant dense<0.000000e+00> : vector<64x8xf32>
    %68 = tpu.matmul %67, %43, %cst_59 {dimension_numbers = #tpu.dot_dimension_numbers<[1], [0], [0], [1], [0, 0, 1, 1], [], []>} : vector<64x64xf32>, vector<64x8xf32>, vector<64x8xf32> -> vector<64x8xf32>
    %c1_60 = arith.constant 1 : index
    %c3_61 = arith.constant 3 : index
    %c0_62 = arith.constant 0 : index
    %c0_63 = arith.constant 0 : index
    %69 = vector.load %arg7[%c1_60, %c3_61, %c0_62, %c0_63] : memref<3x9x8x128xf32, #tpu.memory_space<vmem>>, vector<1x1x8x128xf32>
    %70 = vector.shape_cast %69 : vector<1x1x8x128xf32> to vector<8x128xf32>
    %cst_64 = arith.constant dense<0.000000e+00> : vector<64x128xf32>
    %71 = tpu.matmul %68, %70, %cst_64 {dimension_numbers = #tpu.dot_dimension_numbers<[1], [0], [0], [1], [0, 0, 1, 1], [], []>} : vector<64x8xf32>, vector<8x128xf32>, vector<64x128xf32> -> vector<64x128xf32>
    %72 = arith.addf %65, %71 : vector<64x128xf32>
    %c1_65 = arith.constant 1 : index
    %c4 = arith.constant 4 : index
    %c0_66 = arith.constant 0 : index
    %c0_67 = arith.constant 0 : index
    %73 = vector.load %arg7[%c1_65, %c4, %c0_66, %c0_67] : memref<3x9x8x128xf32, #tpu.memory_space<vmem>>, vector<1x1x8x128xf32>
    %74 = vector.shape_cast %73 : vector<1x1x8x128xf32> to vector<8x128xf32>
    %cst_68 = arith.constant dense<0.000000e+00> : vector<64x128xf32>
    %75 = tpu.matmul %43, %74, %cst_68 {dimension_numbers = #tpu.dot_dimension_numbers<[1], [0], [0], [1], [0, 0, 1, 1], [], []>} : vector<64x8xf32>, vector<8x128xf32>, vector<64x128xf32> -> vector<64x128xf32>
    %76 = arith.addf %72, %75 : vector<64x128xf32>
    %c5 = arith.constant 5 : index
    %c0_69 = arith.constant 0 : index
    %c0_70 = arith.constant 0 : index
    %77 = vector.load %arg2[%c5, %c0_69, %c0_70] : memref<9x64x64xf32, #tpu.memory_space<vmem>>, vector<1x64x64xf32>
    %78 = vector.shape_cast %77 : vector<1x64x64xf32> to vector<64x64xf32>
    %cst_71 = arith.constant dense<0.000000e+00> : vector<64x8xf32>
    %79 = tpu.matmul %78, %43, %cst_71 {dimension_numbers = #tpu.dot_dimension_numbers<[1], [0], [0], [1], [0, 0, 1, 1], [], []>} : vector<64x64xf32>, vector<64x8xf32>, vector<64x8xf32> -> vector<64x8xf32>
    %c1_72 = arith.constant 1 : index
    %c5_73 = arith.constant 5 : index
    %c0_74 = arith.constant 0 : index
    %c0_75 = arith.constant 0 : index
    %80 = vector.load %arg7[%c1_72, %c5_73, %c0_74, %c0_75] : memref<3x9x8x128xf32, #tpu.memory_space<vmem>>, vector<1x1x8x128xf32>
    %81 = vector.shape_cast %80 : vector<1x1x8x128xf32> to vector<8x128xf32>
    %cst_76 = arith.constant dense<0.000000e+00> : vector<64x128xf32>
    %82 = tpu.matmul %79, %81, %cst_76 {dimension_numbers = #tpu.dot_dimension_numbers<[1], [0], [0], [1], [0, 0, 1, 1], [], []>} : vector<64x8xf32>, vector<8x128xf32>, vector<64x128xf32> -> vector<64x128xf32>
    %83 = arith.addf %76, %82 : vector<64x128xf32>
    %c6 = arith.constant 6 : index
    %c0_77 = arith.constant 0 : index
    %c0_78 = arith.constant 0 : index
    %84 = vector.load %arg2[%c6, %c0_77, %c0_78] : memref<9x64x64xf32, #tpu.memory_space<vmem>>, vector<1x64x64xf32>
    %85 = vector.shape_cast %84 : vector<1x64x64xf32> to vector<64x64xf32>
    %cst_79 = arith.constant dense<0.000000e+00> : vector<64x8xf32>
    %86 = tpu.matmul %85, %43, %cst_79 {dimension_numbers = #tpu.dot_dimension_numbers<[1], [0], [0], [1], [0, 0, 1, 1], [], []>} : vector<64x64xf32>, vector<64x8xf32>, vector<64x8xf32> -> vector<64x8xf32>
    %c1_80 = arith.constant 1 : index
    %c6_81 = arith.constant 6 : index
    %c0_82 = arith.constant 0 : index
    %c0_83 = arith.constant 0 : index
    %87 = vector.load %arg7[%c1_80, %c6_81, %c0_82, %c0_83] : memref<3x9x8x128xf32, #tpu.memory_space<vmem>>, vector<1x1x8x128xf32>
    %88 = vector.shape_cast %87 : vector<1x1x8x128xf32> to vector<8x128xf32>
    %cst_84 = arith.constant dense<0.000000e+00> : vector<64x128xf32>
    %89 = tpu.matmul %86, %88, %cst_84 {dimension_numbers = #tpu.dot_dimension_numbers<[1], [0], [0], [1], [0, 0, 1, 1], [], []>} : vector<64x8xf32>, vector<8x128xf32>, vector<64x128xf32> -> vector<64x128xf32>
    %90 = arith.addf %83, %89 : vector<64x128xf32>
    %c7 = arith.constant 7 : index
    %c0_85 = arith.constant 0 : index
    %c0_86 = arith.constant 0 : index
    %91 = vector.load %arg2[%c7, %c0_85, %c0_86] : memref<9x64x64xf32, #tpu.memory_space<vmem>>, vector<1x64x64xf32>
    %92 = vector.shape_cast %91 : vector<1x64x64xf32> to vector<64x64xf32>
    %cst_87 = arith.constant dense<0.000000e+00> : vector<64x8xf32>
    %93 = tpu.matmul %92, %43, %cst_87 {dimension_numbers = #tpu.dot_dimension_numbers<[1], [0], [0], [1], [0, 0, 1, 1], [], []>} : vector<64x64xf32>, vector<64x8xf32>, vector<64x8xf32> -> vector<64x8xf32>
    %c1_88 = arith.constant 1 : index
    %c7_89 = arith.constant 7 : index
    %c0_90 = arith.constant 0 : index
    %c0_91 = arith.constant 0 : index
    %94 = vector.load %arg7[%c1_88, %c7_89, %c0_90, %c0_91] : memref<3x9x8x128xf32, #tpu.memory_space<vmem>>, vector<1x1x8x128xf32>
    %95 = vector.shape_cast %94 : vector<1x1x8x128xf32> to vector<8x128xf32>
    %cst_92 = arith.constant dense<0.000000e+00> : vector<64x128xf32>
    %96 = tpu.matmul %93, %95, %cst_92 {dimension_numbers = #tpu.dot_dimension_numbers<[1], [0], [0], [1], [0, 0, 1, 1], [], []>} : vector<64x8xf32>, vector<8x128xf32>, vector<64x128xf32> -> vector<64x128xf32>
    %97 = arith.addf %90, %96 : vector<64x128xf32>
    %c8 = arith.constant 8 : index
    %c0_93 = arith.constant 0 : index
    %c0_94 = arith.constant 0 : index
    %98 = vector.load %arg2[%c8, %c0_93, %c0_94] : memref<9x64x64xf32, #tpu.memory_space<vmem>>, vector<1x64x64xf32>
    %99 = vector.shape_cast %98 : vector<1x64x64xf32> to vector<64x64xf32>
    %cst_95 = arith.constant dense<0.000000e+00> : vector<64x8xf32>
    %100 = tpu.matmul %99, %43, %cst_95 {dimension_numbers = #tpu.dot_dimension_numbers<[1], [0], [0], [1], [0, 0, 1, 1], [], []>} : vector<64x64xf32>, vector<64x8xf32>, vector<64x8xf32> -> vector<64x8xf32>
    %c1_96 = arith.constant 1 : index
    %c8_97 = arith.constant 8 : index
    %c0_98 = arith.constant 0 : index
    %c0_99 = arith.constant 0 : index
    %101 = vector.load %arg7[%c1_96, %c8_97, %c0_98, %c0_99] : memref<3x9x8x128xf32, #tpu.memory_space<vmem>>, vector<1x1x8x128xf32>
    %102 = vector.shape_cast %101 : vector<1x1x8x128xf32> to vector<8x128xf32>
    %cst_100 = arith.constant dense<0.000000e+00> : vector<64x128xf32>
    %103 = tpu.matmul %100, %102, %cst_100 {dimension_numbers = #tpu.dot_dimension_numbers<[1], [0], [0], [1], [0, 0, 1, 1], [], []>} : vector<64x8xf32>, vector<8x128xf32>, vector<64x128xf32> -> vector<64x128xf32>
    %104 = arith.addf %97, %103 : vector<64x128xf32>
    %105 = vector.broadcast %45 : vector<1x128xf32> to vector<64x128xf32>
    %106 = arith.addf %104, %105 : vector<64x128xf32>
    %cst_101 = arith.constant 0.000000e+00 : f32
    %107 = vector.broadcast %cst_101 : f32 to vector<64x128xf32>
    %108 = arith.cmpf oge, %106, %107 : vector<64x128xf32>
    %cst_102 = arith.constant 2.000000e-01 : f32
    %109 = vector.broadcast %cst_102 : f32 to vector<64x128xf32>
    %110 = arith.mulf %109, %106 : vector<64x128xf32>
    %111 = arith.select %108, %106, %110 : vector<64x128xi1>, vector<64x128xf32>
    %c0_103 = arith.constant 0 : index
    %c0_104 = arith.constant 0 : index
    %c0_105 = arith.constant 0 : index
    %112 = vector.load %arg9[%c0_103, %c0_104, %c0_105] : memref<2x128x128xf32, #tpu.memory_space<vmem>>, vector<1x128x128xf32>
    %113 = vector.shape_cast %112 : vector<1x128x128xf32> to vector<128x128xf32>
    %cst_106 = arith.constant dense<0.000000e+00> : vector<64x128xf32>
    %114 = tpu.matmul %21, %113, %cst_106 {dimension_numbers = #tpu.dot_dimension_numbers<[1], [0], [0], [1], [0, 0, 1, 1], [], []>} : vector<64x128xf32>, vector<128x128xf32>, vector<64x128xf32> -> vector<64x128xf32>
    %c0_107 = arith.constant 0 : index
    %c0_108 = arith.constant 0 : index
    %c0_109 = arith.constant 0 : index
    %115 = vector.load %arg10[%c0_107, %c0_108, %c0_109] : memref<2x1x128xf32, #tpu.memory_space<vmem>>, vector<1x1x128xf32>
    %116 = vector.shape_cast %115 : vector<1x1x128xf32> to vector<1x128xf32>
    %117 = vector.broadcast %116 : vector<1x128xf32> to vector<64x128xf32>
    %118 = arith.addf %114, %117 : vector<64x128xf32>
    %cst_110 = arith.constant 0.000000e+00 : f32
    %119 = vector.broadcast %cst_110 : f32 to vector<64x128xf32>
    %120 = arith.cmpf oge, %118, %119 : vector<64x128xf32>
    %cst_111 = arith.constant 2.000000e-01 : f32
    %121 = vector.broadcast %cst_111 : f32 to vector<64x128xf32>
    %122 = arith.mulf %121, %118 : vector<64x128xf32>
    %123 = arith.select %120, %118, %122 : vector<64x128xi1>, vector<64x128xf32>
    %c1_112 = arith.constant 1 : index
    %c0_113 = arith.constant 0 : index
    %c0_114 = arith.constant 0 : index
    %124 = vector.load %arg12[%c1_112, %c0_113, %c0_114] : memref<3x1x8xf32, #tpu.memory_space<vmem>>, vector<1x1x8xf32>
    %125 = vector.shape_cast %124 : vector<1x1x8xf32> to vector<1x8xf32>
    %c0_115 = arith.constant 0 : index
    %c0_116 = arith.constant 0 : index
    %c0_117 = arith.constant 0 : index
    %126 = vector.load %arg2[%c0_115, %c0_116, %c0_117] : memref<9x64x64xf32, #tpu.memory_space<vmem>>, vector<1x64x64xf32>
    %127 = vector.shape_cast %126 : vector<1x64x64xf32> to vector<64x64xf32>
    %cst_118 = arith.constant dense<0.000000e+00> : vector<64x128xf32>
    %128 = tpu.matmul %127, %123, %cst_118 {dimension_numbers = #tpu.dot_dimension_numbers<[1], [0], [0], [1], [0, 0, 1, 1], [], []>} : vector<64x64xf32>, vector<64x128xf32>, vector<64x128xf32> -> vector<64x128xf32>
    %c1_119 = arith.constant 1 : index
    %c0_120 = arith.constant 0 : index
    %c0_121 = arith.constant 0 : index
    %c0_122 = arith.constant 0 : index
    %129 = vector.load %arg11[%c1_119, %c0_120, %c0_121, %c0_122] : memref<3x9x128x8xf32, #tpu.memory_space<vmem>>, vector<1x1x128x8xf32>
    %130 = vector.shape_cast %129 : vector<1x1x128x8xf32> to vector<128x8xf32>
    %cst_123 = arith.constant dense<0.000000e+00> : vector<64x8xf32>
    %131 = tpu.matmul %128, %130, %cst_123 {dimension_numbers = #tpu.dot_dimension_numbers<[1], [0], [0], [1], [0, 0, 1, 1], [], []>} : vector<64x128xf32>, vector<128x8xf32>, vector<64x8xf32> -> vector<64x8xf32>
    %c1_124 = arith.constant 1 : index
    %c0_125 = arith.constant 0 : index
    %c0_126 = arith.constant 0 : index
    %132 = vector.load %arg2[%c1_124, %c0_125, %c0_126] : memref<9x64x64xf32, #tpu.memory_space<vmem>>, vector<1x64x64xf32>
    %133 = vector.shape_cast %132 : vector<1x64x64xf32> to vector<64x64xf32>
    %cst_127 = arith.constant dense<0.000000e+00> : vector<64x128xf32>
    %134 = tpu.matmul %133, %123, %cst_127 {dimension_numbers = #tpu.dot_dimension_numbers<[1], [0], [0], [1], [0, 0, 1, 1], [], []>} : vector<64x64xf32>, vector<64x128xf32>, vector<64x128xf32> -> vector<64x128xf32>
    %c1_128 = arith.constant 1 : index
    %c1_129 = arith.constant 1 : index
    %c0_130 = arith.constant 0 : index
    %c0_131 = arith.constant 0 : index
    %135 = vector.load %arg11[%c1_128, %c1_129, %c0_130, %c0_131] : memref<3x9x128x8xf32, #tpu.memory_space<vmem>>, vector<1x1x128x8xf32>
    %136 = vector.shape_cast %135 : vector<1x1x128x8xf32> to vector<128x8xf32>
    %cst_132 = arith.constant dense<0.000000e+00> : vector<64x8xf32>
    %137 = tpu.matmul %134, %136, %cst_132 {dimension_numbers = #tpu.dot_dimension_numbers<[1], [0], [0], [1], [0, 0, 1, 1], [], []>} : vector<64x128xf32>, vector<128x8xf32>, vector<64x8xf32> -> vector<64x8xf32>
    %138 = arith.addf %131, %137 : vector<64x8xf32>
    %c2_133 = arith.constant 2 : index
    %c0_134 = arith.constant 0 : index
    %c0_135 = arith.constant 0 : index
    %139 = vector.load %arg2[%c2_133, %c0_134, %c0_135] : memref<9x64x64xf32, #tpu.memory_space<vmem>>, vector<1x64x64xf32>
    %140 = vector.shape_cast %139 : vector<1x64x64xf32> to vector<64x64xf32>
    %cst_136 = arith.constant dense<0.000000e+00> : vector<64x128xf32>
    %141 = tpu.matmul %140, %123, %cst_136 {dimension_numbers = #tpu.dot_dimension_numbers<[1], [0], [0], [1], [0, 0, 1, 1], [], []>} : vector<64x64xf32>, vector<64x128xf32>, vector<64x128xf32> -> vector<64x128xf32>
    %c1_137 = arith.constant 1 : index
    %c2_138 = arith.constant 2 : index
    %c0_139 = arith.constant 0 : index
    %c0_140 = arith.constant 0 : index
    %142 = vector.load %arg11[%c1_137, %c2_138, %c0_139, %c0_140] : memref<3x9x128x8xf32, #tpu.memory_space<vmem>>, vector<1x1x128x8xf32>
    %143 = vector.shape_cast %142 : vector<1x1x128x8xf32> to vector<128x8xf32>
    %cst_141 = arith.constant dense<0.000000e+00> : vector<64x8xf32>
    %144 = tpu.matmul %141, %143, %cst_141 {dimension_numbers = #tpu.dot_dimension_numbers<[1], [0], [0], [1], [0, 0, 1, 1], [], []>} : vector<64x128xf32>, vector<128x8xf32>, vector<64x8xf32> -> vector<64x8xf32>
    %145 = arith.addf %138, %144 : vector<64x8xf32>
    %c3_142 = arith.constant 3 : index
    %c0_143 = arith.constant 0 : index
    %c0_144 = arith.constant 0 : index
    %146 = vector.load %arg2[%c3_142, %c0_143, %c0_144] : memref<9x64x64xf32, #tpu.memory_space<vmem>>, vector<1x64x64xf32>
    %147 = vector.shape_cast %146 : vector<1x64x64xf32> to vector<64x64xf32>
    %cst_145 = arith.constant dense<0.000000e+00> : vector<64x128xf32>
    %148 = tpu.matmul %147, %123, %cst_145 {dimension_numbers = #tpu.dot_dimension_numbers<[1], [0], [0], [1], [0, 0, 1, 1], [], []>} : vector<64x64xf32>, vector<64x128xf32>, vector<64x128xf32> -> vector<64x128xf32>
    %c1_146 = arith.constant 1 : index
    %c3_147 = arith.constant 3 : index
    %c0_148 = arith.constant 0 : index
    %c0_149 = arith.constant 0 : index
    %149 = vector.load %arg11[%c1_146, %c3_147, %c0_148, %c0_149] : memref<3x9x128x8xf32, #tpu.memory_space<vmem>>, vector<1x1x128x8xf32>
    %150 = vector.shape_cast %149 : vector<1x1x128x8xf32> to vector<128x8xf32>
    %cst_150 = arith.constant dense<0.000000e+00> : vector<64x8xf32>
    %151 = tpu.matmul %148, %150, %cst_150 {dimension_numbers = #tpu.dot_dimension_numbers<[1], [0], [0], [1], [0, 0, 1, 1], [], []>} : vector<64x128xf32>, vector<128x8xf32>, vector<64x8xf32> -> vector<64x8xf32>
    %152 = arith.addf %145, %151 : vector<64x8xf32>
    %c1_151 = arith.constant 1 : index
    %c4_152 = arith.constant 4 : index
    %c0_153 = arith.constant 0 : index
    %c0_154 = arith.constant 0 : index
    %153 = vector.load %arg11[%c1_151, %c4_152, %c0_153, %c0_154] : memref<3x9x128x8xf32, #tpu.memory_space<vmem>>, vector<1x1x128x8xf32>
    %154 = vector.shape_cast %153 : vector<1x1x128x8xf32> to vector<128x8xf32>
    %cst_155 = arith.constant dense<0.000000e+00> : vector<64x8xf32>
    %155 = tpu.matmul %123, %154, %cst_155 {dimension_numbers = #tpu.dot_dimension_numbers<[1], [0], [0], [1], [0, 0, 1, 1], [], []>} : vector<64x128xf32>, vector<128x8xf32>, vector<64x8xf32> -> vector<64x8xf32>
    %156 = arith.addf %152, %155 : vector<64x8xf32>
    %c5_156 = arith.constant 5 : index
    %c0_157 = arith.constant 0 : index
    %c0_158 = arith.constant 0 : index
    %157 = vector.load %arg2[%c5_156, %c0_157, %c0_158] : memref<9x64x64xf32, #tpu.memory_space<vmem>>, vector<1x64x64xf32>
    %158 = vector.shape_cast %157 : vector<1x64x64xf32> to vector<64x64xf32>
    %cst_159 = arith.constant dense<0.000000e+00> : vector<64x128xf32>
    %159 = tpu.matmul %158, %123, %cst_159 {dimension_numbers = #tpu.dot_dimension_numbers<[1], [0], [0], [1], [0, 0, 1, 1], [], []>} : vector<64x64xf32>, vector<64x128xf32>, vector<64x128xf32> -> vector<64x128xf32>
    %c1_160 = arith.constant 1 : index
    %c5_161 = arith.constant 5 : index
    %c0_162 = arith.constant 0 : index
    %c0_163 = arith.constant 0 : index
    %160 = vector.load %arg11[%c1_160, %c5_161, %c0_162, %c0_163] : memref<3x9x128x8xf32, #tpu.memory_space<vmem>>, vector<1x1x128x8xf32>
    %161 = vector.shape_cast %160 : vector<1x1x128x8xf32> to vector<128x8xf32>
    %cst_164 = arith.constant dense<0.000000e+00> : vector<64x8xf32>
    %162 = tpu.matmul %159, %161, %cst_164 {dimension_numbers = #tpu.dot_dimension_numbers<[1], [0], [0], [1], [0, 0, 1, 1], [], []>} : vector<64x128xf32>, vector<128x8xf32>, vector<64x8xf32> -> vector<64x8xf32>
    %163 = arith.addf %156, %162 : vector<64x8xf32>
    %c6_165 = arith.constant 6 : index
    %c0_166 = arith.constant 0 : index
    %c0_167 = arith.constant 0 : index
    %164 = vector.load %arg2[%c6_165, %c0_166, %c0_167] : memref<9x64x64xf32, #tpu.memory_space<vmem>>, vector<1x64x64xf32>
    %165 = vector.shape_cast %164 : vector<1x64x64xf32> to vector<64x64xf32>
    %cst_168 = arith.constant dense<0.000000e+00> : vector<64x128xf32>
    %166 = tpu.matmul %165, %123, %cst_168 {dimension_numbers = #tpu.dot_dimension_numbers<[1], [0], [0], [1], [0, 0, 1, 1], [], []>} : vector<64x64xf32>, vector<64x128xf32>, vector<64x128xf32> -> vector<64x128xf32>
    %c1_169 = arith.constant 1 : index
    %c6_170 = arith.constant 6 : index
    %c0_171 = arith.constant 0 : index
    %c0_172 = arith.constant 0 : index
    %167 = vector.load %arg11[%c1_169, %c6_170, %c0_171, %c0_172] : memref<3x9x128x8xf32, #tpu.memory_space<vmem>>, vector<1x1x128x8xf32>
    %168 = vector.shape_cast %167 : vector<1x1x128x8xf32> to vector<128x8xf32>
    %cst_173 = arith.constant dense<0.000000e+00> : vector<64x8xf32>
    %169 = tpu.matmul %166, %168, %cst_173 {dimension_numbers = #tpu.dot_dimension_numbers<[1], [0], [0], [1], [0, 0, 1, 1], [], []>} : vector<64x128xf32>, vector<128x8xf32>, vector<64x8xf32> -> vector<64x8xf32>
    %170 = arith.addf %163, %169 : vector<64x8xf32>
    %c7_174 = arith.constant 7 : index
    %c0_175 = arith.constant 0 : index
    %c0_176 = arith.constant 0 : index
    %171 = vector.load %arg2[%c7_174, %c0_175, %c0_176] : memref<9x64x64xf32, #tpu.memory_space<vmem>>, vector<1x64x64xf32>
    %172 = vector.shape_cast %171 : vector<1x64x64xf32> to vector<64x64xf32>
    %cst_177 = arith.constant dense<0.000000e+00> : vector<64x128xf32>
    %173 = tpu.matmul %172, %123, %cst_177 {dimension_numbers = #tpu.dot_dimension_numbers<[1], [0], [0], [1], [0, 0, 1, 1], [], []>} : vector<64x64xf32>, vector<64x128xf32>, vector<64x128xf32> -> vector<64x128xf32>
    %c1_178 = arith.constant 1 : index
    %c7_179 = arith.constant 7 : index
    %c0_180 = arith.constant 0 : index
    %c0_181 = arith.constant 0 : index
    %174 = vector.load %arg11[%c1_178, %c7_179, %c0_180, %c0_181] : memref<3x9x128x8xf32, #tpu.memory_space<vmem>>, vector<1x1x128x8xf32>
    %175 = vector.shape_cast %174 : vector<1x1x128x8xf32> to vector<128x8xf32>
    %cst_182 = arith.constant dense<0.000000e+00> : vector<64x8xf32>
    %176 = tpu.matmul %173, %175, %cst_182 {dimension_numbers = #tpu.dot_dimension_numbers<[1], [0], [0], [1], [0, 0, 1, 1], [], []>} : vector<64x128xf32>, vector<128x8xf32>, vector<64x8xf32> -> vector<64x8xf32>
    %177 = arith.addf %170, %176 : vector<64x8xf32>
    %c8_183 = arith.constant 8 : index
    %c0_184 = arith.constant 0 : index
    %c0_185 = arith.constant 0 : index
    %178 = vector.load %arg2[%c8_183, %c0_184, %c0_185] : memref<9x64x64xf32, #tpu.memory_space<vmem>>, vector<1x64x64xf32>
    %179 = vector.shape_cast %178 : vector<1x64x64xf32> to vector<64x64xf32>
    %cst_186 = arith.constant dense<0.000000e+00> : vector<64x128xf32>
    %180 = tpu.matmul %179, %123, %cst_186 {dimension_numbers = #tpu.dot_dimension_numbers<[1], [0], [0], [1], [0, 0, 1, 1], [], []>} : vector<64x64xf32>, vector<64x128xf32>, vector<64x128xf32> -> vector<64x128xf32>
    %c1_187 = arith.constant 1 : index
    %c8_188 = arith.constant 8 : index
    %c0_189 = arith.constant 0 : index
    %c0_190 = arith.constant 0 : index
    %181 = vector.load %arg11[%c1_187, %c8_188, %c0_189, %c0_190] : memref<3x9x128x8xf32, #tpu.memory_space<vmem>>, vector<1x1x128x8xf32>
    %182 = vector.shape_cast %181 : vector<1x1x128x8xf32> to vector<128x8xf32>
    %cst_191 = arith.constant dense<0.000000e+00> : vector<64x8xf32>
    %183 = tpu.matmul %180, %182, %cst_191 {dimension_numbers = #tpu.dot_dimension_numbers<[1], [0], [0], [1], [0, 0, 1, 1], [], []>} : vector<64x128xf32>, vector<128x8xf32>, vector<64x8xf32> -> vector<64x8xf32>
    %184 = arith.addf %177, %183 : vector<64x8xf32>
    %185 = vector.broadcast %125 : vector<1x8xf32> to vector<64x8xf32>
    %186 = arith.addf %184, %185 : vector<64x8xf32>
    %cst_192 = arith.constant 0.000000e+00 : f32
    %187 = vector.broadcast %cst_192 : f32 to vector<64x8xf32>
    %188 = arith.cmpf oge, %186, %187 : vector<64x8xf32>
    %cst_193 = arith.constant 2.000000e-01 : f32
    %189 = vector.broadcast %cst_193 : f32 to vector<64x8xf32>
    %190 = arith.mulf %189, %186 : vector<64x8xf32>
    %191 = arith.select %188, %186, %190 : vector<64x8xi1>, vector<64x8xf32>
    %c1_194 = arith.constant 1 : index
    %c0_195 = arith.constant 0 : index
    %c0_196 = arith.constant 0 : index
    %192 = vector.load %arg9[%c1_194, %c0_195, %c0_196] : memref<2x128x128xf32, #tpu.memory_space<vmem>>, vector<1x128x128xf32>
    %193 = vector.shape_cast %192 : vector<1x128x128xf32> to vector<128x128xf32>
    %cst_197 = arith.constant dense<0.000000e+00> : vector<64x128xf32>
    %194 = tpu.matmul %111, %193, %cst_197 {dimension_numbers = #tpu.dot_dimension_numbers<[1], [0], [0], [1], [0, 0, 1, 1], [], []>} : vector<64x128xf32>, vector<128x128xf32>, vector<64x128xf32> -> vector<64x128xf32>
    %c1_198 = arith.constant 1 : index
    %c0_199 = arith.constant 0 : index
    %c0_200 = arith.constant 0 : index
    %195 = vector.load %arg10[%c1_198, %c0_199, %c0_200] : memref<2x1x128xf32, #tpu.memory_space<vmem>>, vector<1x1x128xf32>
    %196 = vector.shape_cast %195 : vector<1x1x128xf32> to vector<1x128xf32>
    %197 = vector.broadcast %196 : vector<1x128xf32> to vector<64x128xf32>
    %198 = arith.addf %194, %197 : vector<64x128xf32>
    %cst_201 = arith.constant 0.000000e+00 : f32
    %199 = vector.broadcast %cst_201 : f32 to vector<64x128xf32>
    %200 = arith.cmpf oge, %198, %199 : vector<64x128xf32>
    %cst_202 = arith.constant 2.000000e-01 : f32
    %201 = vector.broadcast %cst_202 : f32 to vector<64x128xf32>
    %202 = arith.mulf %201, %198 : vector<64x128xf32>
    %203 = arith.select %200, %198, %202 : vector<64x128xi1>, vector<64x128xf32>
    %c2_203 = arith.constant 2 : index
    %c0_204 = arith.constant 0 : index
    %c0_205 = arith.constant 0 : index
    %204 = vector.load %arg12[%c2_203, %c0_204, %c0_205] : memref<3x1x8xf32, #tpu.memory_space<vmem>>, vector<1x1x8xf32>
    %205 = vector.shape_cast %204 : vector<1x1x8xf32> to vector<1x8xf32>
    %c0_206 = arith.constant 0 : index
    %c0_207 = arith.constant 0 : index
    %c0_208 = arith.constant 0 : index
    %206 = vector.load %arg2[%c0_206, %c0_207, %c0_208] : memref<9x64x64xf32, #tpu.memory_space<vmem>>, vector<1x64x64xf32>
    %207 = vector.shape_cast %206 : vector<1x64x64xf32> to vector<64x64xf32>
    %cst_209 = arith.constant dense<0.000000e+00> : vector<64x128xf32>
    %208 = tpu.matmul %207, %203, %cst_209 {dimension_numbers = #tpu.dot_dimension_numbers<[1], [0], [0], [1], [0, 0, 1, 1], [], []>} : vector<64x64xf32>, vector<64x128xf32>, vector<64x128xf32> -> vector<64x128xf32>
    %c2_210 = arith.constant 2 : index
    %c0_211 = arith.constant 0 : index
    %c0_212 = arith.constant 0 : index
    %c0_213 = arith.constant 0 : index
    %209 = vector.load %arg11[%c2_210, %c0_211, %c0_212, %c0_213] : memref<3x9x128x8xf32, #tpu.memory_space<vmem>>, vector<1x1x128x8xf32>
    %210 = vector.shape_cast %209 : vector<1x1x128x8xf32> to vector<128x8xf32>
    %cst_214 = arith.constant dense<0.000000e+00> : vector<64x8xf32>
    %211 = tpu.matmul %208, %210, %cst_214 {dimension_numbers = #tpu.dot_dimension_numbers<[1], [0], [0], [1], [0, 0, 1, 1], [], []>} : vector<64x128xf32>, vector<128x8xf32>, vector<64x8xf32> -> vector<64x8xf32>
    %c1_215 = arith.constant 1 : index
    %c0_216 = arith.constant 0 : index
    %c0_217 = arith.constant 0 : index
    %212 = vector.load %arg2[%c1_215, %c0_216, %c0_217] : memref<9x64x64xf32, #tpu.memory_space<vmem>>, vector<1x64x64xf32>
    %213 = vector.shape_cast %212 : vector<1x64x64xf32> to vector<64x64xf32>
    %cst_218 = arith.constant dense<0.000000e+00> : vector<64x128xf32>
    %214 = tpu.matmul %213, %203, %cst_218 {dimension_numbers = #tpu.dot_dimension_numbers<[1], [0], [0], [1], [0, 0, 1, 1], [], []>} : vector<64x64xf32>, vector<64x128xf32>, vector<64x128xf32> -> vector<64x128xf32>
    %c2_219 = arith.constant 2 : index
    %c1_220 = arith.constant 1 : index
    %c0_221 = arith.constant 0 : index
    %c0_222 = arith.constant 0 : index
    %215 = vector.load %arg11[%c2_219, %c1_220, %c0_221, %c0_222] : memref<3x9x128x8xf32, #tpu.memory_space<vmem>>, vector<1x1x128x8xf32>
    %216 = vector.shape_cast %215 : vector<1x1x128x8xf32> to vector<128x8xf32>
    %cst_223 = arith.constant dense<0.000000e+00> : vector<64x8xf32>
    %217 = tpu.matmul %214, %216, %cst_223 {dimension_numbers = #tpu.dot_dimension_numbers<[1], [0], [0], [1], [0, 0, 1, 1], [], []>} : vector<64x128xf32>, vector<128x8xf32>, vector<64x8xf32> -> vector<64x8xf32>
    %218 = arith.addf %211, %217 : vector<64x8xf32>
    %c2_224 = arith.constant 2 : index
    %c0_225 = arith.constant 0 : index
    %c0_226 = arith.constant 0 : index
    %219 = vector.load %arg2[%c2_224, %c0_225, %c0_226] : memref<9x64x64xf32, #tpu.memory_space<vmem>>, vector<1x64x64xf32>
    %220 = vector.shape_cast %219 : vector<1x64x64xf32> to vector<64x64xf32>
    %cst_227 = arith.constant dense<0.000000e+00> : vector<64x128xf32>
    %221 = tpu.matmul %220, %203, %cst_227 {dimension_numbers = #tpu.dot_dimension_numbers<[1], [0], [0], [1], [0, 0, 1, 1], [], []>} : vector<64x64xf32>, vector<64x128xf32>, vector<64x128xf32> -> vector<64x128xf32>
    %c2_228 = arith.constant 2 : index
    %c2_229 = arith.constant 2 : index
    %c0_230 = arith.constant 0 : index
    %c0_231 = arith.constant 0 : index
    %222 = vector.load %arg11[%c2_228, %c2_229, %c0_230, %c0_231] : memref<3x9x128x8xf32, #tpu.memory_space<vmem>>, vector<1x1x128x8xf32>
    %223 = vector.shape_cast %222 : vector<1x1x128x8xf32> to vector<128x8xf32>
    %cst_232 = arith.constant dense<0.000000e+00> : vector<64x8xf32>
    %224 = tpu.matmul %221, %223, %cst_232 {dimension_numbers = #tpu.dot_dimension_numbers<[1], [0], [0], [1], [0, 0, 1, 1], [], []>} : vector<64x128xf32>, vector<128x8xf32>, vector<64x8xf32> -> vector<64x8xf32>
    %225 = arith.addf %218, %224 : vector<64x8xf32>
    %c3_233 = arith.constant 3 : index
    %c0_234 = arith.constant 0 : index
    %c0_235 = arith.constant 0 : index
    %226 = vector.load %arg2[%c3_233, %c0_234, %c0_235] : memref<9x64x64xf32, #tpu.memory_space<vmem>>, vector<1x64x64xf32>
    %227 = vector.shape_cast %226 : vector<1x64x64xf32> to vector<64x64xf32>
    %cst_236 = arith.constant dense<0.000000e+00> : vector<64x128xf32>
    %228 = tpu.matmul %227, %203, %cst_236 {dimension_numbers = #tpu.dot_dimension_numbers<[1], [0], [0], [1], [0, 0, 1, 1], [], []>} : vector<64x64xf32>, vector<64x128xf32>, vector<64x128xf32> -> vector<64x128xf32>
    %c2_237 = arith.constant 2 : index
    %c3_238 = arith.constant 3 : index
    %c0_239 = arith.constant 0 : index
    %c0_240 = arith.constant 0 : index
    %229 = vector.load %arg11[%c2_237, %c3_238, %c0_239, %c0_240] : memref<3x9x128x8xf32, #tpu.memory_space<vmem>>, vector<1x1x128x8xf32>
    %230 = vector.shape_cast %229 : vector<1x1x128x8xf32> to vector<128x8xf32>
    %cst_241 = arith.constant dense<0.000000e+00> : vector<64x8xf32>
    %231 = tpu.matmul %228, %230, %cst_241 {dimension_numbers = #tpu.dot_dimension_numbers<[1], [0], [0], [1], [0, 0, 1, 1], [], []>} : vector<64x128xf32>, vector<128x8xf32>, vector<64x8xf32> -> vector<64x8xf32>
    %232 = arith.addf %225, %231 : vector<64x8xf32>
    %c2_242 = arith.constant 2 : index
    %c4_243 = arith.constant 4 : index
    %c0_244 = arith.constant 0 : index
    %c0_245 = arith.constant 0 : index
    %233 = vector.load %arg11[%c2_242, %c4_243, %c0_244, %c0_245] : memref<3x9x128x8xf32, #tpu.memory_space<vmem>>, vector<1x1x128x8xf32>
    %234 = vector.shape_cast %233 : vector<1x1x128x8xf32> to vector<128x8xf32>
    %cst_246 = arith.constant dense<0.000000e+00> : vector<64x8xf32>
    %235 = tpu.matmul %203, %234, %cst_246 {dimension_numbers = #tpu.dot_dimension_numbers<[1], [0], [0], [1], [0, 0, 1, 1], [], []>} : vector<64x128xf32>, vector<128x8xf32>, vector<64x8xf32> -> vector<64x8xf32>
    %236 = arith.addf %232, %235 : vector<64x8xf32>
    %c5_247 = arith.constant 5 : index
    %c0_248 = arith.constant 0 : index
    %c0_249 = arith.constant 0 : index
    %237 = vector.load %arg2[%c5_247, %c0_248, %c0_249] : memref<9x64x64xf32, #tpu.memory_space<vmem>>, vector<1x64x64xf32>
    %238 = vector.shape_cast %237 : vector<1x64x64xf32> to vector<64x64xf32>
    %cst_250 = arith.constant dense<0.000000e+00> : vector<64x128xf32>
    %239 = tpu.matmul %238, %203, %cst_250 {dimension_numbers = #tpu.dot_dimension_numbers<[1], [0], [0], [1], [0, 0, 1, 1], [], []>} : vector<64x64xf32>, vector<64x128xf32>, vector<64x128xf32> -> vector<64x128xf32>
    %c2_251 = arith.constant 2 : index
    %c5_252 = arith.constant 5 : index
    %c0_253 = arith.constant 0 : index
    %c0_254 = arith.constant 0 : index
    %240 = vector.load %arg11[%c2_251, %c5_252, %c0_253, %c0_254] : memref<3x9x128x8xf32, #tpu.memory_space<vmem>>, vector<1x1x128x8xf32>
    %241 = vector.shape_cast %240 : vector<1x1x128x8xf32> to vector<128x8xf32>
    %cst_255 = arith.constant dense<0.000000e+00> : vector<64x8xf32>
    %242 = tpu.matmul %239, %241, %cst_255 {dimension_numbers = #tpu.dot_dimension_numbers<[1], [0], [0], [1], [0, 0, 1, 1], [], []>} : vector<64x128xf32>, vector<128x8xf32>, vector<64x8xf32> -> vector<64x8xf32>
    %243 = arith.addf %236, %242 : vector<64x8xf32>
    %c6_256 = arith.constant 6 : index
    %c0_257 = arith.constant 0 : index
    %c0_258 = arith.constant 0 : index
    %244 = vector.load %arg2[%c6_256, %c0_257, %c0_258] : memref<9x64x64xf32, #tpu.memory_space<vmem>>, vector<1x64x64xf32>
    %245 = vector.shape_cast %244 : vector<1x64x64xf32> to vector<64x64xf32>
    %cst_259 = arith.constant dense<0.000000e+00> : vector<64x128xf32>
    %246 = tpu.matmul %245, %203, %cst_259 {dimension_numbers = #tpu.dot_dimension_numbers<[1], [0], [0], [1], [0, 0, 1, 1], [], []>} : vector<64x64xf32>, vector<64x128xf32>, vector<64x128xf32> -> vector<64x128xf32>
    %c2_260 = arith.constant 2 : index
    %c6_261 = arith.constant 6 : index
    %c0_262 = arith.constant 0 : index
    %c0_263 = arith.constant 0 : index
    %247 = vector.load %arg11[%c2_260, %c6_261, %c0_262, %c0_263] : memref<3x9x128x8xf32, #tpu.memory_space<vmem>>, vector<1x1x128x8xf32>
    %248 = vector.shape_cast %247 : vector<1x1x128x8xf32> to vector<128x8xf32>
    %cst_264 = arith.constant dense<0.000000e+00> : vector<64x8xf32>
    %249 = tpu.matmul %246, %248, %cst_264 {dimension_numbers = #tpu.dot_dimension_numbers<[1], [0], [0], [1], [0, 0, 1, 1], [], []>} : vector<64x128xf32>, vector<128x8xf32>, vector<64x8xf32> -> vector<64x8xf32>
    %250 = arith.addf %243, %249 : vector<64x8xf32>
    %c7_265 = arith.constant 7 : index
    %c0_266 = arith.constant 0 : index
    %c0_267 = arith.constant 0 : index
    %251 = vector.load %arg2[%c7_265, %c0_266, %c0_267] : memref<9x64x64xf32, #tpu.memory_space<vmem>>, vector<1x64x64xf32>
    %252 = vector.shape_cast %251 : vector<1x64x64xf32> to vector<64x64xf32>
    %cst_268 = arith.constant dense<0.000000e+00> : vector<64x128xf32>
    %253 = tpu.matmul %252, %203, %cst_268 {dimension_numbers = #tpu.dot_dimension_numbers<[1], [0], [0], [1], [0, 0, 1, 1], [], []>} : vector<64x64xf32>, vector<64x128xf32>, vector<64x128xf32> -> vector<64x128xf32>
    %c2_269 = arith.constant 2 : index
    %c7_270 = arith.constant 7 : index
    %c0_271 = arith.constant 0 : index
    %c0_272 = arith.constant 0 : index
    %254 = vector.load %arg11[%c2_269, %c7_270, %c0_271, %c0_272] : memref<3x9x128x8xf32, #tpu.memory_space<vmem>>, vector<1x1x128x8xf32>
    %255 = vector.shape_cast %254 : vector<1x1x128x8xf32> to vector<128x8xf32>
    %cst_273 = arith.constant dense<0.000000e+00> : vector<64x8xf32>
    %256 = tpu.matmul %253, %255, %cst_273 {dimension_numbers = #tpu.dot_dimension_numbers<[1], [0], [0], [1], [0, 0, 1, 1], [], []>} : vector<64x128xf32>, vector<128x8xf32>, vector<64x8xf32> -> vector<64x8xf32>
    %257 = arith.addf %250, %256 : vector<64x8xf32>
    %c8_274 = arith.constant 8 : index
    %c0_275 = arith.constant 0 : index
    %c0_276 = arith.constant 0 : index
    %258 = vector.load %arg2[%c8_274, %c0_275, %c0_276] : memref<9x64x64xf32, #tpu.memory_space<vmem>>, vector<1x64x64xf32>
    %259 = vector.shape_cast %258 : vector<1x64x64xf32> to vector<64x64xf32>
    %cst_277 = arith.constant dense<0.000000e+00> : vector<64x128xf32>
    %260 = tpu.matmul %259, %203, %cst_277 {dimension_numbers = #tpu.dot_dimension_numbers<[1], [0], [0], [1], [0, 0, 1, 1], [], []>} : vector<64x64xf32>, vector<64x128xf32>, vector<64x128xf32> -> vector<64x128xf32>
    %c2_278 = arith.constant 2 : index
    %c8_279 = arith.constant 8 : index
    %c0_280 = arith.constant 0 : index
    %c0_281 = arith.constant 0 : index
    %261 = vector.load %arg11[%c2_278, %c8_279, %c0_280, %c0_281] : memref<3x9x128x8xf32, #tpu.memory_space<vmem>>, vector<1x1x128x8xf32>
    %262 = vector.shape_cast %261 : vector<1x1x128x8xf32> to vector<128x8xf32>
    %cst_282 = arith.constant dense<0.000000e+00> : vector<64x8xf32>
    %263 = tpu.matmul %260, %262, %cst_282 {dimension_numbers = #tpu.dot_dimension_numbers<[1], [0], [0], [1], [0, 0, 1, 1], [], []>} : vector<64x128xf32>, vector<128x8xf32>, vector<64x8xf32> -> vector<64x8xf32>
    %264 = arith.addf %257, %263 : vector<64x8xf32>
    %265 = vector.broadcast %205 : vector<1x8xf32> to vector<64x8xf32>
    %266 = arith.addf %264, %265 : vector<64x8xf32>
    %cst_283 = arith.constant 0.000000e+00 : f32
    %267 = vector.broadcast %cst_283 : f32 to vector<64x8xf32>
    %268 = arith.cmpf oge, %266, %267 : vector<64x8xf32>
    %cst_284 = arith.constant 2.000000e-01 : f32
    %269 = vector.broadcast %cst_284 : f32 to vector<64x8xf32>
    %270 = arith.mulf %269, %266 : vector<64x8xf32>
    %271 = arith.select %268, %266, %270 : vector<64x8xi1>, vector<64x8xf32>
    %c0_285 = arith.constant 0 : index
    %c0_286 = arith.constant 0 : index
    %272 = vector.load %arg14[%c0_285, %c0_286] : memref<1x8xf32, #tpu.memory_space<vmem>>, vector<1x8xf32>
    %c0_287 = arith.constant 0 : index
    %c0_288 = arith.constant 0 : index
    %c0_289 = arith.constant 0 : index
    %273 = vector.load %arg13[%c0_287, %c0_288, %c0_289] : memref<3x8x8xf32, #tpu.memory_space<vmem>>, vector<1x8x8xf32>
    %274 = vector.shape_cast %273 : vector<1x8x8xf32> to vector<8x8xf32>
    %cst_290 = arith.constant dense<0.000000e+00> : vector<64x8xf32>
    %275 = tpu.matmul %31, %274, %cst_290 {dimension_numbers = #tpu.dot_dimension_numbers<[1], [0], [0], [1], [0, 0, 1, 1], [], []>} : vector<64x8xf32>, vector<8x8xf32>, vector<64x8xf32> -> vector<64x8xf32>
    %276 = vector.broadcast %272 : vector<1x8xf32> to vector<64x8xf32>
    %277 = arith.addf %276, %275 : vector<64x8xf32>
    %c1_291 = arith.constant 1 : index
    %c0_292 = arith.constant 0 : index
    %c0_293 = arith.constant 0 : index
    %278 = vector.load %arg13[%c1_291, %c0_292, %c0_293] : memref<3x8x8xf32, #tpu.memory_space<vmem>>, vector<1x8x8xf32>
    %279 = vector.shape_cast %278 : vector<1x8x8xf32> to vector<8x8xf32>
    %cst_294 = arith.constant dense<0.000000e+00> : vector<64x8xf32>
    %280 = tpu.matmul %191, %279, %cst_294 {dimension_numbers = #tpu.dot_dimension_numbers<[1], [0], [0], [1], [0, 0, 1, 1], [], []>} : vector<64x8xf32>, vector<8x8xf32>, vector<64x8xf32> -> vector<64x8xf32>
    %281 = arith.addf %277, %280 : vector<64x8xf32>
    %c2_295 = arith.constant 2 : index
    %c0_296 = arith.constant 0 : index
    %c0_297 = arith.constant 0 : index
    %282 = vector.load %arg13[%c2_295, %c0_296, %c0_297] : memref<3x8x8xf32, #tpu.memory_space<vmem>>, vector<1x8x8xf32>
    %283 = vector.shape_cast %282 : vector<1x8x8xf32> to vector<8x8xf32>
    %cst_298 = arith.constant dense<0.000000e+00> : vector<64x8xf32>
    %284 = tpu.matmul %271, %283, %cst_298 {dimension_numbers = #tpu.dot_dimension_numbers<[1], [0], [0], [1], [0, 0, 1, 1], [], []>} : vector<64x8xf32>, vector<8x8xf32>, vector<64x8xf32> -> vector<64x8xf32>
    %285 = arith.addf %281, %284 : vector<64x8xf32>
    %cst_299 = arith.constant 0.000000e+00 : f32
    %286 = vector.broadcast %cst_299 : f32 to vector<64x8xf32>
    %287 = arith.cmpf oge, %285, %286 : vector<64x8xf32>
    %cst_300 = arith.constant 2.000000e-01 : f32
    %288 = vector.broadcast %cst_300 : f32 to vector<64x8xf32>
    %289 = arith.mulf %288, %285 : vector<64x8xf32>
    %290 = arith.select %287, %285, %289 : vector<64x8xi1>, vector<64x8xf32>
    %c0_301 = arith.constant 0 : index
    %c0_302 = arith.constant 0 : index
    %c0_303 = arith.constant 0 : index
    %291 = vector.load %arg15[%c0_301, %c0_302, %c0_303] : memref<1x64x8xf32, #tpu.memory_space<vmem>>, vector<1x64x8xf32>
    %292 = vector.shape_cast %291 : vector<1x64x8xf32> to vector<64x8xf32>
    %293 = vector.shape_cast %290 : vector<64x8xf32> to vector<1x64x8xf32>
    tpu.vector_store %arg15[%c0_301, %c0_302, %c0_303], %293 {strides = array<i32>} : memref<1x64x8xf32, #tpu.memory_space<vmem>>, vector<1x64x8xf32>,
    return
  }
  func.func @transform_0(%arg0: i32) -> (i32, i32, i32) {
    %c0_i32 = arith.constant 0 : i32
    %c0_i32_0 = arith.constant 0 : i32
    %c0_i32_1 = arith.constant 0 : i32
    return %arg0, %c0_i32, %c0_i32_0 : i32, i32, i32
  }
  func.func @transform_1(%arg0: i32) -> (i32, i32, i32) {
    %c0_i32 = arith.constant 0 : i32
    %c0_i32_0 = arith.constant 0 : i32
    %c0_i32_1 = arith.constant 0 : i32
    %c0_i32_2 = arith.constant 0 : i32
    return %c0_i32, %c0_i32_0, %c0_i32_1 : i32, i32, i32
  }
  func.func @transform_2(%arg0: i32) -> (i32, i32) {
    %c0_i32 = arith.constant 0 : i32
    %c0_i32_0 = arith.constant 0 : i32
    %c0_i32_1 = arith.constant 0 : i32
    return %c0_i32, %c0_i32_0 : i32, i32
  }
  func.func @transform_3(%arg0: i32) -> (i32, i32) {
    %c0_i32 = arith.constant 0 : i32
    %c0_i32_0 = arith.constant 0 : i32
    %c0_i32_1 = arith.constant 0 : i32
    return %c0_i32, %c0_i32_0 : i32, i32
  }
  func.func @transform_4(%arg0: i32) -> (i32, i32, i32) {
    %c0_i32 = arith.constant 0 : i32
    %c0_i32_0 = arith.constant 0 : i32
    %c0_i32_1 = arith.constant 0 : i32
    %c0_i32_2 = arith.constant 0 : i32
    return %c0_i32, %c0_i32_0, %c0_i32_1 : i32, i32, i32
  }
  func.func @transform_5(%arg0: i32) -> (i32, i32, i32) {
    %c0_i32 = arith.constant 0 : i32
    %c0_i32_0 = arith.constant 0 : i32
    %c0_i32_1 = arith.constant 0 : i32
    %c0_i32_2 = arith.constant 0 : i32
    return %c0_i32, %c0_i32_0, %c0_i32_1 : i32, i32, i32
  }
  func.func @transform_6(%arg0: i32) -> (i32, i32, i32, i32) {
    %c0_i32 = arith.constant 0 : i32
    %c0_i32_0 = arith.constant 0 : i32
    %c0_i32_1 = arith.constant 0 : i32
    %c0_i32_2 = arith.constant 0 : i32
    %c0_i32_3 = arith.constant 0 : i32
    return %c0_i32, %c0_i32_0, %c0_i32_1, %c0_i32_2 : i32, i32, i32, i32
  }
  func.func @transform_7(%arg0: i32) -> (i32, i32, i32) {
    %c0_i32 = arith.constant 0 : i32
    %c0_i32_0 = arith.constant 0 : i32
    %c0_i32_1 = arith.constant 0 : i32
    %c0_i32_2 = arith.constant 0 : i32
    return %c0_i32, %c0_i32_0, %c0_i32_1 : i32, i32, i32
  }
  func.func @transform_8(%arg0: i32) -> (i32, i32, i32) {
    %c0_i32 = arith.constant 0 : i32
    %c0_i32_0 = arith.constant 0 : i32
    %c0_i32_1 = arith.constant 0 : i32
    %c0_i32_2 = arith.constant 0 : i32
    return %c0_i32, %c0_i32_0, %c0_i32_1 : i32, i32, i32
  }
  func.func @transform_9(%arg0: i32) -> (i32, i32, i32) {
    %c0_i32 = arith.constant 0 : i32
    %c0_i32_0 = arith.constant 0 : i32
    %c0_i32_1 = arith.constant 0 : i32
    %c0_i32_2 = arith.constant 0 : i32
    return %c0_i32, %c0_i32_0, %c0_i32_1 : i32, i32, i32
  }
  func.func @transform_10(%arg0: i32) -> (i32, i32, i32, i32) {
    %c0_i32 = arith.constant 0 : i32
    %c0_i32_0 = arith.constant 0 : i32
    %c0_i32_1 = arith.constant 0 : i32
    %c0_i32_2 = arith.constant 0 : i32
    %c0_i32_3 = arith.constant 0 : i32
    return %c0_i32, %c0_i32_0, %c0_i32_1, %c0_i32_2 : i32, i32, i32, i32
  }
  func.func @transform_11(%arg0: i32) -> (i32, i32, i32) {
    %c0_i32 = arith.constant 0 : i32
    %c0_i32_0 = arith.constant 0 : i32
    %c0_i32_1 = arith.constant 0 : i32
    %c0_i32_2 = arith.constant 0 : i32
    return %c0_i32, %c0_i32_0, %c0_i32_1 : i32, i32, i32
  }
  func.func @transform_12(%arg0: i32) -> (i32, i32, i32) {
    %c0_i32 = arith.constant 0 : i32
    %c0_i32_0 = arith.constant 0 : i32
    %c0_i32_1 = arith.constant 0 : i32
    %c0_i32_2 = arith.constant 0 : i32
    return %c0_i32, %c0_i32_0, %c0_i32_1 : i32, i32, i32
  }
  func.func @transform_13(%arg0: i32) -> (i32, i32) {
    %c0_i32 = arith.constant 0 : i32
    %c0_i32_0 = arith.constant 0 : i32
    %c0_i32_1 = arith.constant 0 : i32
    return %c0_i32, %c0_i32_0 : i32, i32
  }
  func.func @transform_14(%arg0: i32) -> (i32, i32, i32) {
    %c0_i32 = arith.constant 0 : i32
    %c0_i32_0 = arith.constant 0 : i32
    %c0_i32_1 = arith.constant 0 : i32
    return %arg0, %c0_i32, %c0_i32_0 : i32, i32, i32
  }
}

</mosaic_0001>

<bundles_post_ra>
// kernel: _lambda_.1
= control target key start
LH: loop header
LB: loop body
LE: loop exit
PB: predicated region body
PF: predicated region fallthrough
CT: control target
= control target key end

     0   :  { %s14991_s0 = inlined_call_operand.vmem [shape: f32[2,64,8], index: 0, kind: input, shape index: {}]   ;;  %s14992_s1 = inlined_call_operand.hbm [shape: f32[9,64,64], index: 1, kind: input, shape index: {}]   ;;  %s14993_s2 = inlined_call_operand.hbm [shape: f32[8,8], index: 2, kind: input, shape index: {}]   ;;  %s14994_s3 = inlined_call_operand.hbm [shape: f32[1,8], index: 3, kind: input, shape index: {}]   ;;  %s14995_s4 = inlined_call_operand.hbm [shape: f32[2,8,8], index: 4, kind: input, shape index: {}]   ;;  %s14996_s5 = inlined_call_operand.hbm [shape: f32[2,1,8], index: 5, kind: input, shape index: {}]   ;;  %s14997_s6 = inlined_call_operand.hbm [shape: f32[3,9,8,128], index: 6, kind: input, shape index: {}]   ;;  %s14998_s7 = inlined_call_operand.hbm [shape: f32[3,1,128], index: 7, kind: input, shape index: {}]   ;;  %s14999_s8 = inlined_call_operand.hbm [shape: f32[2,128,128], index: 8, kind: input, shape index: {}]   ;;  %s15000_s9 = inlined_call_operand.hbm [shape: f32[2,1,128], index: 9, kind: input, shape index: {}]   ;;  %s15001_s10 = inlined_call_operand.hbm [shape: f32[3,9,128,8], index: 10, kind: input, shape index: {}]   ;;  %s15002_s11 = inlined_call_operand.hbm [shape: f32[3,1,8], index: 11, kind: input, shape index: {}]   ;;  %s15003_s12 = inlined_call_operand.hbm [shape: f32[3,8,8], index: 12, kind: input, shape index: {}]   ;;  %s15004_s13 = inlined_call_operand.hbm [shape: f32[1,8], index: 13, kind: input, shape index: {}]   ;;  %s15005_s14 = inlined_call_operand.vmem [shape: f32[2,64,8], index: 14, kind: output, shape index: {}]  }
   0x1   :  { %15034 = sst [smem:[#allocation55_spill]] %s14993_s2 }
   0x2   :  { %15035 = sst [smem:[#allocation56_spill]] %s14995_s4 }
   0x3   :  { %15036 = sst [smem:[#allocation57_spill]] %s15005_s14 }
   0x4   :  { %19 = vsyncpa [#allocation3], 0 }
   0x5   :  { %20 = vsyncpa [#allocation5], 0 }
   0x6   :  { %21 = vsyncpa [#allocation8], 0 }
   0x7   :  { %22 = vsyncpa [#allocation11], 0 }
   0x8   :  { %23 = vsyncpa [#allocation14], 0 }
   0x9   :  { %24 = vsyncpa [#allocation17], 0 }
   0xa   :  { %25 = vsyncpa [#allocation20], 0  ;;  %s13402_s29 = smov 0  }
   0xb LB: > { %15037 = sst [smem:[#allocation29_spill]] %s13308_s29  ;;  %s13310_s30 = smov [#allocation4]   ;;  %s13308_s29 = sphi %s13402_s29, %s31_s29  }
   0xc   : > { %s387_s15 = sshll.u32 %s13310_s30, 4  ;;  %s13408_s16 = sadd.s32 4294967295, %s13308_s29   ;;  %s13413_s15 = int_to_ptr.vmem [resolvable:$true] %s387_s15 }
   0xd   : > { %p8374_p0 = scmp.ge.s32.totalorder %s13308_s29, 1  ;;  %p361_p1 = scmp.lt.s32.totalorder %s13308_s29, 3 }
   0xe   : > { %p15007_p2 = scmp.eq.s32.totalorder %s13408_s16, 0  ;;  %s13311_s18 = smov [#allocation7]  }
   0xf   : > { %p13415_p3 = pnand %p8374_p0, %p361_p1  ;;  %s408_s19 = sshll.u32 %s13311_s18, 4  ;;  %s13421_s19 = int_to_ptr.vmem [resolvable:$true] %s408_s19 }
  0x10   : > { %s13312_s21 = smov [#allocation10]   ;;  %s13313_s23 = smov [#allocation13]  }
  0x11   : > { %s15038_s17 = scalar_select %p13415_p3, 1, 0 }
  0x12   : > { %p12755_p4 = pneg %p13415_p3  ;;  %s434_s22 = sshll.u32 %s13312_s21, 4  ;;  %s13429_s22 = int_to_ptr.vmem [resolvable:$true] %s434_s22 }
  0x13   : > { %s13431_s24 = sshll.u32 %s13313_s23, 4  ;;  %s15040_s2 = sld [smem:[#allocation55_spill]]  ;;  %s461_s24 = int_to_ptr.vmem [resolvable:$true] %s13431_s24 }
  0x14   : > { %p13425_p5 = pnand %p15007_p2, %p12755_p4 }
  0x16   : > { %p13441_p7 = pneg %p13425_p5 }
  0x19   : > { %s12910_s27 = scalar_lea.hbm %s15040_s2, 128 }
  0x1a   : > { %p12911_p6 = scmp.ne.s32.totalorder %s15040_s2, %s12910_s27  ;;  %p12917_p10 = scmp.lt.u32.totalorder %s12910_s27, %s15040_s2 }
  0x1c   : > { %p12913_p8 = pnand %p13441_p7, %p12911_p6 }
  0x1e   : > { %p12914_p9 = pneg %p12913_p8 }
  0x20   : > { %p12919_p11 = pnand %p12917_p10, %p12914_p9 }
  0x22   : > { %12922 = shalt.err (!%p12919_p11)
}
  0x23   : > { %s12923_s25 = scalar_lea.vmem %s13413_s15, 128  ;;  %p12931_p1 = scmp.lt.s32.totalorder %s13413_s15, %s13413_s15 }
  0x24   : > { %p12924_p12 = scmp.ne.s32.totalorder %s13413_s15, %s12923_s25  ;;  %p12932_p4 = scmp.lt.s32.totalorder %s12923_s25, %s12923_s25 }
  0x26   : > { %p12926_p13 = pnand %p12924_p12, %p13441_p7  ;;  %p12933_p6 = por %p12932_p4, %p12931_p1 }
  0x28   : > { %p12927_p0 = pneg %p12926_p13 }
  0x2a   : > { %p12934_p8 = pnand %p12933_p6, %p12927_p0 }
  0x2c   : > { %12937 = shalt.err (!%p12934_p8)
}
  0x2d   : > { %12761 = dma.hbm_to_vmem [thread:$0]  (!%p13425_p5), %s15040_s2, 128, %s13413_s15, [#allocation5]  }
  0x2e   : > { %s15042_s4 = sld [smem:[#allocation56_spill]] }
  0x34   : > { %s12938_s21 = scalar_lea.hbm %s15042_s4, 256 }
  0x35   : > { %p12939_p9 = scmp.ne.s32.totalorder %s15042_s4, %s12938_s21  ;;  %p12945_p12 = scmp.lt.u32.totalorder %s12938_s21, %s15042_s4 }
  0x37   : > { %p12941_p10 = pnand %p12939_p9, %p13441_p7 }
  0x39   : > { %p12942_p11 = pneg %p12941_p10 }
  0x3b   : > { %p12947_p13 = pnand %p12945_p12, %p12942_p11 }
  0x3d   : > { %12950 = shalt.err (!%p12947_p13)
}
  0x3e   : > { %s12951_s15 = scalar_lea.vmem %s13421_s19, 256  ;;  %p12959_p6 = scmp.lt.s32.totalorder %s13421_s19, %s13421_s19 }
  0x3f   : > { %p12952_p0 = scmp.ne.s32.totalorder %s13421_s19, %s12951_s15  ;;  %p12960_p8 = scmp.lt.s32.totalorder %s12951_s15, %s12951_s15 }
  0x41   : > { %p12954_p1 = pnand %p12952_p0, %p13441_p7  ;;  %p12961_p9 = por %p12960_p8, %p12959_p6 }
  0x43   : > { %p12955_p4 = pneg %p12954_p1 }
  0x45   : > { %p12962_p10 = pnand %p12961_p9, %p12955_p4 }
  0x47   : > { %12965 = shalt.err (!%p12962_p10)
}
  0x48   : > { %s13314_s29 = smov 128   ;;  %s13315_s14 = smov 8  }
  0x49   : > { %12767 = dma.hbm_to_vmem [thread:$0]  (!%p13425_p5), %s15042_s4, 256, %s13421_s19, [#allocation8], %s13314_s29, %s13314_s29, %s13315_s14  }
  0x4a   : > { %s12966_s21 = scalar_lea.hbm %s14997_s6, 3456 }
  0x4b   : > { %p12967_p11 = scmp.ne.s32.totalorder %s14997_s6, %s12966_s21  ;;  %p12973_p0 = scmp.lt.u32.totalorder %s12966_s21, %s14997_s6 }
  0x4d   : > { %p12969_p12 = pnand %p12967_p11, %p13441_p7 }
  0x4f   : > { %p12970_p13 = pneg %p12969_p12 }
  0x51   : > { %p12975_p1 = pnand %p12973_p0, %p12970_p13 }
  0x53   : > { %12978 = shalt.err (!%p12975_p1)
}
  0x54   : > { %s12979_s19 = scalar_lea.vmem %s13429_s22, 3456  ;;  %p12987_p9 = scmp.lt.s32.totalorder %s13429_s22, %s13429_s22 }
  0x55   : > { %p12980_p4 = scmp.ne.s32.totalorder %s13429_s22, %s12979_s19  ;;  %p12988_p10 = scmp.lt.s32.totalorder %s12979_s19, %s12979_s19 }
  0x57   : > { %p12982_p6 = pnand %p12980_p4, %p13441_p7  ;;  %p12989_p11 = por %p12988_p10, %p12987_p9 }
  0x59   : > { %p12983_p8 = pneg %p12982_p6 }
  0x5b   : > { %p12990_p12 = pnand %p12989_p11, %p12983_p8 }
  0x5d   : > { %12993 = shalt.err (!%p12990_p12)
}
  0x5e   : > { %12773 = dma.hbm_to_vmem [thread:$0]  (!%p13425_p5), %s14997_s6, 3456, %s13429_s22, [#allocation11], %s13314_s29, %s13314_s29, %s13315_s14  }
  0x5f   : > { %s12994_s30 = scalar_lea.hbm %s14999_s8, 4096 }
  0x60   : > { %p12995_p13 = scmp.ne.s32.totalorder %s14999_s8, %s12994_s30  ;;  %p13001_p4 = scmp.lt.u32.totalorder %s12994_s30, %s14999_s8 }
  0x62   : > { %p12997_p0 = pnand %p12995_p13, %p13441_p7 }
  0x64   : > { %p12998_p1 = pneg %p12997_p0 }
  0x66   : > { %p13003_p6 = pnand %p13001_p4, %p12998_p1 }
  0x68   : > { %13006 = shalt.err (!%p13003_p6)
}
  0x69   : > { %s13007_s19 = scalar_lea.vmem %s461_s24, 4096  ;;  %p13015_p11 = scmp.lt.s32.totalorder %s461_s24, %s461_s24 }
  0x6a   : > { %p13008_p8 = scmp.ne.s32.totalorder %s461_s24, %s13007_s19  ;;  %p13016_p12 = scmp.lt.s32.totalorder %s13007_s19, %s13007_s19 }
  0x6c   : > { %p13010_p9 = pnand %p13008_p8, %p13441_p7  ;;  %p13017_p2 = por %p13016_p12, %p13015_p11 }
  0x6e   : > { %p13011_p10 = pneg %p13010_p9 }
  0x70   : > { %p13018_p3 = pnand %p13017_p2, %p13011_p10 }
  0x72   : > { %13021 = shalt.err (!%p13018_p3)
}
  0x73   : > { %12779 = dma.hbm_to_vmem [thread:$0]  (!%p13425_p5), %s14999_s8, 4096, %s461_s24, [#allocation14], %s13314_s29, %s13314_s29, %s13315_s14  }
  0x74   : > { %s13316_s26 = smov [#allocation16]   ;;  %s13317_s28 = smov [#allocation19]  }
  0x75   : > { %s486_s27 = sshll.u32 %s13316_s26, 4  ;;  %s512_s30 = sshll.u32 %s13317_s28, 4  ;;  %s487_s27 = int_to_ptr.vmem [resolvable:$true] %s486_s27  ;;  %s513_s30 = int_to_ptr.vmem [resolvable:$true] %s512_s30 }
  0x76   : > { %s13022_s25 = scalar_lea.hbm %s15001_s10, 55296 }
  0x77   : > { %p13023_p2 = scmp.ne.s32.totalorder %s15001_s10, %s13022_s25  ;;  %p13029_p0 = scmp.lt.u32.totalorder %s13022_s25, %s15001_s10 }
  0x79   : > { %p13025_p3 = pnand %p13023_p2, %p13441_p7 }
  0x7b   : > { %p13026_p13 = pneg %p13025_p3 }
  0x7d   : > { %p13031_p1 = pnand %p13029_p0, %p13026_p13 }
  0x7f   : > { %13034 = shalt.err (!%p13031_p1)
}
  0x80   : > { %s13035_s24 = scalar_lea.vmem %s487_s27, 55296  ;;  %p13043_p9 = scmp.lt.s32.totalorder %s487_s27, %s487_s27 }
  0x81   : > { %p13036_p4 = scmp.ne.s32.totalorder %s487_s27, %s13035_s24  ;;  %p13044_p10 = scmp.lt.s32.totalorder %s13035_s24, %s13035_s24 }
  0x83   : > { %p13038_p6 = pnand %p13036_p4, %p13441_p7  ;;  %p13045_p11 = por %p13044_p10, %p13043_p9 }
  0x85   : > { %p13039_p8 = pneg %p13038_p6 }
  0x87   : > { %p13046_p12 = pnand %p13045_p11, %p13039_p8 }
  0x89   : > { %13049 = shalt.err (!%p13046_p12)
}
  0x8a   : > { %12785 = dma.hbm_to_vmem [thread:$0]  (!%p13425_p5), %s15001_s10, 55296, %s487_s27, [#allocation17], %s13314_s29, %s13314_s29, %s13315_s14  }
  0x8b   : > { %s13050_s21 = scalar_lea.hbm %s15003_s12, 384 }
  0x8c   : > { %p13051_p2 = scmp.ne.s32.totalorder %s15003_s12, %s13050_s21  ;;  %p13057_p0 = scmp.lt.u32.totalorder %s13050_s21, %s15003_s12 }
  0x8e   : > { %p13053_p3 = pnand %p13051_p2, %p13441_p7 }
  0x90   : > { %p13054_p13 = pneg %p13053_p3 }
  0x92   : > { %p13059_p1 = pnand %p13057_p0, %p13054_p13 }
  0x94   : > { %13062 = shalt.err (!%p13059_p1)
}
  0x95   : > { %s13063_s22 = scalar_lea.vmem %s513_s30, 384  ;;  %p13071_p9 = scmp.lt.s32.totalorder %s513_s30, %s513_s30 }
  0x96   : > { %p13064_p4 = scmp.ne.s32.totalorder %s513_s30, %s13063_s22  ;;  %p13072_p10 = scmp.lt.s32.totalorder %s13063_s22, %s13063_s22 }
  0x98   : > { %p13066_p6 = pnand %p13064_p4, %p13441_p7  ;;  %p13073_p11 = por %p13072_p10, %p13071_p9 }
  0x9a   : > { %p13067_p8 = pneg %p13066_p6 }
  0x9c   : > { %p13074_p12 = pnand %p13073_p11, %p13067_p8 }
  0x9e   : > { %13077 = shalt.err (!%p13074_p12)
}
  0x9f   : > { %12791 = dma.hbm_to_vmem [thread:$0]  (!%p13425_p5), %s15003_s12, 384, %s513_s30, [#allocation20], %s13314_s29, %s13314_s29, %s13315_s14  }
  0xa0   : > { %s13318_s4 = smov [#allocation2]   ;;  %s13319_s26 = smov [#allocation6]  }
  0xa1   : > { %s373_s2 = sshll.u32 %s13318_s4, 4  ;;  %s398_s28 = sshll.u32 %s13319_s26, 4  ;;  %s374_s2 = int_to_ptr.vmem [resolvable:$true] %s373_s2  ;;  %s399_s28 = int_to_ptr.vmem [resolvable:$true] %s398_s28 }
  0xa2   : > { %s13078_s25 = scalar_lea.hbm %s14992_s1, 9216 }
  0xa3   : > { %p13079_p2 = scmp.ne.s32.totalorder %s14992_s1, %s13078_s25  ;;  %p13085_p0 = scmp.lt.u32.totalorder %s13078_s25, %s14992_s1 }
  0xa5   : > { %p13081_p3 = pnand %p13079_p2, %p13441_p7 }
  0xa7   : > { %p13082_p13 = pneg %p13081_p3 }
  0xa9   : > { %p13087_p1 = pnand %p13085_p0, %p13082_p13 }
  0xab   : > { %13090 = shalt.err (!%p13087_p1)
}
  0xac   : > { %s13091_s30 = scalar_lea.vmem %s374_s2, 9216  ;;  %p13099_p9 = scmp.lt.s32.totalorder %s374_s2, %s374_s2 }
  0xad   : > { %p13092_p4 = scmp.ne.s32.totalorder %s374_s2, %s13091_s30  ;;  %p13100_p10 = scmp.lt.s32.totalorder %s13091_s30, %s13091_s30 }
  0xaf   : > { %p13094_p6 = pnand %p13092_p4, %p13441_p7  ;;  %p13101_p11 = por %p13100_p10, %p13099_p9 }
  0xb1   : > { %p13095_p8 = pneg %p13094_p6 }
  0xb3   : > { %p13102_p12 = pnand %p13101_p11, %p13095_p8 }
  0xb5   : > { %13105 = shalt.err (!%p13102_p12)
}
  0xb6   : > { %12758 = dma.hbm_to_vmem [thread:$0]  (!%p13425_p5), %s14992_s1, 9216, %s374_s2, [#allocation3], %s13314_s29, %s13314_s29, %s13315_s14  }
  0xb7   : > { %s13106_s23 = scalar_lea.hbm %s14994_s3, 16 }
  0xb8   : > { %p13107_p2 = scmp.ne.s32.totalorder %s14994_s3, %s13106_s23  ;;  %p13113_p0 = scmp.lt.u32.totalorder %s13106_s23, %s14994_s3 }
  0xba   : > { %p13109_p3 = pnand %p13107_p2, %p13441_p7 }
  0xbc   : > { %p13110_p13 = pneg %p13109_p3 }
  0xbe   : > { %p13115_p1 = pnand %p13113_p0, %p13110_p13 }
  0xc0   : > { %13118 = shalt.err (!%p13115_p1)
}
  0xc1   : > { %s13119_s27 = scalar_lea.vmem %s399_s28, 16  ;;  %s13126_s29 = scalar_lea.vmem %s399_s28, 32 }
  0xc2   : > { %p13120_p4 = scmp.ne.s32.totalorder %s399_s28, %s13119_s27  ;;  %p13127_p9 = scmp.lt.s32.totalorder %s399_s28, %s399_s28 }
  0xc3   : > { %p13128_p10 = scmp.lt.s32.totalorder %s13126_s29, %s13119_s27 }
  0xc4   : > { %p13122_p6 = pnand %p13120_p4, %p13441_p7 }
  0xc5   : > { %p13129_p11 = por %p13128_p10, %p13127_p9 }
  0xc6   : > { %p13123_p8 = pneg %p13122_p6 }
  0xc8   : > { %p13130_p12 = pnand %p13129_p11, %p13123_p8 }
  0xca   : > { %13133 = shalt.err (!%p13130_p12)
}
  0xcb   : > { %12764 = dma.hbm_to_vmem [thread:$0]  (!%p13425_p5), %s14994_s3, 16, %s399_s28, [#allocation5]  }
  0xcc   : > { %s13320_s30 = smov [#allocation9]   ;;  %s13134_s21 = scalar_lea.hbm %s14996_s5, 32 }
  0xcd   : > { %s421_s24 = sshll.u32 %s13320_s30, 4  ;;  %p13135_p2 = scmp.ne.s32.totalorder %s14996_s5, %s13134_s21  ;;  %s422_s24 = int_to_ptr.vmem [resolvable:$true] %s421_s24 }
  0xce   : > { %p13141_p0 = scmp.lt.u32.totalorder %s13134_s21, %s14996_s5 }
  0xcf   : > { %p13137_p3 = pnand %p13135_p2, %p13441_p7 }
  0xd1   : > { %p13138_p13 = pneg %p13137_p3 }
  0xd3   : > { %p13143_p1 = pnand %p13141_p0, %p13138_p13 }
  0xd5   : > { %13146 = shalt.err (!%p13143_p1)
}
  0xd6   : > { %s13147_s28 = scalar_lea.vmem %s422_s24, 32  ;;  %p13155_p9 = scmp.lt.s32.totalorder %s422_s24, %s422_s24 }
  0xd7   : > { %p13148_p4 = scmp.ne.s32.totalorder %s422_s24, %s13147_s28  ;;  %p13156_p10 = scmp.lt.s32.totalorder %s13147_s28, %s13147_s28 }
  0xd9   : > { %p13150_p6 = pnand %p13148_p4, %p13441_p7  ;;  %p13157_p11 = por %p13156_p10, %p13155_p9 }
  0xdb   : > { %p13151_p8 = pneg %p13150_p6 }
  0xdd   : > { %p13158_p12 = pnand %p13157_p11, %p13151_p8 }
  0xdf   : > { %13161 = shalt.err (!%p13158_p12)
}
  0xe0   : > { %s13321_s22 = smov 16   ;;  %s13322_s27 = smov 1  }
  0xe1   : > { %12770 = dma.hbm_to_vmem [thread:$0]  (!%p13425_p5), %s14996_s5, 32, %s422_s24, [#allocation8], %s13321_s22, %s13321_s22, %s13322_s27  }
  0xe2   : > { %s13323_s2 = smov [#allocation12]   ;;  %s13324_s4 = smov [#allocation15]  }
  0xe3   : > { %s447_s30 = sshll.u32 %s13323_s2, 4  ;;  %s473_s26 = sshll.u32 %s13324_s4, 4  ;;  %s448_s30 = int_to_ptr.vmem [resolvable:$true] %s447_s30  ;;  %s13638_s26 = int_to_ptr.vmem [resolvable:$true] %s473_s26 }
  0xe4   : > { %s13162_s25 = scalar_lea.hbm %s14998_s7, 48 }
  0xe5   : > { %p13163_p2 = scmp.ne.s32.totalorder %s14998_s7, %s13162_s25  ;;  %p13169_p0 = scmp.lt.u32.totalorder %s13162_s25, %s14998_s7 }
  0xe7   : > { %p13165_p3 = pnand %p13163_p2, %p13441_p7 }
  0xe9   : > { %p13166_p13 = pneg %p13165_p3 }
  0xeb   : > { %p13171_p1 = pnand %p13169_p0, %p13166_p13 }
  0xed   : > { %13174 = shalt.err (!%p13171_p1)
}
  0xee   : > { %s13175_s29 = scalar_lea.vmem %s448_s30, 48  ;;  %s13182_s14 = scalar_lea.vmem %s448_s30, 64 }
  0xef   : > { %p13176_p4 = scmp.ne.s32.totalorder %s448_s30, %s13175_s29  ;;  %p13183_p9 = scmp.lt.s32.totalorder %s448_s30, %s448_s30 }
  0xf0   : > { %p13184_p10 = scmp.lt.s32.totalorder %s13182_s14, %s13175_s29 }
  0xf1   : > { %p13178_p6 = pnand %p13176_p4, %p13441_p7 }
  0xf2   : > { %p13185_p11 = por %p13184_p10, %p13183_p9 }
  0xf3   : > { %p13179_p8 = pneg %p13178_p6 }
  0xf5   : > { %p13186_p12 = pnand %p13185_p11, %p13179_p8 }
  0xf7   : > { %13189 = shalt.err (!%p13186_p12)
}
  0xf8   : > { %12776 = dma.hbm_to_vmem [thread:$0]  (!%p13425_p5), %s14998_s7, 48, %s448_s30, [#allocation11], %s13321_s22, %s13321_s22, %s13322_s27  }
  0xf9   : > { %s13190_s25 = scalar_lea.hbm %s15000_s9, 32 }
  0xfa   : > { %p13191_p2 = scmp.ne.s32.totalorder %s15000_s9, %s13190_s25  ;;  %p13197_p0 = scmp.lt.u32.totalorder %s13190_s25, %s15000_s9 }
  0xfc   : > { %p13193_p3 = pnand %p13191_p2, %p13441_p7 }
  0xfe   : > { %p13194_p13 = pneg %p13193_p3 }
 0x100   : > { %p13199_p1 = pnand %p13197_p0, %p13194_p13 }
 0x102   : > { %13202 = shalt.err (!%p13199_p1)
}
 0x103   : > { %s13203_s30 = scalar_lea.vmem %s13638_s26, 32  ;;  %p13211_p9 = scmp.lt.s32.totalorder %s13638_s26, %s13638_s26 }
 0x104   : > { %p13204_p4 = scmp.ne.s32.totalorder %s13638_s26, %s13203_s30  ;;  %p13212_p10 = scmp.lt.s32.totalorder %s13203_s30, %s13203_s30 }
 0x106   : > { %p13206_p6 = pnand %p13204_p4, %p13441_p7  ;;  %p13213_p11 = por %p13212_p10, %p13211_p9 }
 0x108   : > { %p13207_p8 = pneg %p13206_p6 }
 0x10a   : > { %p13214_p12 = pnand %p13213_p11, %p13207_p8 }
 0x10c   : > { %13217 = shalt.err (!%p13214_p12)
}
 0x10d   : > { %12782 = dma.hbm_to_vmem [thread:$0]  (!%p13425_p5), %s15000_s9, 32, %s13638_s26, [#allocation14], %s13321_s22, %s13321_s22, %s13322_s27  }
 0x10e   : > { %s13325_s2 = smov [#allocation18]   ;;  %s13326_s21 = smov [#allocation21]  }
 0x10f   : > { %s499_s4 = sshll.u32 %s13325_s2, 4  ;;  %s526_s23 = sshll.u32 %s13326_s21, 4  ;;  %s500_s4 = int_to_ptr.vmem [resolvable:$true] %s499_s4  ;;  %s13687_s23 = int_to_ptr.vmem [resolvable:$true] %s526_s23 }
 0x110   : > { %s13218_s19 = scalar_lea.hbm %s15002_s11, 48 }
 0x111   : > { %p13219_p2 = scmp.ne.s32.totalorder %s15002_s11, %s13218_s19  ;;  %p13225_p0 = scmp.lt.u32.totalorder %s13218_s19, %s15002_s11 }
 0x113   : > { %p13221_p3 = pnand %p13219_p2, %p13441_p7 }
 0x115   : > { %p13222_p13 = pneg %p13221_p3 }
 0x117   : > { %p13227_p1 = pnand %p13225_p0, %p13222_p13 }
 0x119   : > { %13230 = shalt.err (!%p13227_p1)
}
 0x11a   : > { %s13231_s29 = scalar_lea.vmem %s500_s4, 48  ;;  %s13238_s14 = scalar_lea.vmem %s500_s4, 64 }
 0x11b   : > { %p13232_p4 = scmp.ne.s32.totalorder %s500_s4, %s13231_s29  ;;  %p13239_p9 = scmp.lt.s32.totalorder %s500_s4, %s500_s4 }
 0x11c   : > { %p13240_p10 = scmp.lt.s32.totalorder %s13238_s14, %s13231_s29 }
 0x11d   : > { %p13234_p6 = pnand %p13232_p4, %p13441_p7 }
 0x11e   : > { %p13241_p11 = por %p13240_p10, %p13239_p9 }
 0x11f   : > { %p13235_p8 = pneg %p13234_p6 }
 0x121   : > { %p13242_p12 = pnand %p13241_p11, %p13235_p8 }
 0x123   : > { %13245 = shalt.err (!%p13242_p12)
}
 0x124   : > { %12788 = dma.hbm_to_vmem [thread:$0]  (!%p13425_p5), %s15002_s11, 48, %s500_s4, [#allocation17], %s13321_s22, %s13321_s22, %s13322_s27  }
 0x125   : > { %s13246_s19 = scalar_lea.hbm %s15004_s13, 16 }
 0x126   : > { %p13247_p2 = scmp.ne.s32.totalorder %s15004_s13, %s13246_s19  ;;  %p13253_p0 = scmp.lt.u32.totalorder %s13246_s19, %s15004_s13 }
 0x128   : > { %p13249_p3 = pnand %p13247_p2, %p13441_p7 }
 0x12a   : > { %p13250_p13 = pneg %p13249_p3 }
 0x12c   : > { %p13255_p1 = pnand %p13253_p0, %p13250_p13 }
 0x12e   : > { %13258 = shalt.err (!%p13255_p1)
}
 0x12f   : > { %s13259_s22 = scalar_lea.vmem %s13687_s23, 16  ;;  %s13266_s27 = scalar_lea.vmem %s13687_s23, 32 }
 0x130   : > { %p13260_p4 = scmp.ne.s32.totalorder %s13687_s23, %s13259_s22  ;;  %p13267_p9 = scmp.lt.s32.totalorder %s13687_s23, %s13687_s23 }
 0x131   : > { %p13268_p10 = scmp.lt.s32.totalorder %s13266_s27, %s13259_s22 }
 0x132   : > { %p13262_p6 = pnand %p13260_p4, %p13441_p7 }
 0x133   : > { %p13269_p11 = por %p13268_p10, %p13267_p9 }
 0x134   : > { %p13263_p8 = pneg %p13262_p6 }
 0x136   : > { %p13270_p12 = pnand %p13269_p11, %p13263_p8 }
 0x138   : > { %13273 = shalt.err (!%p13270_p12)
}
 0x139   : > { %12794 = dma.hbm_to_vmem [thread:$0]  (!%p13425_p5), %s15004_s13, 16, %s13687_s23, [#allocation20]  }
 0x13a   : > { %p15043_p2 = scmp.ne.s32.totalorder %s15038_s17, 0 }
 0x13c   : > { %547 = sbr.rel (%p15043_p2) target bundleno = 3257 (0xcb9), region = 76 }
 0x143   : > { %p15044_p7 = scmp.eq.s32.totalorder %s13408_s16, 0 }
 0x145   : > { %13279 = dma.done.wait (%p15044_p7), [#allocation3], 9216   ;;  %p15045_p3 = pmov %p15044_p7 }
 0x147   : > { %13281 = vsyncadd (%p15045_p3), [#allocation3], 4294958080  ;;  %p15046_p13 = pmov %p15045_p3 }
 0x148   : > { %p15047_p0 = pmov %p15045_p3 }
 0x149   : > { %13283 = dma.done.wait (%p15046_p13), [#allocation5], 144  }
 0x14a   : > { %13285 = vsyncadd (%p15047_p0), [#allocation5], 4294967152  ;;  %p15048_p1 = pmov %p15047_p0 }
 0x14b   : > { %p15049_p5 = pmov %p15047_p0 }
 0x14c   : > { %13287 = dma.done.wait (%p15048_p1), [#allocation8], 288  }
 0x14d   : > { %13289 = vsyncadd (%p15049_p5), [#allocation8], 4294967008  ;;  %p15050_p4 = pmov %p15047_p0 }
 0x14e   : > { %p15051_p6 = pmov %p15047_p0 }
 0x14f   : > { %13291 = dma.done.wait (%p15050_p4), [#allocation11], 3504  }
 0x150   : > { %13293 = vsyncadd (%p15051_p6), [#allocation11], 4294963792  ;;  %p15052_p8 = pmov %p15047_p0 }
 0x151   : > { %p15053_p9 = pmov %p15047_p0 }
 0x152   : > { %13295 = dma.done.wait (%p15052_p8), [#allocation14], 4128  }
 0x153   : > { %13297 = vsyncadd (%p15053_p9), [#allocation14], 4294963168  ;;  %p15054_p10 = pmov %p15047_p0 }
 0x154   : > { %p15055_p11 = pmov %p15047_p0 }
 0x155   : > { %13299 = dma.done.wait (%p15054_p10), [#allocation17], 55344  }
 0x156   : > { %13301 = vsyncadd (%p15055_p11), [#allocation17], 4294911952  ;;  %p15056_p12 = pmov %p15047_p0 }
 0x157   : > { %p15057_p2 = pmov %p15047_p0 }
 0x158   : > { %13303 = dma.done.wait (%p15056_p12), [#allocation20], 400  }
 0x159   : > { %13305 = vsyncadd (%p15057_p2), [#allocation20], 4294966896  ;;  %p641_p7 = scmp.lt.s32.totalorder %s13408_s16, 1  ;;  %vm667_vm0 = vcmask 64512   ;;  %v659_v0 = vld [vmem:[#allocation4] sm:$0xff]  ;;  %v843_v9 = vld [vmem:[#allocation7] sm:$0xff] }
 0x15a   : > { %9715 = vmatprep.subr.mxu0 %v659_v0  ;;  %9729 = vmatprep.subr.mxu1 %v843_v9  ;;  %v8407_v10 = vld [vmem:[#allocation6] ss:$0 sm:$0xff]  ;;  %v13790_v43 = vld [vmem:[#allocation2] sm:$0xff]  ;;  %vm1014_vm9 = vcmask 523264   ;;  %v8418_v44 = vld [vmem:[#allocation9] ss:$0 sm:$0xff] }
 0x15b   : > { %s15111_s16 = smov (!%p641_p7, %s13408_s16), 1  ;;  %9716 = vmatpush3.msra.mxu0 %v659_v0  ;;  %9730 = vmatpush3.msra.mxu1 %v843_v9  ;;  %s15108_s21 = sld [smem:[#allocation57_spill]] }
 0x15c   : > { %s8723_s17 = sshll.u32 %s15111_s16, 6 }
 0x15d   : > { %s645_s23 = scalar_lea.vmem %s14991_s0, %s8723_s17 }
 0x15e   : > { %v651_v1 = vld [vmem:[%s645_s23] sm:$0xff]  ;;  %v652_v2 = vld [vmem:[%s645_s23 + $0x8] sm:$0xff]  ;;  %v653_v3 = vld [vmem:[%s645_s23 + $0x10] sm:$0xff] }
 0x15f   : > { %9717 = vmatprep.mubr.msk.f32.mxu0 %vm667_vm0, %v651_v1  ;;  %v654_v4 = vld [vmem:[%s645_s23 + $0x18] sm:$0xff]  ;;  %v655_v5 = vld [vmem:[%s645_s23 + $0x20] sm:$0xff]  ;;  %v656_v6 = vld [vmem:[%s645_s23 + $0x28] sm:$0xff] }
 0x160   : > { %9718 = vmatmul.mubr.msk.f32.vlgmr.msra.gmra.mrb[0].mxu0 %vm667_vm0, %v652_v2  ;;  %v657_v7 = vld [vmem:[%s645_s23 + $0x30] sm:$0xff]  ;;  %v658_v8 = vld [vmem:[%s645_s23 + $0x38] sm:$0xff] }
 0x161   : > { %9720 = vmatprep.mubr.msk.f32.mxu0 %vm667_vm0, %v653_v3  ;;  %s14970_s25 = scalar_lea.vmem %s15108_s21, %s8723_s17 }
 0x164   : > { %9721 = vmatmul.mubr.msk.f32.gmra.mrb[2].mxu0 %vm667_vm0, %v654_v4 }
 0x165   : > { %9723 = vmatprep.mubr.msk.f32.mxu0 %vm667_vm0, %v655_v5 }
 0x168   : > { %9724 = vmatmul.mubr.msk.f32.gmra.mrb[4].mxu0 %vm667_vm0, %v656_v6 }
 0x169   : > { %9726 = vmatprep.mubr.msk.f32.mxu0 %vm667_vm0, %v657_v7 }
 0x16c   : > { %9727 = vmatmul.mubr.msk.f32.gmra.mrb[6].mxu0 %vm667_vm0, %v658_v8 }
 0x233   : > { %v9719_v11 = vpop.f32.mrb[0].mxu0 }
 0x234   : > { %v764_v12 = vadd.f32 %v9719_v11, %v8407_v10  ;;  %v758_v13 = vpop.f32.mrb[1].mxu0 }
 0x235   : > { %v759_v14 = vadd.f32 %v8407_v10, %v758_v13 }
 0x236   : > { %v806_v15 = vmul.f32 0.2, %v764_v12  ;;  %vm798_vm1 = vcmp.ge.f32.partialorder %v764_v12, 0.0 }
 0x237   : > { %v9722_v16 = vpop.f32.mrb[2].mxu0  ;;  %vm797_vm2 = vcmp.ge.f32.partialorder %v759_v14, 0.0  ;;  %v805_v17 = vmul.f32 0.2, %v759_v14 }
 0x238   : > { %v774_v18 = vadd.f32 %v9722_v16, %v8407_v10  ;;  %v768_v19 = vpop.f32.mrb[3].mxu0  ;;  %v814_v23 = vsel %vm798_vm1, %v764_v12, %v806_v15 }
 0x239   : > { %v769_v20 = vadd.f32 %v8407_v10, %v768_v19  ;;  %v813_v21 = vsel %vm797_vm2, %v759_v14, %v805_v17  ;;  %v13834_v17 = vld [vmem:[#allocation2 + $0x8] sm:$0xff]  ;;  %v13844_v19 = vld [vmem:[#allocation2 + $0x18] sm:$0xff] }
 0x23a   : > { %v808_v22 = vmul.f32 0.2, %v774_v18  ;;  %9731 = vmatprep.mubr.msk.f32.mxu1 %vm667_vm0, %v813_v21  ;;  %vm800_vm3 = vcmp.ge.f32.partialorder %v774_v18, 0.0  ;;  %v13854_v21 = vld [vmem:[#allocation2 + $0x28] sm:$0xff] }
 0x23b   : > { %vm799_vm4 = vcmp.ge.f32.partialorder %v769_v20, 0.0  ;;  %v807_v24 = vmul.f32 0.2, %v769_v20  ;;  %v9725_v25 = vpop.f32.mrb[4].mxu0  ;;  %9732 = vmatmul.mubr.msk.f32.vlgmr.msra.gmra.mrb[0].mxu1 %vm667_vm0, %v814_v23  ;;  %v13864_v23 = vld [vmem:[#allocation2 + $0x38] sm:$0xff] }
 0x23c   : > { %v784_v26 = vadd.f32 %v9725_v25, %v8407_v10  ;;  %v778_v27 = vpop.f32.mrb[5].mxu0  ;;  %v816_v31 = vsel %vm800_vm3, %v774_v18, %v808_v22  ;;  %v13837_v18 = vld [vmem:[#allocation2 + $0x10] sm:$0xff]  ;;  %v13874_v25 = vld [vmem:[#allocation2 + $0x48] sm:$0xff] }
 0x23d   : > { %v779_v28 = vadd.f32 %v8407_v10, %v778_v27  ;;  %v815_v29 = vsel %vm799_vm4, %v769_v20, %v807_v24  ;;  %v13847_v20 = vld [vmem:[#allocation2 + $0x20] sm:$0xff]  ;;  %v13857_v22 = vld [vmem:[#allocation2 + $0x30] sm:$0xff]  ;;  %v13884_v27 = vld [vmem:[#allocation2 + $0x58] sm:$0xff] }
 0x23e   : > { %v810_v30 = vmul.f32 0.2, %v784_v26  ;;  %9734 = vmatprep.mubr.msk.f32.mxu1 %vm667_vm0, %v815_v29  ;;  %vm802_vm5 = vcmp.ge.f32.partialorder %v784_v26, 0.0  ;;  %v13867_v24 = vld [vmem:[#allocation2 + $0x40] sm:$0xff]  ;;  %v13894_v29 = vld [vmem:[#allocation2 + $0x68] sm:$0xff] }
 0x23f   : > { %vm801_vm6 = vcmp.ge.f32.partialorder %v779_v28, 0.0  ;;  %v809_v32 = vmul.f32 0.2, %v779_v28  ;;  %v9728_v33 = vpop.f32.mrb[6].mxu0  ;;  %9735 = vmatmul.mubr.msk.f32.gmra.mrb[2].mxu1 %vm667_vm0, %v816_v31  ;;  %v13904_v31 = vld [vmem:[#allocation2 + $0x78] sm:$0xff] }
 0x240   : > { %v794_v34 = vadd.f32 %v9728_v33, %v8407_v10  ;;  %v788_v35 = vpop.f32.mrb[7].mxu0  ;;  %v818_v39 = vsel %vm802_vm5, %v784_v26, %v810_v30  ;;  %v13877_v26 = vld [vmem:[#allocation2 + $0x50] sm:$0xff]  ;;  %v13914_v33 = vld [vmem:[#allocation2 + $0x88] sm:$0xff] }
 0x241   : > { %v789_v36 = vadd.f32 %v8407_v10, %v788_v35  ;;  %v817_v37 = vsel %vm801_vm6, %v779_v28, %v809_v32  ;;  %v13887_v28 = vld [vmem:[#allocation2 + $0x60] sm:$0xff]  ;;  %v13897_v30 = vld [vmem:[#allocation2 + $0x70] sm:$0xff]  ;;  %v13924_v35 = vld [vmem:[#allocation2 + $0x98] sm:$0xff] }
 0x242   : > { %v812_v38 = vmul.f32 0.2, %v794_v34  ;;  %9737 = vmatprep.mubr.msk.f32.mxu1 %vm667_vm0, %v817_v37  ;;  %vm804_vm7 = vcmp.ge.f32.partialorder %v794_v34, 0.0  ;;  %v13907_v32 = vld [vmem:[#allocation2 + $0x80] sm:$0xff]  ;;  %v13934_v37 = vld [vmem:[#allocation2 + $0xa8] sm:$0xff] }
 0x243   : > { %vm803_vm8 = vcmp.ge.f32.partialorder %v789_v36, 0.0  ;;  %v811_v40 = vmul.f32 0.2, %v789_v36  ;;  %9738 = vmatmul.mubr.msk.f32.gmra.mrb[4].mxu1 %vm667_vm0, %v818_v39  ;;  %v13944_v39 = vld [vmem:[#allocation2 + $0xb8] sm:$0xff] }
 0x244   : > { %v820_v42 = vsel %vm804_vm7, %v794_v34, %v812_v38  ;;  %v13917_v34 = vld [vmem:[#allocation2 + $0x90] sm:$0xff] }
 0x245   : > { %v819_v41 = vsel %vm803_vm8, %v789_v36, %v811_v40  ;;  %v13927_v36 = vld [vmem:[#allocation2 + $0xa0] sm:$0xff]  ;;  %v13937_v38 = vld [vmem:[#allocation2 + $0xb0] sm:$0xff] }
 0x246   : > { %9740 = vmatprep.mubr.msk.f32.mxu1 %vm667_vm0, %v819_v41  ;;  %v13947_v40 = vld [vmem:[#allocation2 + $0xc0] sm:$0xff]  ;;  %v13954_v41 = vld [vmem:[#allocation2 + $0xc8] sm:$0xff] }
 0x247   : > { %9741 = vmatmul.mubr.msk.f32.gmra.mrb[6].mxu1 %vm667_vm0, %v820_v42  ;;  %v13957_v42 = vld [vmem:[#allocation2 + $0xd0] sm:$0xff] }
 0x248   : > { %9759 = vmatprep.mubr.msk.f32.mxu1 %vm1014_vm9, %v13790_v43 }
 0x30e   : > { %v9733_v45 = vpop.f32.mrb[0].mxu1 }
 0x30f   : > { %v947_v46 = vadd.f32 %v9733_v45, %v8418_v44  ;;  %v941_v47 = vpop.f32.mrb[1].mxu1  ;;  %v13967_v45 = vld [vmem:[#allocation2 + $0xe0] sm:$0xff] }
 0x310   : > { %v942_v48 = vadd.f32 %v8418_v44, %v941_v47  ;;  %v13977_v47 = vld [vmem:[#allocation2 + $0xf0] sm:$0xff] }
 0x311   : > { %vm981_vm10 = vcmp.ge.f32.partialorder %v947_v46, 0.0  ;;  %v989_v49 = vmul.f32 0.2, %v947_v46 }
 0x312   : > { %vm980_vm11 = vcmp.ge.f32.partialorder %v942_v48, 0.0  ;;  %v988_v50 = vmul.f32 0.2, %v942_v48  ;;  %v9736_v51 = vpop.f32.mrb[2].mxu1 }
 0x313   : > { %v13794_v52 = vsel %vm981_vm10, %v947_v46, %v989_v49  ;;  %v957_v53 = vadd.f32 %v9736_v51, %v8418_v44  ;;  %v951_v54 = vpop.f32.mrb[3].mxu1  ;;  %v13974_v46 = vld [vmem:[#allocation2 + $0xe8] sm:$0xff]  ;;  %v13987_v49 = vld [vmem:[#allocation2 + $0x140] sm:$0xff]  ;;  %v13997_v51 = vld [vmem:[#allocation2 + $0x150] sm:$0xff] }
 0x314   : > { %v13796_v55 = vsel %vm980_vm11, %v942_v48, %v988_v50  ;;  %v952_v56 = vadd.f32 %v8418_v44, %v951_v54  ;;  %v13984_v48 = vld [vmem:[#allocation2 + $0xf8] sm:$0xff]  ;;  %v13994_v50 = vld [vmem:[#allocation2 + $0x148] sm:$0xff]  ;;  %v14007_v54 = vld [vmem:[#allocation2 + $0x160] sm:$0xff] }
 0x315   : > { %v13800_v57 = vpack.c.bf16 %v13794_v52, %v13796_v55  ;;  %vm983_vm12 = vcmp.ge.f32.partialorder %v957_v53, 0.0  ;;  %v991_v58 = vmul.f32 0.2, %v957_v53 }
 0x316   : > { %vm982_vm13 = vcmp.ge.f32.partialorder %v952_v56, 0.0  ;;  %v990_v59 = vmul.f32 0.2, %v952_v56  ;;  %v9739_v60 = vpop.f32.mrb[4].mxu1 }
 0x317   : > { %v13802_v61 = vsel %vm983_vm12, %v957_v53, %v991_v58  ;;  %v967_v62 = vadd.f32 %v9739_v60, %v8418_v44  ;;  %v961_v63 = vpop.f32.mrb[5].mxu1  ;;  %11464 = vmatprep.subr.bf16.mxu1 %v13800_v57  ;;  %v14004_v53 = vld [vmem:[#allocation2 + $0x158] sm:$0xff]  ;;  %v14017_v58 = vld [vmem:[#allocation2 + $0x170] sm:$0xff]  ;;  %v14027_v60 = vld [vmem:[#allocation2 + $0x180] sm:$0xff] }
 0x318   : > { %v13805_v0 = vsel %vm982_vm13, %v952_v56, %v990_v59  ;;  %v962_v1 = vadd.f32 %v8418_v44, %v961_v63  ;;  %11466 = vmatpush3.bf16.msra.mxu1 %v13800_v57  ;;  %v14014_v56 = vld [vmem:[#allocation2 + $0x168] sm:$0xff]  ;;  %v14024_v59 = vld [vmem:[#allocation2 + $0x178] sm:$0xff]  ;;  %15059 = vst [vmem:[#allocation31_spill] sm:$0xff] %v14027_v60  ;;  %v14037_v63 = vld [vmem:[#allocation2 + $0x190] sm:$0xff] }
 0x319   : > { %v13810_v2 = vpack.c.bf16 %v13802_v61, %v13805_v0  ;;  %vm985_vm14 = vcmp.ge.f32.partialorder %v967_v62, 0.0  ;;  %v993_v3 = vmul.f32 0.2, %v967_v62  ;;  %15058 = vst [vmem:[#allocation30_spill] sm:$0xff] %v14024_v59  ;;  %15061 = vst [vmem:[#allocation33_spill] sm:$0xff] %v14037_v63 }
 0x31a   : > { %vm984_vm15 = vcmp.ge.f32.partialorder %v962_v1, 0.0  ;;  %v992_v4 = vmul.f32 0.2, %v962_v1  ;;  %v9742_v5 = vpop.f32.mrb[6].mxu1 }
 0x31b   : > { %v13812_v6 = vsel %vm985_vm14, %v967_v62, %v993_v3  ;;  %v977_v7 = vadd.f32 %v9742_v5, %v8418_v44  ;;  %v971_v8 = vpop.f32.mrb[7].mxu1  ;;  %11468 = vmatprep.subr.bf16.mxu1 %v13810_v2  ;;  %v14034_v62 = vld [vmem:[#allocation2 + $0x188] sm:$0xff]  ;;  %v14047_v3 = vld [vmem:[#allocation2 + $0x1a0] sm:$0xff]  ;;  %v14057_v5 = vld [vmem:[#allocation2 + $0x1b0] sm:$0xff] }
 0x31c   : > { %v13815_v9 = vsel %vm984_vm15, %v962_v1, %v992_v4  ;;  %v972_v10 = vadd.f32 %v8418_v44, %v971_v8  ;;  %11470 = vmatpush3.bf16.msra.mxu1 %v13810_v2  ;;  %v13964_v44 = vld [vmem:[#allocation2 + $0xd8] sm:$0xff]  ;;  %15060 = vst [vmem:[#allocation32_spill] sm:$0xff] %v14034_v62  ;;  %15063 = vst [vmem:[#allocation35_spill] sm:$0xff] %v14047_v3  ;;  %v14054_v4 = vld [vmem:[#allocation2 + $0x1a8] sm:$0xff] }
 0x31d   : > { %v13820_v11 = vpack.c.bf16 %v13812_v6, %v13815_v9  ;;  %vm987_vm1 = vcmp.ge.f32.partialorder %v977_v7, 0.0  ;;  %v995_v12 = vmul.f32 0.2, %v977_v7  ;;  %v14044_v1 = vld [vmem:[#allocation2 + $0x198] sm:$0xff]  ;;  %15064 = vst [vmem:[#allocation36_spill] sm:$0xff] %v14054_v4  ;;  %15065 = vst [vmem:[#allocation37_spill] sm:$0xff] %v14057_v5 }
 0x31e   : > { %vm986_vm2 = vcmp.ge.f32.partialorder %v972_v10, 0.0  ;;  %v994_v13 = vmul.f32 0.2, %v972_v10  ;;  %15062 = vst [vmem:[#allocation34_spill] sm:$0xff] %v14044_v1  ;;  %v14067_v8 = vld [vmem:[#allocation2 + $0x1c0] sm:$0xff] }
 0x31f   : > { %v13822_v14 = vsel %vm987_vm1, %v977_v7, %v995_v12  ;;  %11472 = vmatprep.subr.bf16.mxu1 %v13820_v11  ;;  %v14064_v7 = vld [vmem:[#allocation2 + $0x1b8] sm:$0xff]  ;;  %15067 = vst [vmem:[#allocation39_spill] sm:$0xff] %v14067_v8  ;;  %v14074_v12 = vld [vmem:[#allocation2 + $0x1c8] sm:$0xff] }
 0x320   : > { %v13825_v15 = vsel %vm986_vm2, %v972_v10, %v994_v13  ;;  %11474 = vmatpush3.bf16.msra.mxu1 %v13820_v11  ;;  %15066 = vst [vmem:[#allocation38_spill] sm:$0xff] %v14064_v7  ;;  %v1285_v10 = vld [vmem:[#allocation10 + $0x50] sm:$0xff]  ;;  %15068 = vst [vmem:[#allocation40_spill] sm:$0xff] %v14074_v12 }
 0x321   : > { %v13830_v16 = vpack.c.bf16 %v13822_v14, %v13825_v15  ;;  %v14077_v13 = vld [vmem:[#allocation2 + $0x1d0] sm:$0xff]  ;;  %9799 = vmatprep.subr.mxu0 %v1285_v10 }
 0x322   : > { %15069 = vst [vmem:[#allocation41_spill] sm:$0xff] %v14077_v13  ;;  %9800 = vmatpush3.msra.mxu0 %v1285_v10  ;;  %v14094_v10 = vld [vmem:[#allocation2 + $0x1e8] sm:$0xff] }
 0x323   : > { %11476 = vmatprep.subr.bf16.mxu1 %v13830_v16  ;;  %15072 = vst [vmem:[#allocation44_spill] sm:$0xff] %v14094_v10 }
 0x324   : > { %11478 = vmatpush3.bf16.msra.mxu1 %v13830_v16 }
 0x325   : > { %11480 = vmatprep.subr.bf16.mxu1 %v13800_v57 }
 0x327   : > { %9760 = vmatmul.mubr.msk.f32.vlgmr.msra.gmra.mrb[8].mxu1 %vm1014_vm9, %v13834_v17 }
 0x328   : > { %11482 = vmatpush3.bf16.msra.mxu1 %v13800_v57  ;;  %9762 = vmatprep.mubr.msk.f32.mxu1 %vm1014_vm9, %v13837_v18 }
 0x329   : > { %11484 = vmatprep.subr.bf16.mxu1 %v13810_v2 }
 0x32b   : > { %9763 = vmatmul.mubr.msk.f32.gmra.mrb[10].mxu1 %vm1014_vm9, %v13844_v19 }
 0x32c   : > { %11486 = vmatpush3.bf16.msra.mxu1 %v13810_v2  ;;  %9765 = vmatprep.mubr.msk.f32.mxu1 %vm1014_vm9, %v13847_v20 }
 0x32d   : > { %11488 = vmatprep.subr.bf16.mxu1 %v13820_v11 }
 0x32f   : > { %9766 = vmatmul.mubr.msk.f32.gmra.mrb[12].mxu1 %vm1014_vm9, %v13854_v21 }
 0x330   : > { %11490 = vmatpush3.bf16.msra.mxu1 %v13820_v11  ;;  %9768 = vmatprep.mubr.msk.f32.mxu1 %vm1014_vm9, %v13857_v22 }
 0x331   : > { %11492 = vmatprep.subr.bf16.mxu1 %v13830_v16 }
 0x333   : > { %9769 = vmatmul.mubr.msk.f32.gmra.mrb[14].mxu1 %vm1014_vm9, %v13864_v23 }
 0x334   : > { %11494 = vmatpush3.bf16.msra.mxu1 %v13830_v16  ;;  %9787 = vmatprep.mubr.msk.f32.mxu1 %vm1014_vm9, %v13867_v24 }
 0x335   : > { %11496 = vmatprep.subr.bf16.mxu1 %v13800_v57 }
 0x337   : > { %9788 = vmatmul.mubr.msk.f32.vlgmr.msra.gmra.mrb[16].mxu1 %vm1014_vm9, %v13874_v25 }
 0x338   : > { %11498 = vmatpush3.bf16.msra.mxu1 %v13800_v57  ;;  %9790 = vmatprep.mubr.msk.f32.mxu1 %vm1014_vm9, %v13877_v26 }
 0x339   : > { %11500 = vmatprep.subr.bf16.mxu1 %v13810_v2 }
 0x33b   : > { %9791 = vmatmul.mubr.msk.f32.gmra.mrb[18].mxu1 %vm1014_vm9, %v13884_v27 }
 0x33c   : > { %11502 = vmatpush3.bf16.msra.mxu1 %v13810_v2  ;;  %9793 = vmatprep.mubr.msk.f32.mxu1 %vm1014_vm9, %v13887_v28 }
 0x33d   : > { %11504 = vmatprep.subr.bf16.mxu1 %v13820_v11 }
 0x33f   : > { %9794 = vmatmul.mubr.msk.f32.gmra.mrb[20].mxu1 %vm1014_vm9, %v13894_v29 }
 0x340   : > { %11506 = vmatpush3.bf16.msra.mxu1 %v13820_v11  ;;  %9796 = vmatprep.mubr.msk.f32.mxu1 %vm1014_vm9, %v13897_v30 }
 0x341   : > { %11508 = vmatprep.subr.bf16.mxu1 %v13830_v16 }
 0x343   : > { %9797 = vmatmul.mubr.msk.f32.gmra.mrb[22].mxu1 %vm1014_vm9, %v13904_v31 }
 0x344   : > { %11510 = vmatpush3.bf16.msra.mxu1 %v13830_v16  ;;  %9843 = vmatprep.mubr.msk.f32.mxu1 %vm1014_vm9, %v13907_v32 }
 0x345   : > { %11512 = vmatprep.subr.bf16.mxu1 %v13800_v57 }
 0x347   : > { %9844 = vmatmul.mubr.msk.f32.vlgmr.msra.gmra.mrb[24].mxu1 %vm1014_vm9, %v13914_v33 }
 0x348   : > { %11514 = vmatpush3.bf16.msra.mxu1 %v13800_v57  ;;  %9846 = vmatprep.mubr.msk.f32.mxu1 %vm1014_vm9, %v13917_v34 }
 0x349   : > { %11516 = vmatprep.subr.bf16.mxu1 %v13810_v2 }
 0x34b   : > { %9847 = vmatmul.mubr.msk.f32.gmra.mrb[26].mxu1 %vm1014_vm9, %v13924_v35 }
 0x34c   : > { %11518 = vmatpush3.bf16.msra.mxu1 %v13810_v2  ;;  %9849 = vmatprep.mubr.msk.f32.mxu1 %vm1014_vm9, %v13927_v36 }
 0x34d   : > { %11520 = vmatprep.subr.bf16.mxu1 %v13820_v11 }
 0x34f   : > { %9850 = vmatmul.mubr.msk.f32.gmra.mrb[28].mxu1 %vm1014_vm9, %v13934_v37 }
 0x350   : > { %11522 = vmatpush3.bf16.msra.mxu1 %v13820_v11  ;;  %9852 = vmatprep.mubr.msk.f32.mxu1 %vm1014_vm9, %v13937_v38 }
 0x351   : > { %11524 = vmatprep.subr.bf16.mxu1 %v13830_v16 }
 0x353   : > { %9853 = vmatmul.mubr.msk.f32.gmra.mrb[30].mxu1 %vm1014_vm9, %v13944_v39 }
 0x354   : > { %11526 = vmatpush3.bf16.msra.mxu1 %v13830_v16  ;;  %9885 = vmatprep.mubr.msk.f32.mxu1 %vm1014_vm9, %v13947_v40 }
 0x355   : > { %11528 = vmatprep.subr.bf16.mxu1 %v13800_v57 }
 0x357   : > { %9886 = vmatmul.mubr.msk.f32.vlgmr.msra.gmra.mrb[32].mxu1 %vm1014_vm9, %v13954_v41 }
 0x358   : > { %11530 = vmatpush3.bf16.msra.mxu1 %v13800_v57  ;;  %9888 = vmatprep.mubr.msk.f32.mxu1 %vm1014_vm9, %v13957_v42 }
 0x359   : > { %11532 = vmatprep.subr.bf16.mxu1 %v13810_v2 }
 0x35b   : > { %9889 = vmatmul.mubr.msk.f32.gmra.mrb[34].mxu1 %vm1014_vm9, %v13964_v44 }
 0x35c   : > { %11534 = vmatpush3.bf16.msra.mxu1 %v13810_v2  ;;  %9891 = vmatprep.mubr.msk.f32.mxu1 %vm1014_vm9, %v13967_v45 }
 0x35d   : > { %11536 = vmatprep.subr.bf16.mxu1 %v13820_v11 }
 0x35f   : > { %9892 = vmatmul.mubr.msk.f32.gmra.mrb[36].mxu1 %vm1014_vm9, %v13974_v46 }
 0x360   : > { %11538 = vmatpush3.bf16.msra.mxu1 %v13820_v11  ;;  %9894 = vmatprep.mubr.msk.f32.mxu1 %vm1014_vm9, %v13977_v47 }
 0x361   : > { %11540 = vmatprep.subr.bf16.mxu1 %v13830_v16 }
 0x363   : > { %9895 = vmatmul.mubr.msk.f32.gmra.mrb[38].mxu1 %vm1014_vm9, %v13984_v48 }
 0x364   : > { %11542 = vmatpush3.bf16.msra.mxu1 %v13830_v16  ;;  %9941 = vmatprep.mubr.msk.f32.mxu1 %vm1014_vm9, %v13987_v49 }
 0x365   : > { %11544 = vmatprep.subr.bf16.mxu1 %v13800_v57 }
 0x367   : > { %9942 = vmatmul.mubr.msk.f32.vlgmr.msra.gmra.mrb[40].mxu1 %vm1014_vm9, %v13994_v50 }
 0x368   : > { %11546 = vmatpush3.bf16.msra.mxu1 %v13800_v57  ;;  %9944 = vmatprep.mubr.msk.f32.mxu1 %vm1014_vm9, %v13997_v51 }
 0x369   : > { %11548 = vmatprep.subr.bf16.mxu1 %v13810_v2 }
 0x36b   : > { %9945 = vmatmul.mubr.msk.f32.gmra.mrb[42].mxu1 %vm1014_vm9, %v14004_v53 }
 0x36c   : > { %11550 = vmatpush3.bf16.msra.mxu1 %v13810_v2  ;;  %9947 = vmatprep.mubr.msk.f32.mxu1 %vm1014_vm9, %v14007_v54 }
 0x36d   : > { %11552 = vmatprep.subr.bf16.mxu1 %v13820_v11 }
 0x36f   : > { %9948 = vmatmul.mubr.msk.f32.gmra.mrb[44].mxu1 %vm1014_vm9, %v14014_v56 }
 0x370   : > { %11554 = vmatpush3.bf16.msra.mxu1 %v13820_v11  ;;  %9950 = vmatprep.mubr.msk.f32.mxu1 %vm1014_vm9, %v14017_v58 }
 0x371   : > { %11556 = vmatprep.subr.bf16.mxu1 %v13830_v16 }
 0x373   : > { %9951 = vmatmul.mubr.msk.f32.gmra.mrb[46].mxu1 %vm1014_vm9, %v14024_v59  ;;  %v3398_v59 = vld [vmem:[#allocation13 + $0x78] sm:$0xff] }
 0x374   : > { %11558 = vmatpush3.bf16.msra.mxu1 %v13830_v16  ;;  %9983 = vmatprep.mubr.msk.f32.mxu1 %vm1014_vm9, %v14027_v60  ;;  %v3395_v60 = vld [vmem:[#allocation13 + $0x60] sm:$0xff] }
 0x375   : > { %11560 = vmatprep.subr.bf16.mxu1 %v13800_v57 }
 0x377   : > { %9984 = vmatmul.mubr.msk.f32.vlgmr.msra.gmra.mrb[48].mxu1 %vm1014_vm9, %v14034_v62  ;;  %v3393_v62 = vld [vmem:[#allocation13 + $0x50] sm:$0xff] }
 0x378   : > { %11562 = vmatpush3.bf16.msra.mxu1 %v13800_v57  ;;  %9986 = vmatprep.mubr.msk.f32.mxu1 %vm1014_vm9, %v14037_v63 }
 0x379   : > { %11564 = vmatprep.subr.bf16.mxu1 %v13810_v2 }
 0x37b   : > { %9987 = vmatmul.mubr.msk.f32.gmra.mrb[50].mxu1 %vm1014_vm9, %v14044_v1  ;;  %v8416_v1 = vld [vmem:[#allocation12] ss:$0 sm:$0xff] }
 0x37c   : > { %11566 = vmatpush3.bf16.msra.mxu1 %v13810_v2  ;;  %9989 = vmatprep.mubr.msk.f32.mxu1 %vm1014_vm9, %v14047_v3  ;;  %v14111_v3 = vld [vmem:[#allocation10 + $0x48] sm:$0xff]  ;;  %v830_v63 = vmul.f32 0.2, %v8416_v1  ;;  %vm829_vm3 = vcmp.ge.f32.partialorder %v8416_v1, 0.0 }
 0x37d   : > { %11568 = vmatprep.subr.bf16.mxu1 %v13820_v11  ;;  %9813 = vmatprep.subr.mxu0 %v14111_v3 }
 0x37f   : > { %9990 = vmatmul.mubr.msk.f32.gmra.mrb[52].mxu1 %vm1014_vm9, %v14054_v4  ;;  %v3386_v4 = vld [vmem:[#allocation13 + $0x18] sm:$0xff] }
 0x380   : > { %11570 = vmatpush3.bf16.msra.mxu1 %v13820_v11  ;;  %9992 = vmatprep.mubr.msk.f32.mxu1 %vm1014_vm9, %v14057_v5  ;;  %v3385_v5 = vld [vmem:[#allocation13 + $0x10] sm:$0xff] }
 0x381   : > { %11572 = vmatprep.subr.bf16.mxu1 %v13830_v16 }
 0x383   : > { %9993 = vmatmul.mubr.msk.f32.gmra.mrb[54].mxu1 %vm1014_vm9, %v14064_v7  ;;  %v14084_v7 = vld [vmem:[#allocation2 + $0x1d8] sm:$0xff] }
 0x384   : > { %11574 = vmatpush3.bf16.msra.mxu1 %v13830_v16  ;;  %10025 = vmatprep.mubr.msk.f32.mxu1 %vm1014_vm9, %v14067_v8  ;;  %15070 = vst [vmem:[#allocation42_spill] sm:$0xff] %v14084_v7  ;;  %v14087_v8 = vld [vmem:[#allocation2 + $0x1e0] sm:$0xff] }
 0x385   : > { %11576 = vmatprep.subr.bf16.mxu1 %v13800_v57  ;;  %15071 = vst [vmem:[#allocation43_spill] sm:$0xff] %v14087_v8 }
 0x387   : > { %10026 = vmatmul.mubr.msk.f32.vlgmr.msra.gmra.mrb[56].mxu1 %vm1014_vm9, %v14074_v12  ;;  %v3384_v12 = vld [vmem:[#allocation13 + $0x8] sm:$0xff] }
 0x388   : > { %11578 = vmatpush3.bf16.msra.mxu1 %v13800_v57  ;;  %10028 = vmatprep.mubr.msk.f32.mxu1 %vm1014_vm9, %v14077_v13  ;;  %v14097_v57 = vld [vmem:[#allocation2 + $0x1f0] sm:$0xff]  ;;  %v3383_v13 = vld [vmem:[#allocation13] sm:$0xff] }
 0x389   : > { %11580 = vmatprep.subr.bf16.mxu1 %v13810_v2  ;;  %15073 = vst [vmem:[#allocation45_spill] sm:$0xff] %v14097_v57 }
 0x38b   : > { %10029 = vmatmul.mubr.msk.f32.gmra.mrb[58].mxu1 %vm1014_vm9, %v14084_v7  ;;  %v11591_v7 = vpack.c.bf16 %v3384_v12, %v3383_v13  ;;  %v3387_v12 = vld [vmem:[#allocation13 + $0x20] sm:$0xff]  ;;  %v3388_v13 = vld [vmem:[#allocation13 + $0x28] sm:$0xff] }
 0x38c   : > { %11582 = vmatpush3.bf16.msra.mxu1 %v13810_v2  ;;  %10031 = vmatprep.mubr.msk.f32.mxu1 %vm1014_vm9, %v14087_v8  ;;  %v14104_v2 = vld [vmem:[#allocation2 + $0x1f8] sm:$0xff]  ;;  %v14107_v8 = vld [vmem:[#allocation2 + $0x200] sm:$0xff] }
 0x38d   : > { %11584 = vmatprep.subr.bf16.mxu1 %v13820_v11  ;;  %15074 = vst [vmem:[#allocation46_spill] sm:$0xff] %v14104_v2  ;;  %15075 = vst [vmem:[#allocation47_spill] sm:$0xff] %v14107_v8 }
 0x38f   : > { %10032 = vmatmul.mubr.msk.f32.gmra.mrb[60].mxu1 %vm1014_vm9, %v14094_v10  ;;  %v14118_v10 = vld [vmem:[#allocation2 + $0x210] sm:$0xff] }
 0x390   : > { %11586 = vmatpush3.bf16.msra.mxu1 %v13820_v11  ;;  %10034 = vmatprep.mubr.msk.f32.mxu1 %vm1014_vm9, %v14097_v57  ;;  %v14116_v11 = vld [vmem:[#allocation2 + $0x208] sm:$0xff]  ;;  %v11595_v57 = vpack.c.bf16 %v3386_v4, %v3385_v5  ;;  %15077 = vst [vmem:[#allocation49_spill] sm:$0xff] %v14118_v10  ;;  %v3390_v5 = vld [vmem:[#allocation13 + $0x38] sm:$0xff] }
 0x391   : > { %11588 = vmatprep.subr.bf16.mxu1 %v13830_v16  ;;  %15076 = vst [vmem:[#allocation48_spill] sm:$0xff] %v14116_v11  ;;  %v3389_v4 = vld [vmem:[#allocation13 + $0x30] sm:$0xff] }
 0x393   : > { %10035 = vmatmul.mubr.msk.f32.gmra.mrb[62].mxu1 %vm1014_vm9, %v14104_v2  ;;  %v14127_v2 = vld [vmem:[#allocation2 + $0x220] sm:$0xff] }
 0x394   : > { %11590 = vmatpush3.bf16.msra.mxu1 %v13830_v16  ;;  %10067 = vmatprep.mubr.msk.f32.mxu1 %vm1014_vm9, %v14107_v8  ;;  %v14125_v16 = vld [vmem:[#allocation2 + $0x218] sm:$0xff]  ;;  %v11599_v8 = vpack.c.bf16 %v3388_v13, %v3387_v12  ;;  %15079 = vst [vmem:[#allocation51_spill] sm:$0xff] %v14127_v2  ;;  %v3392_v13 = vld [vmem:[#allocation13 + $0x48] sm:$0xff] }
 0x395   : > { %11592 = vmatprep.subr.bf16.mxu1 %v11591_v7  ;;  %15078 = vst [vmem:[#allocation50_spill] sm:$0xff] %v14125_v16  ;;  %v3391_v12 = vld [vmem:[#allocation13 + $0x40] sm:$0xff] }
 0x397   : > { %10068 = vmatmul.mubr.msk.f32.vlgmr.msra.gmra.mrb[64].mxu1 %vm1014_vm9, %v14116_v11  ;;  %v14135_v11 = vld [vmem:[#allocation2 + $0x230] sm:$0xff] }
 0x398   : > { %11594 = vmatpush3.bf16.msra.mxu1 %v11591_v7  ;;  %10070 = vmatprep.mubr.msk.f32.mxu1 %vm1014_vm9, %v14118_v10  ;;  %v14133_v7 = vld [vmem:[#allocation2 + $0x228] sm:$0xff]  ;;  %v11603_v10 = vpack.c.bf16 %v3390_v5, %v3389_v4  ;;  %15081 = vst [vmem:[#allocation53_spill] sm:$0xff] %v14135_v11  ;;  %v3394_v4 = vld [vmem:[#allocation13 + $0x58] sm:$0xff] }
 0x399   : > { %11596 = vmatprep.subr.bf16.mxu1 %v11595_v57  ;;  %15080 = vst [vmem:[#allocation52_spill] sm:$0xff] %v14133_v7  ;;  %v11611_v5 = vpack.c.bf16 %v3394_v4, %v3393_v62  ;;  %v1683_v4 = vld [vmem:[#allocation10 + $0x58] sm:$0xff] }
 0x39b   : > { %10071 = vmatmul.mubr.msk.f32.gmra.mrb[66].mxu1 %vm1014_vm9, %v14125_v16  ;;  %v831_v16 = vsel %vm829_vm3, %v8416_v1, %v830_v63 }
 0x39c   : > { %11598 = vmatpush3.bf16.msra.mxu1 %v11595_v57  ;;  %10073 = vmatprep.mubr.msk.f32.mxu1 %vm1014_vm9, %v14127_v2  ;;  %v14141_v57 = vld [vmem:[#allocation2 + $0x238] sm:$0xff]  ;;  %v11607_v2 = vpack.c.bf16 %v3392_v13, %v3391_v12 }
 0x39d   : > { %11600 = vmatprep.subr.bf16.mxu1 %v11599_v8  ;;  %15082 = vst [vmem:[#allocation54_spill] sm:$0xff] %v14141_v57 }
 0x39f   : > { %10074 = vmatmul.mubr.msk.f32.gmra.mrb[68].mxu1 %vm1014_vm9, %v14133_v7  ;;  %v3396_v7 = vld [vmem:[#allocation13 + $0x68] sm:$0xff] }
 0x3a0   : > { %11602 = vmatpush3.bf16.msra.mxu1 %v11599_v8  ;;  %10076 = vmatprep.mubr.msk.f32.mxu1 %vm1014_vm9, %v14135_v11  ;;  %v11615_v8 = vpack.c.bf16 %v3396_v7, %v3395_v60  ;;  %v3397_v11 = vld [vmem:[#allocation13 + $0x70] sm:$0xff] }
 0x3a1   : > { %11604 = vmatprep.subr.bf16.mxu1 %v11603_v10  ;;  %v11619_v12 = vpack.c.bf16 %v3398_v59, %v3397_v11 }
 0x3a3   : > { %10077 = vmatmul.mubr.msk.f32.gmra.mrb[70].mxu1 %vm1014_vm9, %v14141_v57  ;;  %v1960_v57 = vld [vmem:[#allocation10 + $0x60] sm:$0xff] }
 0x3a4   : > { %11606 = vmatpush3.bf16.msra.mxu1 %v11603_v10  ;;  %10125 = vmatprep.mubr.f32.mxu1 %v831_v16 }
 0x3a5   : > { %11608 = vmatprep.subr.bf16.mxu1 %v11607_v2 }
 0x3a8   : > { %11610 = vmatpush3.bf16.msra.mxu1 %v11607_v2 }
 0x3a9   : > { %11612 = vmatprep.subr.bf16.mxu1 %v11611_v5 }
 0x3ac   : > { %11614 = vmatpush3.bf16.msra.mxu1 %v11611_v5 }
 0x3ad   : > { %11616 = vmatprep.subr.bf16.mxu1 %v11615_v8 }
 0x3b0   : > { %11618 = vmatpush3.bf16.msra.mxu1 %v11615_v8 }
 0x3b1   : > { %11620 = vmatprep.subr.bf16.mxu1 %v11619_v12 }
 0x3b4   : > { %11622 = vmatpush3.bf16.msra.mxu1 %v11619_v12 }
 0x3b7   : > { %10126 = vmatmul.mubr.f32.vlgmr.msra.gmra.mrb[72].mxu1 %v831_v16 }
 0x3b8   : > { %10128 = vmatprep.mubr.f32.mxu1 %v831_v16 }
 0x3bb   : > { %10129 = vmatmul.mubr.f32.gmra.mrb[74].mxu1 %v831_v16 }
 0x3bc   : > { %10131 = vmatprep.mubr.f32.mxu1 %v831_v16 }
 0x3bf   : > { %10132 = vmatmul.mubr.f32.gmra.mrb[76].mxu1 %v831_v16 }
 0x3c0   : > { %10134 = vmatprep.mubr.f32.mxu1 %v831_v16 }
 0x3c3   : > { %10135 = vmatmul.mubr.f32.gmra.mrb[78].mxu1 %v831_v16 }
 0x3c4   : > { %10153 = vmatprep.mubr.msk.f32.mxu1 %vm1014_vm9, %v13790_v43 }
 0x3fa   : > { %v9761_v62 = vpop.f32.mrb[8].mxu1 }
 0x3fb   : > { %v1105_v60 = vpop.f32.mrb[9].mxu1 }
 0x3fe   : > { %v9764_v63 = vpop.f32.mrb[10].mxu1 }
 0x3ff   : > { %v1115_v1 = vpop.f32.mrb[11].mxu1 }
 0x402   : > { %v9767_v10 = vpop.f32.mrb[12].mxu1 }
 0x403   : > { %v1125_v2 = vpop.f32.mrb[13].mxu1 }
 0x406   : > { %v9770_v59 = vpop.f32.mrb[14].mxu1 }
 0x407   : > { %v1135_v11 = vpop.f32.mrb[15].mxu1 }
 0x40a   : > { %v9789_v7 = vpop.f32.mrb[16].mxu1 }
 0x40b   : > { %v1245_v13 = vpop.f32.mrb[17].mxu1 }
 0x40c   : > { %9801 = vmatprep.mubr.msk.f32.mxu0 %vm667_vm0, %v1245_v13 }
 0x40d   : > { %9802 = vmatmul.mubr.msk.f32.vlgmr.msra.gmra.mrb[8].mxu0 %vm667_vm0, %v9789_v7 }
 0x40e   : > { %v9792_v5 = vpop.f32.mrb[18].mxu1  ;;  %9814 = vmatpush3.msra.mxu0 %v14111_v3 }
 0x40f   : > { %v1255_v16 = vpop.f32.mrb[19].mxu1  ;;  %9855 = vmatprep.subr.mxu0 %v1683_v4 }
 0x410   : > { %9804 = vmatprep.mubr.msk.f32.mxu0 %vm667_vm0, %v1255_v16 }
 0x411   : > { %9805 = vmatmul.mubr.msk.f32.gmra.mrb[10].mxu0 %vm667_vm0, %v9792_v5 }
 0x412   : > { %v9795_v43 = vpop.f32.mrb[20].mxu1 }
 0x413   : > { %v1265_v8 = vpop.f32.mrb[21].mxu1 }
 0x414   : > { %9807 = vmatprep.mubr.msk.f32.mxu0 %vm667_vm0, %v1265_v8 }
 0x415   : > { %9808 = vmatmul.mubr.msk.f32.gmra.mrb[12].mxu0 %vm667_vm0, %v9795_v43 }
 0x416   : > { %v9798_v12 = vpop.f32.mrb[22].mxu1 }
 0x417   : > { %v1275_v13 = vpop.f32.mrb[23].mxu1 }
 0x418   : > { %9810 = vmatprep.mubr.msk.f32.mxu0 %vm667_vm0, %v1275_v13 }
 0x419   : > { %9811 = vmatmul.mubr.msk.f32.gmra.mrb[14].mxu0 %vm667_vm0, %v9798_v12 }
 0x41a   : > { %9815 = vmatprep.mubr.msk.f32.mxu0 %vm667_vm0, %v1105_v60  ;;  %v9845_v3 = vpop.f32.mrb[24].mxu1 }
 0x41b   : > { %v1643_v7 = vpop.f32.mrb[25].mxu1 }
 0x41d   : > { %9816 = vmatmul.mubr.msk.f32.vlgmr.msra.gmra.mrb[8].mxu0 %vm667_vm0, %v9761_v62 }
 0x41e   : > { %9818 = vmatprep.mubr.msk.f32.mxu0 %vm667_vm0, %v1115_v1  ;;  %v9848_v5 = vpop.f32.mrb[26].mxu1  ;;  %9856 = vmatpush3.msra.mxu0 %v1683_v4  ;;  %v2099_v4 = vld [vmem:[#allocation10 + $0x68] sm:$0xff] }
 0x41f   : > { %v1653_v16 = vpop.f32.mrb[27].mxu1  ;;  %9897 = vmatprep.subr.mxu0 %v1960_v57 }
 0x421   : > { %9819 = vmatmul.mubr.msk.f32.gmra.mrb[10].mxu0 %vm667_vm0, %v9764_v63 }
 0x422   : > { %9821 = vmatprep.mubr.msk.f32.mxu0 %vm667_vm0, %v1125_v2  ;;  %v9851_v43 = vpop.f32.mrb[28].mxu1 }
 0x423   : > { %v1663_v8 = vpop.f32.mrb[29].mxu1 }
 0x425   : > { %9822 = vmatmul.mubr.msk.f32.gmra.mrb[12].mxu0 %vm667_vm0, %v9767_v10 }
 0x426   : > { %9824 = vmatprep.mubr.msk.f32.mxu0 %vm667_vm0, %v1135_v11  ;;  %v9854_v60 = vpop.f32.mrb[30].mxu1 }
 0x427   : > { %v1673_v12 = vpop.f32.mrb[31].mxu1 }
 0x429   : > { %9825 = vmatmul.mubr.msk.f32.gmra.mrb[14].mxu0 %vm667_vm0, %v9770_v59 }
 0x42a   : > { %9857 = vmatprep.mubr.msk.f32.mxu0 %vm667_vm0, %v1643_v7  ;;  %v9887_v62 = vpop.f32.mrb[32].mxu1  ;;  %v2376_v7 = vld [vmem:[#allocation10 + $0x70] sm:$0xff] }
 0x42b   : > { %v1920_v1 = vpop.f32.mrb[33].mxu1 }
 0x42d   : > { %9858 = vmatmul.mubr.msk.f32.vlgmr.msra.gmra.mrb[8].mxu0 %vm667_vm0, %v9845_v3 }
 0x42e   : > { %9860 = vmatprep.mubr.msk.f32.mxu0 %vm667_vm0, %v1653_v16  ;;  %v9890_v63 = vpop.f32.mrb[34].mxu1  ;;  %9898 = vmatpush3.msra.mxu0 %v1960_v57 }
 0x42f   : > { %v1930_v2 = vpop.f32.mrb[35].mxu1  ;;  %9911 = vmatprep.subr.mxu0 %v2099_v4 }
 0x431   : > { %9861 = vmatmul.mubr.msk.f32.gmra.mrb[10].mxu0 %vm667_vm0, %v9848_v5 }
 0x432   : > { %9863 = vmatprep.mubr.msk.f32.mxu0 %vm667_vm0, %v1663_v8  ;;  %v9893_v10 = vpop.f32.mrb[36].mxu1 }
 0x433   : > { %v1940_v11 = vpop.f32.mrb[37].mxu1 }
 0x435   : > { %9864 = vmatmul.mubr.msk.f32.gmra.mrb[12].mxu0 %vm667_vm0, %v9851_v43 }
 0x436   : > { %9866 = vmatprep.mubr.msk.f32.mxu0 %vm667_vm0, %v1673_v12  ;;  %v9896_v59 = vpop.f32.mrb[38].mxu1 }
 0x437   : > { %v1950_v13 = vpop.f32.mrb[39].mxu1 }
 0x439   : > { %9867 = vmatmul.mubr.msk.f32.gmra.mrb[14].mxu0 %vm667_vm0, %v9854_v60 }
 0x43a   : > { %9899 = vmatprep.mubr.msk.f32.mxu0 %vm667_vm0, %v1920_v1  ;;  %v9943_v3 = vpop.f32.mrb[40].mxu1 }
 0x43b   : > { %v2336_v57 = vpop.f32.mrb[41].mxu1 }
 0x43d   : > { %9900 = vmatmul.mubr.msk.f32.vlgmr.msra.gmra.mrb[8].mxu0 %vm667_vm0, %v9887_v62 }
 0x43e   : > { %9902 = vmatprep.mubr.msk.f32.mxu0 %vm667_vm0, %v1930_v2  ;;  %v9946_v5 = vpop.f32.mrb[42].mxu1  ;;  %9912 = vmatpush3.msra.mxu0 %v2099_v4  ;;  %v2653_v4 = vld [vmem:[#allocation10 + $0x78] sm:$0xff] }
 0x43f   : > { %v2346_v16 = vpop.f32.mrb[43].mxu1  ;;  %9953 = vmatprep.subr.mxu0 %v2376_v7 }
 0x441   : > { %9903 = vmatmul.mubr.msk.f32.gmra.mrb[10].mxu0 %vm667_vm0, %v9890_v63 }
 0x442   : > { %9905 = vmatprep.mubr.msk.f32.mxu0 %vm667_vm0, %v1940_v11  ;;  %v9949_v43 = vpop.f32.mrb[44].mxu1 }
 0x443   : > { %v2356_v8 = vpop.f32.mrb[45].mxu1 }
 0x445   : > { %9906 = vmatmul.mubr.msk.f32.gmra.mrb[12].mxu0 %vm667_vm0, %v9893_v10 }
 0x446   : > { %9908 = vmatprep.mubr.msk.f32.mxu0 %vm667_vm0, %v1950_v13  ;;  %v9952_v60 = vpop.f32.mrb[46].mxu1 }
 0x447   : > { %v2366_v12 = vpop.f32.mrb[47].mxu1 }
 0x449   : > { %9909 = vmatmul.mubr.msk.f32.gmra.mrb[14].mxu0 %vm667_vm0, %v9896_v59  ;;  %v2930_v59 = vld [vmem:[#allocation10 + $0x80] sm:$0xff] }
 0x44a   : > { %9913 = vmatprep.mubr.msk.f32.mxu0 %vm667_vm0, %v13796_v55  ;;  %v9985_v62 = vpop.f32.mrb[48].mxu1 }
 0x44b   : > { %v2613_v1 = vpop.f32.mrb[49].mxu1 }
 0x44d   : > { %9914 = vmatmul.mubr.msk.f32.vlgmr.msra.gmra.mrb[8].mxu0 %vm667_vm0, %v13794_v52 }
 0x44e   : > { %9916 = vmatprep.mubr.msk.f32.mxu0 %vm667_vm0, %v13805_v0  ;;  %v9988_v63 = vpop.f32.mrb[50].mxu1  ;;  %9954 = vmatpush3.msra.mxu0 %v2376_v7 }
 0x44f   : > { %v2623_v2 = vpop.f32.mrb[51].mxu1  ;;  %9995 = vmatprep.subr.mxu0 %v2653_v4 }
 0x451   : > { %9917 = vmatmul.mubr.msk.f32.gmra.mrb[10].mxu0 %vm667_vm0, %v13802_v61 }
 0x452   : > { %9919 = vmatprep.mubr.msk.f32.mxu0 %vm667_vm0, %v13815_v9  ;;  %v9991_v55 = vpop.f32.mrb[52].mxu1 }
 0x453   : > { %v2633_v10 = vpop.f32.mrb[53].mxu1 }
 0x455   : > { %9920 = vmatmul.mubr.msk.f32.gmra.mrb[12].mxu0 %vm667_vm0, %v13812_v6 }
 0x456   : > { %9922 = vmatprep.mubr.msk.f32.mxu0 %vm667_vm0, %v13825_v15  ;;  %v9994_v52 = vpop.f32.mrb[54].mxu1 }
 0x457   : > { %v2643_v0 = vpop.f32.mrb[55].mxu1 }
 0x459   : > { %9923 = vmatmul.mubr.msk.f32.gmra.mrb[14].mxu0 %vm667_vm0, %v13822_v14 }
 0x45a   : > { %9955 = vmatprep.mubr.msk.f32.mxu0 %vm667_vm0, %v2336_v57  ;;  %v10027_v11 = vpop.f32.mrb[56].mxu1 }
 0x45b   : > { %v2890_v61 = vpop.f32.mrb[57].mxu1 }
 0x45d   : > { %9956 = vmatmul.mubr.msk.f32.vlgmr.msra.gmra.mrb[8].mxu0 %vm667_vm0, %v9943_v3 }
 0x45e   : > { %9958 = vmatprep.mubr.msk.f32.mxu0 %vm667_vm0, %v2346_v16  ;;  %v10030_v9 = vpop.f32.mrb[58].mxu1  ;;  %9996 = vmatpush3.msra.mxu0 %v2653_v4  ;;  %v3207_v16 = vld [vmem:[#allocation10 + $0x88] sm:$0xff] }
 0x45f   : > { %v2900_v6 = vpop.f32.mrb[59].mxu1  ;;  %10037 = vmatprep.subr.mxu0 %v2930_v59 }
 0x461   : > { %9959 = vmatmul.mubr.msk.f32.gmra.mrb[10].mxu0 %vm667_vm0, %v9946_v5 }
 0x462   : > { %9961 = vmatprep.mubr.msk.f32.mxu0 %vm667_vm0, %v2356_v8  ;;  %v10033_v15 = vpop.f32.mrb[60].mxu1 }
 0x463   : > { %v2910_v13 = vpop.f32.mrb[61].mxu1 }
 0x465   : > { %9962 = vmatmul.mubr.msk.f32.gmra.mrb[12].mxu0 %vm667_vm0, %v9949_v43 }
 0x466   : > { %9964 = vmatprep.mubr.msk.f32.mxu0 %vm667_vm0, %v2366_v12  ;;  %v10036_v14 = vpop.f32.mrb[62].mxu1 }
 0x467   : > { %v2920_v57 = vpop.f32.mrb[63].mxu1 }
 0x469   : > { %9965 = vmatmul.mubr.msk.f32.gmra.mrb[14].mxu0 %vm667_vm0, %v9952_v60 }
 0x46a   : > { %9997 = vmatprep.mubr.msk.f32.mxu0 %vm667_vm0, %v2613_v1  ;;  %v10069_v3 = vpop.f32.mrb[64].mxu1 }
 0x46b   : > { %v3167_v7 = vpop.f32.mrb[65].mxu1 }
 0x46d   : > { %9998 = vmatmul.mubr.msk.f32.vlgmr.msra.gmra.mrb[8].mxu0 %vm667_vm0, %v9985_v62  ;;  %v8564_v62 = vld [vmem:[#allocation15] ss:$0 sm:$0xff] }
 0x46e   : > { %10000 = vmatprep.mubr.msk.f32.mxu0 %vm667_vm0, %v2623_v2  ;;  %10038 = vmatpush3.msra.mxu0 %v2930_v59  ;;  %v10072_v5 = vpop.f32.mrb[66].mxu1 }
 0x46f   : > { %v3177_v8 = vpop.f32.mrb[67].mxu1  ;;  %10079 = vmatprep.subr.mxu0 %v3207_v16 }
 0x471   : > { %10001 = vmatmul.mubr.msk.f32.gmra.mrb[10].mxu0 %vm667_vm0, %v9988_v63 }
 0x472   : > { %10003 = vmatprep.mubr.msk.f32.mxu0 %vm667_vm0, %v2633_v10  ;;  %v10075_v43 = vpop.f32.mrb[68].mxu1 }
 0x473   : > { %v3187_v12 = vpop.f32.mrb[69].mxu1 }
 0x475   : > { %10004 = vmatmul.mubr.msk.f32.gmra.mrb[12].mxu0 %vm667_vm0, %v9991_v55 }
 0x476   : > { %10006 = vmatprep.mubr.msk.f32.mxu0 %vm667_vm0, %v2643_v0  ;;  %v14211_v60 = vpop.f32.mrb[70].mxu1 }
 0x477   : > { %v3197_v1 = vpop.f32.mrb[71].mxu1 }
 0x479   : > { %10007 = vmatmul.mubr.msk.f32.gmra.mrb[14].mxu0 %vm667_vm0, %v9994_v52 }
 0x47a   : > { %10039 = vmatprep.mubr.msk.f32.mxu0 %vm667_vm0, %v2890_v61 }
 0x47d   : > { %10040 = vmatmul.mubr.msk.f32.vlgmr.msra.gmra.mrb[8].mxu0 %vm667_vm0, %v10027_v11 }
 0x47e   : > { %10042 = vmatprep.mubr.msk.f32.mxu0 %vm667_vm0, %v2900_v6  ;;  %10080 = vmatpush3.msra.mxu0 %v3207_v16 }
 0x481   : > { %10043 = vmatmul.mubr.msk.f32.gmra.mrb[10].mxu0 %vm667_vm0, %v10030_v9 }
 0x482   : > { %10045 = vmatprep.mubr.msk.f32.mxu0 %vm667_vm0, %v2910_v13 }
 0x485   : > { %10046 = vmatmul.mubr.msk.f32.gmra.mrb[12].mxu0 %vm667_vm0, %v10033_v15 }
 0x486   : > { %10048 = vmatprep.mubr.msk.f32.mxu0 %vm667_vm0, %v2920_v57 }
 0x489   : > { %10049 = vmatmul.mubr.msk.f32.gmra.mrb[14].mxu0 %vm667_vm0, %v10036_v14 }
 0x48a   : > { %10081 = vmatprep.mubr.msk.f32.mxu0 %vm667_vm0, %v3167_v7  ;;  %v10127_v4 = vpop.f32.mrb[72].mxu1 }
 0x48b   : > { %v3478_v63 = vadd.f32 %v10127_v4, %v8564_v62  ;;  %v3472_v2 = vpop.f32.mrb[73].mxu1 }
 0x48c   : > { %v3473_v55 = vadd.f32 %v8564_v62, %v3472_v2 }
 0x48d   : > { %vm3512_vm4 = vcmp.ge.f32.partialorder %v3478_v63, 0.0  ;;  %v3520_v10 = vmul.f32 0.2, %v3478_v63  ;;  %10082 = vmatmul.mubr.msk.f32.vlgmr.msra.gmra.mrb[8].mxu0 %vm667_vm0, %v10069_v3 }
 0x48e   : > { %vm3511_vm5 = vcmp.ge.f32.partialorder %v3473_v55, 0.0  ;;  %v3519_v52 = vmul.f32 0.2, %v3473_v55  ;;  %10084 = vmatprep.mubr.msk.f32.mxu0 %vm667_vm0, %v3177_v8  ;;  %v10130_v0 = vpop.f32.mrb[74].mxu1 }
 0x48f   : > { %v14225_v11 = vsel %vm3512_vm4, %v3478_v63, %v3520_v10  ;;  %v3488_v61 = vadd.f32 %v10130_v0, %v8564_v62  ;;  %v3482_v59 = vpop.f32.mrb[75].mxu1 }
 0x490   : > { %v14227_v9 = vsel %vm3511_vm5, %v3473_v55, %v3519_v52  ;;  %v3483_v6 = vadd.f32 %v8564_v62, %v3482_v59 }
 0x491   : > { %v14231_v15 = vpack.c.bf16 %v14225_v11, %v14227_v9  ;;  %vm3514_vm6 = vcmp.ge.f32.partialorder %v3488_v61, 0.0  ;;  %v3522_v13 = vmul.f32 0.2, %v3488_v61  ;;  %10085 = vmatmul.mubr.msk.f32.gmra.mrb[10].mxu0 %vm667_vm0, %v10072_v5 }
 0x492   : > { %vm3513_vm7 = vcmp.ge.f32.partialorder %v3483_v6, 0.0  ;;  %v3521_v14 = vmul.f32 0.2, %v3483_v6  ;;  %10087 = vmatprep.mubr.msk.f32.mxu0 %vm667_vm0, %v3187_v12  ;;  %v10133_v57 = vpop.f32.mrb[76].mxu1 }
 0x493   : > { %v14235_v3 = vsel %vm3514_vm6, %v3488_v61, %v3522_v13  ;;  %v3498_v7 = vadd.f32 %v10133_v57, %v8564_v62  ;;  %v3492_v16 = vpop.f32.mrb[77].mxu1  ;;  %11624 = vmatprep.subr.bf16.mxu1 %v14231_v15  ;;  %11640 = vmatprep.subr.bf16.mxu0 %v14231_v15 }
 0x494   : > { %v14239_v8 = vsel %vm3513_vm7, %v3483_v6, %v3521_v14  ;;  %v3493_v4 = vadd.f32 %v8564_v62, %v3492_v16  ;;  %11626 = vmatpush3.bf16.msra.mxu1 %v14231_v15  ;;  %11642 = vmatpush3.bf16.msra.mxu0 %v14231_v15  ;;  %v3765_v6 = vld [vmem:[#allocation16 + $0x500] sm:$0xff] }
 0x495   : > { %v14245_v5 = vpack.c.bf16 %v14235_v3, %v14239_v8  ;;  %vm3516_vm8 = vcmp.ge.f32.partialorder %v3498_v7, 0.0  ;;  %v3524_v12 = vmul.f32 0.2, %v3498_v7  ;;  %10088 = vmatmul.mubr.msk.f32.gmra.mrb[12].mxu0 %vm667_vm0, %v10075_v43 }
 0x496   : > { %vm3515_vm10 = vcmp.ge.f32.partialorder %v3493_v4, 0.0  ;;  %v3523_v63 = vmul.f32 0.2, %v3493_v4  ;;  %10090 = vmatprep.mubr.msk.f32.mxu0 %vm667_vm0, %v3197_v1  ;;  %v10136_v2 = vpop.f32.mrb[78].mxu1 }
 0x497   : > { %v14249_v55 = vsel %vm3516_vm8, %v3498_v7, %v3524_v12  ;;  %v3508_v10 = vadd.f32 %v10136_v2, %v8564_v62  ;;  %v3502_v52 = vpop.f32.mrb[79].mxu1  ;;  %11628 = vmatprep.subr.bf16.mxu1 %v14245_v5  ;;  %11644 = vmatprep.subr.bf16.mxu0 %v14245_v5  ;;  %v3768_v7 = vld [vmem:[#allocation16 + $0x518] sm:$0xff]  ;;  %v15104_v2 = vld [vmem:[#allocation51_spill] sm:$0xff] }
 0x498   : > { %v14253_v0 = vsel %vm3515_vm10, %v3493_v4, %v3523_v63  ;;  %v3503_v61 = vadd.f32 %v8564_v62, %v3502_v52  ;;  %11630 = vmatpush3.bf16.msra.mxu1 %v14245_v5  ;;  %11646 = vmatpush3.bf16.msra.mxu0 %v14245_v5  ;;  %v3766_v62 = vld [vmem:[#allocation16 + $0x508] sm:$0xff]  ;;  %v15102_v12 = vld [vmem:[#allocation49_spill] sm:$0xff]  ;;  %v15103_v63 = vld [vmem:[#allocation50_spill] sm:$0xff] }
 0x499   : > { %v14259_v43 = vpack.c.bf16 %v14249_v55, %v14253_v0  ;;  %vm3518_vm11 = vcmp.ge.f32.partialorder %v3508_v10, 0.0  ;;  %v3526_v1 = vmul.f32 0.2, %v3508_v10  ;;  %10091 = vmatmul.mubr.msk.f32.gmra.mrb[14].mxu0 %vm667_vm0, %v14211_v60  ;;  %v11655_v57 = vpack.c.bf16 %v3766_v62, %v3765_v6  ;;  %v15100_v4 = vld [vmem:[#allocation47_spill] sm:$0xff]  ;;  %v15106_v52 = vld [vmem:[#allocation53_spill] sm:$0xff] }
 0x49a   : > { %vm3517_vm12 = vcmp.ge.f32.partialorder %v3503_v61, 0.0  ;;  %v3525_v59 = vmul.f32 0.2, %v3503_v61  ;;  %10181 = vmatprep.mubr.msk.f32.mxu0 %vm1014_vm9, %v13867_v24  ;;  %v3767_v24 = vld [vmem:[#allocation16 + $0x510] sm:$0xff] }
 0x49b   : > { %v14265_v13 = vsel %vm3518_vm11, %v3508_v10, %v3526_v1  ;;  %11632 = vmatprep.subr.bf16.mxu1 %v14259_v43  ;;  %11648 = vmatprep.subr.bf16.mxu0 %v14259_v43  ;;  %v11659_v16 = vpack.c.bf16 %v3768_v7, %v3767_v24  ;;  %v15105_v10 = vld [vmem:[#allocation52_spill] sm:$0xff] }
 0x49c   : > { %v14269_v14 = vsel %vm3517_vm12, %v3503_v61, %v3525_v59  ;;  %11634 = vmatpush3.bf16.msra.mxu1 %v14259_v43  ;;  %11650 = vmatpush3.bf16.msra.mxu0 %v14259_v43  ;;  %v15107_v61 = vld [vmem:[#allocation54_spill] sm:$0xff] }
 0x49d   : > { %v14275_v60 = vpack.c.bf16 %v14265_v13, %v14269_v14 }
 0x49f   : > { %11636 = vmatprep.subr.bf16.mxu1 %v14275_v60  ;;  %11652 = vmatprep.subr.bf16.mxu0 %v14275_v60 }
 0x4a0   : > { %11638 = vmatpush3.bf16.msra.mxu1 %v14275_v60  ;;  %11654 = vmatpush3.bf16.msra.mxu0 %v14275_v60 }
 0x4a1   : > { %11720 = vmatprep.subr.bf16.mxu0 %v14231_v15  ;;  %11656 = vmatprep.subr.bf16.mxu1 %v11655_v57 }
 0x4a3   : > { %10182 = vmatmul.mubr.msk.f32.vlgmr.msra.gmra.mrb[16].mxu0 %vm1014_vm9, %v13874_v25  ;;  %10154 = vmatmul.mubr.msk.f32.vlgmr.msra.gmra.mrb[80].mxu1 %vm1014_vm9, %v13834_v17  ;;  %v3769_v17 = vld [vmem:[#allocation16 + $0x520] sm:$0xff] }
 0x4a4   : > { %11722 = vmatpush3.bf16.msra.mxu0 %v14231_v15  ;;  %10184 = vmatprep.mubr.msk.f32.mxu0 %vm1014_vm9, %v13877_v26  ;;  %v15085_v26 = vld [vmem:[#allocation32_spill] sm:$0xff] }
 0x4a5   : > { %11724 = vmatprep.subr.bf16.mxu0 %v14245_v5  ;;  %10156 = vmatprep.mubr.msk.f32.mxu1 %vm1014_vm9, %v13837_v18  ;;  %v3770_v18 = vld [vmem:[#allocation16 + $0x528] sm:$0xff] }
 0x4a6   : > { %11658 = vmatpush3.bf16.msra.mxu1 %v11655_v57 }
 0x4a7   : > { %10185 = vmatmul.mubr.msk.f32.gmra.mrb[18].mxu0 %vm1014_vm9, %v13884_v27  ;;  %10157 = vmatmul.mubr.msk.f32.gmra.mrb[82].mxu1 %vm1014_vm9, %v13844_v19  ;;  %v11663_v19 = vpack.c.bf16 %v3770_v18, %v3769_v17  ;;  %v15086_v27 = vld [vmem:[#allocation33_spill] sm:$0xff] }
 0x4a8   : > { %11726 = vmatpush3.bf16.msra.mxu0 %v14245_v5  ;;  %10187 = vmatprep.mubr.msk.f32.mxu0 %vm1014_vm9, %v13887_v28  ;;  %v3773_v28 = vld [vmem:[#allocation16 + $0x540] sm:$0xff]  ;;  %v3646_v17 = vld [vmem:[#allocation16 + $0x498] sm:$0xff] }
 0x4a9   : > { %11728 = vmatprep.subr.bf16.mxu0 %v14259_v43  ;;  %10159 = vmatprep.mubr.msk.f32.mxu1 %vm1014_vm9, %v13847_v20  ;;  %v15083_v20 = vld [vmem:[#allocation30_spill] sm:$0xff] }
 0x4aa   : > { %11660 = vmatprep.subr.bf16.mxu1 %v11659_v16 }
 0x4ab   : > { %10188 = vmatmul.mubr.msk.f32.gmra.mrb[20].mxu0 %vm1014_vm9, %v13894_v29  ;;  %10160 = vmatmul.mubr.msk.f32.gmra.mrb[84].mxu1 %vm1014_vm9, %v13854_v21  ;;  %v15084_v21 = vld [vmem:[#allocation31_spill] sm:$0xff] }
 0x4ac   : > { %11730 = vmatpush3.bf16.msra.mxu0 %v14259_v43  ;;  %10190 = vmatprep.mubr.msk.f32.mxu0 %vm1014_vm9, %v13897_v30  ;;  %v3774_v29 = vld [vmem:[#allocation16 + $0x548] sm:$0xff] }
 0x4ad   : > { %11732 = vmatprep.subr.bf16.mxu0 %v14275_v60  ;;  %10162 = vmatprep.mubr.msk.f32.mxu1 %vm1014_vm9, %v13857_v22  ;;  %v3771_v22 = vld [vmem:[#allocation16 + $0x530] sm:$0xff]  ;;  %v11671_v30 = vpack.c.bf16 %v3774_v29, %v3773_v28 }
 0x4ae   : > { %11662 = vmatpush3.bf16.msra.mxu1 %v11659_v16  ;;  %v3645_v16 = vld [vmem:[#allocation16 + $0x490] sm:$0xff] }
 0x4af   : > { %10191 = vmatmul.mubr.msk.f32.gmra.mrb[22].mxu0 %vm1014_vm9, %v13904_v31  ;;  %10163 = vmatmul.mubr.msk.f32.gmra.mrb[86].mxu1 %vm1014_vm9, %v13864_v23  ;;  %v3772_v23 = vld [vmem:[#allocation16 + $0x538] sm:$0xff] }
 0x4b0   : > { %11734 = vmatpush3.bf16.msra.mxu0 %v14275_v60  ;;  %10297 = vmatprep.mubr.msk.f32.mxu0 %vm1014_vm9, %v13907_v32  ;;  %v11667_v25 = vpack.c.bf16 %v3772_v23, %v3771_v22  ;;  %v15087_v31 = vld [vmem:[#allocation34_spill] sm:$0xff]  ;;  %v15088_v32 = vld [vmem:[#allocation35_spill] sm:$0xff] }
 0x4b1   : > { %11768 = vmatprep.subr.bf16.mxu0 %v14231_v15  ;;  %11664 = vmatprep.subr.bf16.mxu1 %v11663_v19  ;;  %v3647_v23 = vld [vmem:[#allocation16 + $0x4a0] sm:$0xff] }
 0x4b2   : > { %11666 = vmatpush3.bf16.msra.mxu1 %v11663_v19 }
 0x4b3   : > { %10298 = vmatmul.mubr.msk.f32.vlgmr.msra.gmra.mrb[24].mxu0 %vm1014_vm9, %v13914_v33  ;;  %11668 = vmatprep.subr.bf16.mxu1 %v11667_v25  ;;  %v3775_v33 = vld [vmem:[#allocation16 + $0x550] sm:$0xff] }
 0x4b4   : > { %11770 = vmatpush3.bf16.msra.mxu0 %v14231_v15  ;;  %10300 = vmatprep.mubr.msk.f32.mxu0 %vm1014_vm9, %v13917_v34  ;;  %v3776_v34 = vld [vmem:[#allocation16 + $0x558] sm:$0xff] }
 0x4b5   : > { %11772 = vmatprep.subr.bf16.mxu0 %v14245_v5 }
 0x4b6   : > { %11670 = vmatpush3.bf16.msra.mxu1 %v11667_v25  ;;  %v3648_v25 = vld [vmem:[#allocation16 + $0x4a8] sm:$0xff] }
 0x4b7   : > { %10301 = vmatmul.mubr.msk.f32.gmra.mrb[26].mxu0 %vm1014_vm9, %v13924_v35  ;;  %11672 = vmatprep.subr.bf16.mxu1 %v11671_v30  ;;  %v11675_v35 = vpack.c.bf16 %v3776_v34, %v3775_v33  ;;  %v11695_v28 = vpack.c.bf16 %v3648_v25, %v3647_v23  ;;  %v4102_v23 = vld [vmem:[#allocation16 + $0x5a8] sm:$0xff] }
 0x4b8   : > { %11774 = vmatpush3.bf16.msra.mxu0 %v14245_v5  ;;  %10303 = vmatprep.mubr.msk.f32.mxu0 %vm1014_vm9, %v13927_v36  ;;  %v15089_v36 = vld [vmem:[#allocation36_spill] sm:$0xff] }
 0x4b9   : > { %11776 = vmatprep.subr.bf16.mxu0 %v14259_v43 }
 0x4ba   : > { %11674 = vmatpush3.bf16.msra.mxu1 %v11671_v30 }
 0x4bb   : > { %10304 = vmatmul.mubr.msk.f32.gmra.mrb[28].mxu0 %vm1014_vm9, %v13934_v37  ;;  %v15090_v37 = vld [vmem:[#allocation37_spill] sm:$0xff]  ;;  %11676 = vmatprep.subr.bf16.mxu1 %v11675_v35 }
 0x4bc   : > { %11778 = vmatpush3.bf16.msra.mxu0 %v14259_v43  ;;  %10306 = vmatprep.mubr.msk.f32.mxu0 %vm1014_vm9, %v13937_v38  ;;  %v3777_v38 = vld [vmem:[#allocation16 + $0x560] sm:$0xff] }
 0x4bd   : > { %11780 = vmatprep.subr.bf16.mxu0 %v14275_v60 }
 0x4be   : > { %11678 = vmatpush3.bf16.msra.mxu1 %v11675_v35 }
 0x4bf   : > { %10307 = vmatmul.mubr.msk.f32.gmra.mrb[30].mxu0 %vm1014_vm9, %v13944_v39  ;;  %v3778_v39 = vld [vmem:[#allocation16 + $0x568] sm:$0xff] }
 0x4c0   : > { %11782 = vmatpush3.bf16.msra.mxu0 %v14275_v60  ;;  %10369 = vmatprep.mubr.msk.f32.mxu0 %vm1014_vm9, %v13947_v40  ;;  %v11679_v40 = vpack.c.bf16 %v3778_v39, %v3777_v38  ;;  %v3651_v38 = vld [vmem:[#allocation16 + $0x4c0] sm:$0xff]  ;;  %v3652_v39 = vld [vmem:[#allocation16 + $0x4c8] sm:$0xff] }
 0x4c1   : > { %11848 = vmatprep.subr.bf16.mxu0 %v14231_v15 }
 0x4c2   : > { %11680 = vmatprep.subr.bf16.mxu1 %v11679_v40 }
 0x4c3   : > { %10370 = vmatmul.mubr.msk.f32.vlgmr.msra.gmra.mrb[32].mxu0 %vm1014_vm9, %v13954_v41  ;;  %v15091_v41 = vld [vmem:[#allocation38_spill] sm:$0xff]  ;;  %11682 = vmatpush3.bf16.msra.mxu1 %v11679_v40 }
 0x4c4   : > { %11850 = vmatpush3.bf16.msra.mxu0 %v14231_v15  ;;  %10372 = vmatprep.mubr.msk.f32.mxu0 %vm1014_vm9, %v13957_v42  ;;  %v15092_v42 = vld [vmem:[#allocation39_spill] sm:$0xff] }
 0x4c5   : > { %11852 = vmatprep.subr.bf16.mxu0 %v14245_v5 }
 0x4c7   : > { %10373 = vmatmul.mubr.msk.f32.gmra.mrb[34].mxu0 %vm1014_vm9, %v13964_v44  ;;  %v3779_v44 = vld [vmem:[#allocation16 + $0x570] sm:$0xff] }
 0x4c8   : > { %11854 = vmatpush3.bf16.msra.mxu0 %v14245_v5  ;;  %10375 = vmatprep.mubr.msk.f32.mxu0 %vm1014_vm9, %v13967_v45  ;;  %v3780_v45 = vld [vmem:[#allocation16 + $0x578] sm:$0xff] }
 0x4c9   : > { %11856 = vmatprep.subr.bf16.mxu0 %v14259_v43 }
 0x4cb   : > { %10376 = vmatmul.mubr.msk.f32.gmra.mrb[36].mxu0 %vm1014_vm9, %v13974_v46  ;;  %v11683_v46 = vpack.c.bf16 %v3780_v45, %v3779_v44 }
 0x4cc   : > { %11858 = vmatpush3.bf16.msra.mxu0 %v14259_v43  ;;  %10378 = vmatprep.mubr.msk.f32.mxu0 %vm1014_vm9, %v13977_v47  ;;  %v15093_v47 = vld [vmem:[#allocation40_spill] sm:$0xff] }
 0x4cd   : > { %11860 = vmatprep.subr.bf16.mxu0 %v14275_v60  ;;  %11684 = vmatprep.subr.bf16.mxu1 %v11683_v46 }
 0x4ce   : > { %11686 = vmatpush3.bf16.msra.mxu1 %v11683_v46  ;;  %v3653_v46 = vld [vmem:[#allocation16 + $0x4d0] sm:$0xff] }
 0x4cf   : > { %10379 = vmatmul.mubr.msk.f32.gmra.mrb[38].mxu0 %vm1014_vm9, %v13984_v48  ;;  %v15094_v48 = vld [vmem:[#allocation41_spill] sm:$0xff] }
 0x4d0   : > { %11862 = vmatpush3.bf16.msra.mxu0 %v14275_v60  ;;  %10485 = vmatprep.mubr.msk.f32.mxu0 %vm1014_vm9, %v13987_v49  ;;  %v3643_v49 = vld [vmem:[#allocation16 + $0x480] sm:$0xff] }
 0x4d1   : > { %11896 = vmatprep.subr.bf16.mxu0 %v14231_v15 }
 0x4d3   : > { %10486 = vmatmul.mubr.msk.f32.vlgmr.msra.gmra.mrb[40].mxu0 %vm1014_vm9, %v13994_v50  ;;  %v3644_v50 = vld [vmem:[#allocation16 + $0x488] sm:$0xff] }
 0x4d4   : > { %11898 = vmatpush3.bf16.msra.mxu0 %v14231_v15  ;;  %10488 = vmatprep.mubr.msk.f32.mxu0 %vm1014_vm9, %v13997_v51  ;;  %v11687_v51 = vpack.c.bf16 %v3644_v50, %v3643_v49 }
 0x4d5   : > { %11900 = vmatprep.subr.bf16.mxu0 %v14245_v5 }
 0x4d6   : > { %11688 = vmatprep.subr.bf16.mxu1 %v11687_v51 }
 0x4d7   : > { %10489 = vmatmul.mubr.msk.f32.gmra.mrb[42].mxu0 %vm1014_vm9, %v14004_v53  ;;  %v15095_v53 = vld [vmem:[#allocation42_spill] sm:$0xff] }
 0x4d8   : > { %11902 = vmatpush3.bf16.msra.mxu0 %v14245_v5  ;;  %10491 = vmatprep.mubr.msk.f32.mxu0 %vm1014_vm9, %v14007_v54  ;;  %v15096_v54 = vld [vmem:[#allocation43_spill] sm:$0xff] }
 0x4d9   : > { %11904 = vmatprep.subr.bf16.mxu0 %v14259_v43 }
 0x4db   : > { %10492 = vmatmul.mubr.msk.f32.gmra.mrb[44].mxu0 %vm1014_vm9, %v14014_v56  ;;  %v15097_v56 = vld [vmem:[#allocation44_spill] sm:$0xff] }
 0x4dc   : > { %11906 = vmatpush3.bf16.msra.mxu0 %v14259_v43  ;;  %10494 = vmatprep.mubr.msk.f32.mxu0 %vm1014_vm9, %v14017_v58  ;;  %v15098_v58 = vld [vmem:[#allocation45_spill] sm:$0xff] }
 0x4dd   : > { %11908 = vmatprep.subr.bf16.mxu0 %v14275_v60 }
 0x4df   : > { %10495 = vmatmul.mubr.msk.f32.gmra.mrb[46].mxu0 %vm1014_vm9, %v15083_v20 }
 0x4e0   : > { %11910 = vmatpush3.bf16.msra.mxu0 %v14275_v60  ;;  %10557 = vmatprep.mubr.msk.f32.mxu0 %vm1014_vm9, %v15084_v21  ;;  %v11691_v21 = vpack.c.bf16 %v3646_v17, %v3645_v16  ;;  %v4099_v16 = vld [vmem:[#allocation16 + $0x590] sm:$0xff]  ;;  %v4100_v17 = vld [vmem:[#allocation16 + $0x598] sm:$0xff] }
 0x4e1   : > { %11944 = vmatprep.subr.bf16.mxu0 %v14231_v15 }
 0x4e3   : > { %10558 = vmatmul.mubr.msk.f32.vlgmr.msra.gmra.mrb[48].mxu0 %vm1014_vm9, %v15085_v26 }
 0x4e4   : > { %11946 = vmatpush3.bf16.msra.mxu0 %v14231_v15  ;;  %10560 = vmatprep.mubr.msk.f32.mxu0 %vm1014_vm9, %v15086_v27 }
 0x4e5   : > { %11948 = vmatprep.subr.bf16.mxu0 %v14245_v5 }
 0x4e7   : > { %10561 = vmatmul.mubr.msk.f32.gmra.mrb[50].mxu0 %vm1014_vm9, %v15087_v31  ;;  %v3649_v31 = vld [vmem:[#allocation16 + $0x4b0] sm:$0xff] }
 0x4e8   : > { %11950 = vmatpush3.bf16.msra.mxu0 %v14245_v5  ;;  %10563 = vmatprep.mubr.msk.f32.mxu0 %vm1014_vm9, %v15088_v32  ;;  %v3650_v32 = vld [vmem:[#allocation16 + $0x4b8] sm:$0xff] }
 0x4e9   : > { %11952 = vmatprep.subr.bf16.mxu0 %v14259_v43  ;;  %v11699_v35 = vpack.c.bf16 %v3650_v32, %v3649_v31  ;;  %v4104_v31 = vld [vmem:[#allocation16 + $0x5b8] sm:$0xff] }
 0x4eb   : > { %10564 = vmatmul.mubr.msk.f32.gmra.mrb[52].mxu0 %vm1014_vm9, %v15089_v36 }
 0x4ec   : > { %11954 = vmatpush3.bf16.msra.mxu0 %v14259_v43  ;;  %10566 = vmatprep.mubr.msk.f32.mxu0 %vm1014_vm9, %v15090_v37 }
 0x4ed   : > { %11956 = vmatprep.subr.bf16.mxu0 %v14275_v60 }
 0x4ef   : > { %10567 = vmatmul.mubr.msk.f32.gmra.mrb[54].mxu0 %vm1014_vm9, %v15091_v41 }
 0x4f0   : > { %11958 = vmatpush3.bf16.msra.mxu0 %v14275_v60  ;;  %10629 = vmatprep.mubr.msk.f32.mxu0 %vm1014_vm9, %v15092_v42  ;;  %v11703_v42 = vpack.c.bf16 %v3652_v39, %v3651_v38 }
 0x4f1   : > { %11992 = vmatprep.subr.bf16.mxu0 %v14231_v15 }
 0x4f3   : > { %10630 = vmatmul.mubr.msk.f32.vlgmr.msra.gmra.mrb[56].mxu0 %vm1014_vm9, %v15093_v47  ;;  %v3654_v47 = vld [vmem:[#allocation16 + $0x4d8] sm:$0xff] }
 0x4f4   : > { %11994 = vmatpush3.bf16.msra.mxu0 %v14231_v15  ;;  %10632 = vmatprep.mubr.msk.f32.mxu0 %vm1014_vm9, %v15094_v48  ;;  %v15099_v15 = vld [vmem:[#allocation46_spill] sm:$0xff]  ;;  %v11707_v49 = vpack.c.bf16 %v3654_v47, %v3653_v46 }
 0x4f5   : > { %11996 = vmatprep.subr.bf16.mxu0 %v14245_v5 }
 0x4f7   : > { %10633 = vmatmul.mubr.msk.f32.gmra.mrb[58].mxu0 %vm1014_vm9, %v15095_v53  ;;  %v3656_v53 = vld [vmem:[#allocation16 + $0x4e8] sm:$0xff] }
 0x4f8   : > { %11998 = vmatpush3.bf16.msra.mxu0 %v14245_v5  ;;  %10635 = vmatprep.mubr.msk.f32.mxu0 %vm1014_vm9, %v15096_v54  ;;  %v15101_v5 = vld [vmem:[#allocation48_spill] sm:$0xff] }
 0x4f9   : > { %12000 = vmatprep.subr.bf16.mxu0 %v14259_v43 }
 0x4fb   : > { %10636 = vmatmul.mubr.msk.f32.gmra.mrb[60].mxu0 %vm1014_vm9, %v15097_v56 }
 0x4fc   : > { %12002 = vmatpush3.bf16.msra.mxu0 %v14259_v43  ;;  %10638 = vmatprep.mubr.msk.f32.mxu0 %vm1014_vm9, %v15098_v58  ;;  %v12846_v43 = vld [vmem:[#allocation2] sm:$0xff] }
 0x4fd   : > { %12004 = vmatprep.subr.bf16.mxu0 %v14275_v60 }
 0x4ff   : > { %10639 = vmatmul.mubr.msk.f32.gmra.mrb[62].mxu0 %vm1014_vm9, %v15099_v15  ;;  %v3657_v15 = vld [vmem:[#allocation16 + $0x4f0] sm:$0xff] }
 0x500   : > { %12006 = vmatpush3.bf16.msra.mxu0 %v14275_v60  ;;  %10701 = vmatprep.mubr.msk.f32.mxu0 %vm1014_vm9, %v15100_v4  ;;  %v3658_v4 = vld [vmem:[#allocation16 + $0x4f8] sm:$0xff] }
 0x503   : > { %10702 = vmatmul.mubr.msk.f32.vlgmr.msra.gmra.mrb[64].mxu0 %vm1014_vm9, %v15101_v5 }
 0x504   : > { %10704 = vmatprep.mubr.msk.f32.mxu0 %vm1014_vm9, %v15102_v12  ;;  %v11715_v12 = vpack.c.bf16 %v3658_v4, %v3657_v15  ;;  %v4332_v15 = vld [vmem:[#allocation16 + $0x600] sm:$0xff]  ;;  %v4333_v4 = vld [vmem:[#allocation16 + $0x608] sm:$0xff] }
 0x507   : > { %10705 = vmatmul.mubr.msk.f32.gmra.mrb[66].mxu0 %vm1014_vm9, %v15103_v63 }
 0x508   : > { %10707 = vmatprep.mubr.msk.f32.mxu0 %vm1014_vm9, %v15104_v2  ;;  %v4097_v2 = vld [vmem:[#allocation16 + $0x580] sm:$0xff] }
 0x50b   : > { %10708 = vmatmul.mubr.msk.f32.gmra.mrb[68].mxu0 %vm1014_vm9, %v15105_v10  ;;  %v4098_v10 = vld [vmem:[#allocation16 + $0x588] sm:$0xff] }
 0x50c   : > { %10710 = vmatprep.mubr.msk.f32.mxu0 %vm1014_vm9, %v15106_v52 }
 0x50f   : > { %10711 = vmatmul.mubr.msk.f32.gmra.mrb[70].mxu0 %vm1014_vm9, %v15107_v61  ;;  %v11735_v61 = vpack.c.bf16 %v4098_v10, %v4097_v2  ;;  %v11783_v2 = vpack.c.bf16 %v4333_v4, %v4332_v15  ;;  %v4463_v15 = vld [vmem:[#allocation16 + $0x688] sm:$0xff] }
 0x510   : > { %10817 = vmatprep.mubr.msk.f32.mxu0 %vm1014_vm9, %v12846_v43 }
 0x560   : > { %v14454_v1 = vpop.f32.mrb[8].mxu0 }
 0x561   : > { %v14456_v59 = vpop.f32.mrb[9].mxu0 }
 0x564   : > { %v14458_v6 = vpop.f32.mrb[10].mxu0 }
 0x565   : > { %v14460_v62 = vpop.f32.mrb[11].mxu0 }
 0x568   : > { %v14462_v60 = vpop.f32.mrb[12].mxu0 }
 0x569   : > { %v14464_v57 = vpop.f32.mrb[13].mxu0 }
 0x56c   : > { %v14466_v24 = vpop.f32.mrb[14].mxu0 }
 0x56d   : > { %v14468_v7 = vpop.f32.mrb[15].mxu0 }
 0x576   : > { %v10183_v18 = vpop.f32.mrb[16].mxu0  ;;  %v14470_v19 = vpop.f32.mrb[80].mxu1 }
 0x577   : > { %v3725_v20 = vpop.f32.mrb[17].mxu0  ;;  %v3603_v22 = vpop.f32.mrb[81].mxu1 }
 0x578   : > { %10225 = vmatprep.mubr.f32.mxu1 %v3725_v20  ;;  %v11739_v20 = vpack.c.bf16 %v4100_v17, %v4099_v16  ;;  %v4335_v16 = vld [vmem:[#allocation16 + $0x618] sm:$0xff] }
 0x579   : > { %10226 = vmatmul.mubr.f32.vlgmr.msra.gmra.mrb[88].mxu1 %v10183_v18 }
 0x57a   : > { %11690 = vmatpush3.bf16.msra.mxu1 %v11687_v51  ;;  %v10186_v26 = vpop.f32.mrb[18].mxu0  ;;  %v14472_v27 = vpop.f32.mrb[82].mxu1  ;;  %v3655_v51 = vld [vmem:[#allocation16 + $0x4e0] sm:$0xff] }
 0x57b   : > { %11692 = vmatprep.subr.bf16.mxu1 %v11691_v21  ;;  %v3735_v29 = vpop.f32.mrb[19].mxu0  ;;  %v14474_v30 = vpop.f32.mrb[83].mxu1  ;;  %v11711_v56 = vpack.c.bf16 %v3656_v53, %v3655_v51  ;;  %v4111_v51 = vld [vmem:[#allocation16 + $0x5f0] sm:$0xff]  ;;  %v4112_v53 = vld [vmem:[#allocation16 + $0x5f8] sm:$0xff] }
 0x57c   : > { %10228 = vmatprep.mubr.f32.mxu1 %v3735_v29  ;;  %v4103_v29 = vld [vmem:[#allocation16 + $0x5b0] sm:$0xff] }
 0x57d   : > { %10229 = vmatmul.mubr.f32.gmra.mrb[90].mxu1 %v10186_v26 }
 0x57e   : > { %11694 = vmatpush3.bf16.msra.mxu1 %v11691_v21  ;;  %v10189_v33 = vpop.f32.mrb[20].mxu0  ;;  %v14476_v34 = vpop.f32.mrb[84].mxu1 }
 0x57f   : > { %11696 = vmatprep.subr.bf16.mxu1 %v11695_v28  ;;  %v3745_v36 = vpop.f32.mrb[21].mxu0  ;;  %v3623_v37 = vpop.f32.mrb[85].mxu1 }
 0x580   : > { %10231 = vmatprep.mubr.f32.mxu1 %v3745_v36 }
 0x581   : > { %10232 = vmatmul.mubr.f32.gmra.mrb[92].mxu1 %v10189_v33  ;;  %v11747_v33 = vpack.c.bf16 %v4104_v31, %v4103_v29  ;;  %v4338_v31 = vld [vmem:[#allocation16 + $0x630] sm:$0xff] }
 0x582   : > { %11698 = vmatpush3.bf16.msra.mxu1 %v11695_v28  ;;  %v10192_v40 = vpop.f32.mrb[22].mxu0  ;;  %v14478_v41 = vpop.f32.mrb[86].mxu1 }
 0x583   : > { %11700 = vmatprep.subr.bf16.mxu1 %v11699_v35  ;;  %v3755_v44 = vpop.f32.mrb[23].mxu0  ;;  %v3633_v45 = vpop.f32.mrb[87].mxu1 }
 0x584   : > { %10234 = vmatprep.mubr.f32.mxu1 %v3755_v44 }
 0x585   : > { %10235 = vmatmul.mubr.f32.gmra.mrb[94].mxu1 %v10192_v40 }
 0x586   : > { %11702 = vmatpush3.bf16.msra.mxu1 %v11699_v35  ;;  %10269 = vmatprep.mubr.f32.mxu1 %v3603_v22  ;;  %v14480_v48 = vpop.f32.mrb[24].mxu0  ;;  %v4101_v22 = vld [vmem:[#allocation16 + $0x5a0] sm:$0xff] }
 0x587   : > { %11704 = vmatprep.subr.bf16.mxu1 %v11703_v42  ;;  %v4057_v50 = vpop.f32.mrb[25].mxu0  ;;  %v11743_v26 = vpack.c.bf16 %v4102_v23, %v4101_v22  ;;  %v4105_v35 = vld [vmem:[#allocation16 + $0x5c0] sm:$0xff] }
 0x588   : > { %v4336_v23 = vld [vmem:[#allocation16 + $0x620] sm:$0xff] }
 0x58a   : > { %11706 = vmatpush3.bf16.msra.mxu1 %v11703_v42  ;;  %v14482_v54 = vpop.f32.mrb[26].mxu0 }
 0x58b   : > { %11708 = vmatprep.subr.bf16.mxu1 %v11707_v49  ;;  %v14484_v58 = vpop.f32.mrb[27].mxu0 }
 0x58e   : > { %11710 = vmatpush3.bf16.msra.mxu1 %v11707_v49  ;;  %v14486_v5 = vpop.f32.mrb[28].mxu0 }
 0x58f   : > { %11712 = vmatprep.subr.bf16.mxu1 %v11711_v56  ;;  %v14488_v63 = vpop.f32.mrb[29].mxu0 }
 0x592   : > { %11714 = vmatpush3.bf16.msra.mxu1 %v11711_v56  ;;  %v14490_v52 = vpop.f32.mrb[30].mxu0 }
 0x593   : > { %11716 = vmatprep.subr.bf16.mxu1 %v11715_v12  ;;  %v14492_v43 = vpop.f32.mrb[31].mxu0 }
 0x596   : > { %11718 = vmatpush3.bf16.msra.mxu1 %v11715_v12  ;;  %v14494_v18 = vpop.f32.mrb[32].mxu0 }
 0x597   : > { %11736 = vmatprep.subr.bf16.mxu1 %v11735_v61  ;;  %v14496_v21 = vpop.f32.mrb[33].mxu0 }
 0x599   : > { %10270 = vmatmul.mubr.f32.vlgmr.msra.gmra.mrb[88].mxu1 %v14470_v19 }
 0x59a   : > { %11738 = vmatpush3.bf16.msra.mxu1 %v11735_v61  ;;  %10272 = vmatprep.mubr.f32.mxu1 %v14474_v30  ;;  %v14500_v25 = vpop.f32.mrb[34].mxu0  ;;  %v4106_v30 = vld [vmem:[#allocation16 + $0x5c8] sm:$0xff]  ;;  %v4334_v61 = vld [vmem:[#allocation16 + $0x610] sm:$0xff] }
 0x59b   : > { %11740 = vmatprep.subr.bf16.mxu1 %v11739_v20  ;;  %v14502_v28 = vpop.f32.mrb[35].mxu0  ;;  %v11751_v38 = vpack.c.bf16 %v4106_v30, %v4105_v35  ;;  %v4340_v30 = vld [vmem:[#allocation16 + $0x640] sm:$0xff] }
 0x59d   : > { %10273 = vmatmul.mubr.f32.gmra.mrb[90].mxu1 %v14472_v27  ;;  %v4107_v27 = vld [vmem:[#allocation16 + $0x5d0] sm:$0xff] }
 0x59e   : > { %11742 = vmatpush3.bf16.msra.mxu1 %v11739_v20  ;;  %10275 = vmatprep.mubr.f32.mxu1 %v3623_v37  ;;  %v14505_v32 = vpop.f32.mrb[36].mxu0  ;;  %v4108_v37 = vld [vmem:[#allocation16 + $0x5d8] sm:$0xff]  ;;  %v11787_v20 = vpack.c.bf16 %v4335_v16, %v4334_v61  ;;  %v4464_v61 = vld [vmem:[#allocation16 + $0x690] sm:$0xff] }
 0x59f   : > { %11744 = vmatprep.subr.bf16.mxu1 %v11743_v26  ;;  %v14507_v19 = vpop.f32.mrb[37].mxu0  ;;  %v11755_v42 = vpack.c.bf16 %v4108_v37, %v4107_v27  ;;  %v4343_v27 = vld [vmem:[#allocation16 + $0x658] sm:$0xff] }
 0x5a0   : > { %v4465_v16 = vld [vmem:[#allocation16 + $0x698] sm:$0xff] }
 0x5a1   : > { %10276 = vmatmul.mubr.f32.gmra.mrb[92].mxu1 %v14476_v34  ;;  %v4109_v34 = vld [vmem:[#allocation16 + $0x5e0] sm:$0xff] }
 0x5a2   : > { %11746 = vmatpush3.bf16.msra.mxu1 %v11743_v26  ;;  %10278 = vmatprep.mubr.f32.mxu1 %v3633_v45  ;;  %v14510_v36 = vpop.f32.mrb[38].mxu0  ;;  %v4110_v45 = vld [vmem:[#allocation16 + $0x5e8] sm:$0xff] }
 0x5a3   : > { %11748 = vmatprep.subr.bf16.mxu1 %v11747_v33  ;;  %v14512_v39 = vpop.f32.mrb[39].mxu0  ;;  %v11759_v47 = vpack.c.bf16 %v4110_v45, %v4109_v34  ;;  %v4337_v26 = vld [vmem:[#allocation16 + $0x628] sm:$0xff] }
 0x5a4   : > { %v11791_v29 = vpack.c.bf16 %v4337_v26, %v4336_v23  ;;  %v11819_v23 = vpack.c.bf16 %v4465_v16, %v4464_v61  ;;  %v4466_v26 = vld [vmem:[#allocation16 + $0x6a0] sm:$0xff]  ;;  %v4699_v61 = vld [vmem:[#allocation16 + $0x710] sm:$0xff]  ;;  %v4700_v16 = vld [vmem:[#allocation16 + $0x718] sm:$0xff] }
 0x5a5   : > { %10279 = vmatmul.mubr.f32.gmra.mrb[94].mxu1 %v14478_v41 }
 0x5a6   : > { %11750 = vmatpush3.bf16.msra.mxu1 %v11747_v33  ;;  %10341 = vmatprep.mubr.f32.mxu1 %v4057_v50  ;;  %v14515_v40 = vpop.f32.mrb[40].mxu0  ;;  %v11763_v50 = vpack.c.bf16 %v4112_v53, %v4111_v51  ;;  %v4339_v33 = vld [vmem:[#allocation16 + $0x638] sm:$0xff] }
 0x5a7   : > { %11752 = vmatprep.subr.bf16.mxu1 %v11751_v38  ;;  %v14517_v44 = vpop.f32.mrb[41].mxu0  ;;  %v11795_v35 = vpack.c.bf16 %v4339_v33, %v4338_v31  ;;  %v4468_v33 = vld [vmem:[#allocation16 + $0x6b0] sm:$0xff] }
 0x5aa   : > { %11754 = vmatpush3.bf16.msra.mxu1 %v11751_v38  ;;  %v14519_v46 = vpop.f32.mrb[42].mxu0  ;;  %v4341_v38 = vld [vmem:[#allocation16 + $0x648] sm:$0xff] }
 0x5ab   : > { %11756 = vmatprep.subr.bf16.mxu1 %v11755_v42  ;;  %v14521_v49 = vpop.f32.mrb[43].mxu0 }
 0x5ae   : > { %11758 = vmatpush3.bf16.msra.mxu1 %v11755_v42  ;;  %v14523_v41 = vpop.f32.mrb[44].mxu0  ;;  %v4344_v42 = vld [vmem:[#allocation16 + $0x660] sm:$0xff] }
 0x5af   : > { %11760 = vmatprep.subr.bf16.mxu1 %v11759_v47  ;;  %v14525_v56 = vpop.f32.mrb[45].mxu0 }
 0x5b2   : > { %11762 = vmatpush3.bf16.msra.mxu1 %v11759_v47  ;;  %v14527_v12 = vpop.f32.mrb[46].mxu0  ;;  %v4346_v47 = vld [vmem:[#allocation16 + $0x670] sm:$0xff] }
 0x5b3   : > { %11764 = vmatprep.subr.bf16.mxu1 %v11763_v50  ;;  %v14529_v10 = vpop.f32.mrb[47].mxu0 }
 0x5b6   : > { %11766 = vmatpush3.bf16.msra.mxu1 %v11763_v50  ;;  %v14531_v17 = vpop.f32.mrb[48].mxu0  ;;  %v4462_v50 = vld [vmem:[#allocation16 + $0x680] sm:$0xff] }
 0x5b7   : > { %11784 = vmatprep.subr.bf16.mxu1 %v11783_v2  ;;  %v14533_v22 = vpop.f32.mrb[49].mxu0  ;;  %v11815_v4 = vpack.c.bf16 %v4463_v15, %v4462_v50  ;;  %v4698_v50 = vld [vmem:[#allocation16 + $0x708] sm:$0xff] }
 0x5b9   : > { %10342 = vmatmul.mubr.f32.vlgmr.msra.gmra.mrb[88].mxu1 %v14480_v48  ;;  %v11799_v48 = vpack.c.bf16 %v4341_v38, %v4340_v30  ;;  %v4470_v38 = vld [vmem:[#allocation16 + $0x6c0] sm:$0xff] }
 0x5ba   : > { %11786 = vmatpush3.bf16.msra.mxu1 %v11783_v2  ;;  %10344 = vmatprep.mubr.f32.mxu1 %v14484_v58  ;;  %v4342_v58 = vld [vmem:[#allocation16 + $0x650] sm:$0xff] }
 0x5bb   : > { %11788 = vmatprep.subr.bf16.mxu1 %v11787_v20 }
 0x5bd   : > { %10345 = vmatmul.mubr.f32.gmra.mrb[90].mxu1 %v14482_v54  ;;  %v14543_v54 = vpop.f32.mrb[50].mxu0 }
 0x5be   : > { %11790 = vmatpush3.bf16.msra.mxu1 %v11787_v20  ;;  %10347 = vmatprep.mubr.f32.mxu1 %v14488_v63  ;;  %v11803_v63 = vpack.c.bf16 %v4343_v27, %v4342_v58  ;;  %v14545_v37 = vpop.f32.mrb[51].mxu0  ;;  %v4473_v58 = vld [vmem:[#allocation16 + $0x6d8] sm:$0xff] }
 0x5bf   : > { %11792 = vmatprep.subr.bf16.mxu1 %v11791_v29  ;;  %v14547_v34 = vpop.f32.mrb[52].mxu0 }
 0x5c0   : > { %v14549_v45 = vpop.f32.mrb[53].mxu0 }
 0x5c1   : > { %10348 = vmatmul.mubr.f32.gmra.mrb[92].mxu1 %v14486_v5  ;;  %v4345_v5 = vld [vmem:[#allocation16 + $0x668] sm:$0xff] }
 0x5c2   : > { %11794 = vmatpush3.bf16.msra.mxu1 %v11791_v29  ;;  %10350 = vmatprep.mubr.f32.mxu1 %v14492_v43  ;;  %v11807_v43 = vpack.c.bf16 %v4345_v5, %v4344_v42  ;;  %v14551_v51 = vpop.f32.mrb[54].mxu0  ;;  %v4467_v29 = vld [vmem:[#allocation16 + $0x6a8] sm:$0xff] }
 0x5c3   : > { %11796 = vmatprep.subr.bf16.mxu1 %v11795_v35  ;;  %v14553_v53 = vpop.f32.mrb[55].mxu0  ;;  %v11823_v31 = vpack.c.bf16 %v4467_v29, %v4466_v26  ;;  %v11867_v26 = vpack.c.bf16 %v4700_v16, %v4699_v61  ;;  %v4701_v29 = vld [vmem:[#allocation16 + $0x720] sm:$0xff]  ;;  %v4934_v61 = vld [vmem:[#allocation16 + $0x790] sm:$0xff]  ;;  %v4935_v16 = vld [vmem:[#allocation16 + $0x798] sm:$0xff] }
 0x5c5   : > { %10351 = vmatmul.mubr.f32.gmra.mrb[94].mxu1 %v14490_v52  ;;  %v4347_v52 = vld [vmem:[#allocation16 + $0x678] sm:$0xff] }
 0x5c6   : > { %11798 = vmatpush3.bf16.msra.mxu1 %v11795_v35  ;;  %10413 = vmatprep.mubr.f32.mxu1 %v14496_v21  ;;  %v11811_v21 = vpack.c.bf16 %v4347_v52, %v4346_v47  ;;  %v14555_v2 = vpop.f32.mrb[56].mxu0  ;;  %v4469_v35 = vld [vmem:[#allocation16 + $0x6b8] sm:$0xff] }
 0x5c7   : > { %11800 = vmatprep.subr.bf16.mxu1 %v11799_v48  ;;  %v14557_v20 = vpop.f32.mrb[57].mxu0  ;;  %v11827_v30 = vpack.c.bf16 %v4469_v35, %v4468_v33 }
 0x5ca   : > { %11802 = vmatpush3.bf16.msra.mxu1 %v11799_v48  ;;  %v4471_v48 = vld [vmem:[#allocation16 + $0x6c8] sm:$0xff] }
 0x5cb   : > { %11804 = vmatprep.subr.bf16.mxu1 %v11803_v63 }
 0x5ce   : > { %11806 = vmatpush3.bf16.msra.mxu1 %v11803_v63  ;;  %v4474_v63 = vld [vmem:[#allocation16 + $0x6e0] sm:$0xff] }
 0x5cf   : > { %11808 = vmatprep.subr.bf16.mxu1 %v11807_v43 }
 0x5d2   : > { %11810 = vmatpush3.bf16.msra.mxu1 %v11807_v43  ;;  %v4476_v43 = vld [vmem:[#allocation16 + $0x6f0] sm:$0xff] }
 0x5d3   : > { %11812 = vmatprep.subr.bf16.mxu1 %v11811_v21 }
 0x5d6   : > { %11814 = vmatpush3.bf16.msra.mxu1 %v11811_v21  ;;  %v4697_v21 = vld [vmem:[#allocation16 + $0x700] sm:$0xff] }
 0x5d7   : > { %11816 = vmatprep.subr.bf16.mxu1 %v11815_v4  ;;  %v11863_v15 = vpack.c.bf16 %v4698_v50, %v4697_v21  ;;  %v4932_v50 = vld [vmem:[#allocation16 + $0x780] sm:$0xff] }
 0x5d9   : > { %10414 = vmatmul.mubr.f32.vlgmr.msra.gmra.mrb[88].mxu1 %v14494_v18  ;;  %v11831_v18 = vpack.c.bf16 %v4471_v48, %v4470_v38  ;;  %v4703_v38 = vld [vmem:[#allocation16 + $0x730] sm:$0xff]  ;;  %v4704_v48 = vld [vmem:[#allocation16 + $0x738] sm:$0xff] }
 0x5da   : > { %11818 = vmatpush3.bf16.msra.mxu1 %v11815_v4  ;;  %10416 = vmatprep.mubr.f32.mxu1 %v14502_v28  ;;  %v4472_v28 = vld [vmem:[#allocation16 + $0x6d0] sm:$0xff] }
 0x5db   : > { %11820 = vmatprep.subr.bf16.mxu1 %v11819_v23 }
 0x5dd   : > { %10417 = vmatmul.mubr.f32.gmra.mrb[90].mxu1 %v14500_v25  ;;  %v14567_v25 = vpop.f32.mrb[58].mxu0 }
 0x5de   : > { %11822 = vmatpush3.bf16.msra.mxu1 %v11819_v23  ;;  %10419 = vmatprep.mubr.f32.mxu1 %v14507_v19  ;;  %v11835_v19 = vpack.c.bf16 %v4473_v58, %v4472_v28  ;;  %v14569_v27 = vpop.f32.mrb[59].mxu0  ;;  %v4705_v58 = vld [vmem:[#allocation16 + $0x740] sm:$0xff] }
 0x5df   : > { %11824 = vmatprep.subr.bf16.mxu1 %v11823_v31  ;;  %v14571_v42 = vpop.f32.mrb[60].mxu0 }
 0x5e0   : > { %v14573_v5 = vpop.f32.mrb[61].mxu0 }
 0x5e1   : > { %10420 = vmatmul.mubr.f32.gmra.mrb[92].mxu1 %v14505_v32  ;;  %v4475_v32 = vld [vmem:[#allocation16 + $0x6e8] sm:$0xff]  ;;  %v14575_v47 = vpop.f32.mrb[62].mxu0 }
 0x5e2   : > { %11826 = vmatpush3.bf16.msra.mxu1 %v11823_v31  ;;  %10422 = vmatprep.mubr.f32.mxu1 %v14512_v39  ;;  %v11839_v39 = vpack.c.bf16 %v4475_v32, %v4474_v63  ;;  %v14577_v52 = vpop.f32.mrb[63].mxu0  ;;  %v4702_v31 = vld [vmem:[#allocation16 + $0x728] sm:$0xff]  ;;  %v4707_v32 = vld [vmem:[#allocation16 + $0x750] sm:$0xff] }
 0x5e3   : > { %11828 = vmatprep.subr.bf16.mxu1 %v11827_v30  ;;  %v14579_v4 = vpop.f32.mrb[64].mxu0 }
 0x5e4   : > { %v14581_v23 = vpop.f32.mrb[65].mxu0 }
 0x5e5   : > { %10423 = vmatmul.mubr.f32.gmra.mrb[94].mxu1 %v14510_v36  ;;  %v4477_v36 = vld [vmem:[#allocation16 + $0x6f8] sm:$0xff]  ;;  %v14584_v33 = vpop.f32.mrb[66].mxu0 }
 0x5e6   : > { %11830 = vmatpush3.bf16.msra.mxu1 %v11827_v30  ;;  %10457 = vmatprep.mubr.f32.mxu1 %v14227_v9  ;;  %v11843_v9 = vpack.c.bf16 %v4477_v36, %v4476_v43  ;;  %v14587_v35 = vpop.f32.mrb[67].mxu0  ;;  %v11871_v30 = vpack.c.bf16 %v4702_v31, %v4701_v29  ;;  %v4709_v43 = vld [vmem:[#allocation16 + $0x760] sm:$0xff]  ;;  %v4937_v29 = vld [vmem:[#allocation16 + $0x7a8] sm:$0xff] }
 0x5e7   : > { %11832 = vmatprep.subr.bf16.mxu1 %v11831_v18 }
 0x5ea   : > { %11834 = vmatpush3.bf16.msra.mxu1 %v11831_v18  ;;  %v14590_v18 = vpop.f32.mrb[68].mxu0 }
 0x5eb   : > { %11836 = vmatprep.subr.bf16.mxu1 %v11835_v19  ;;  %v14593_v28 = vpop.f32.mrb[69].mxu0 }
 0x5ee   : > { %11838 = vmatpush3.bf16.msra.mxu1 %v11835_v19  ;;  %v14596_v19 = vpop.f32.mrb[70].mxu0 }
 0x5ef   : > { %11840 = vmatprep.subr.bf16.mxu1 %v11839_v39  ;;  %v14599_v63 = vpop.f32.mrb[71].mxu0 }
 0x5f2   : > { %11842 = vmatpush3.bf16.msra.mxu1 %v11839_v39 }
 0x5f3   : > { %11844 = vmatprep.subr.bf16.mxu1 %v11843_v9 }
 0x5f6   : > { %11846 = vmatpush3.bf16.msra.mxu1 %v11843_v9  ;;  %v4712_v9 = vld [vmem:[#allocation16 + $0x778] sm:$0xff] }
 0x5f7   : > { %11864 = vmatprep.subr.bf16.mxu1 %v11863_v15 }
 0x5f9   : > { %10458 = vmatmul.mubr.f32.vlgmr.msra.gmra.mrb[88].mxu1 %v14225_v11  ;;  %v11875_v11 = vpack.c.bf16 %v4704_v48, %v4703_v38  ;;  %v4939_v38 = vld [vmem:[#allocation16 + $0x7b8] sm:$0xff] }
 0x5fa   : > { %10460 = vmatprep.mubr.f32.mxu1 %v14239_v8  ;;  %11866 = vmatpush3.bf16.msra.mxu1 %v11863_v15  ;;  %v4706_v8 = vld [vmem:[#allocation16 + $0x748] sm:$0xff] }
 0x5fb   : > { %11868 = vmatprep.subr.bf16.mxu1 %v11867_v26  ;;  %v4933_v15 = vld [vmem:[#allocation16 + $0x788] sm:$0xff] }
 0x5fd   : > { %10461 = vmatmul.mubr.f32.gmra.mrb[90].mxu1 %v14235_v3  ;;  %v11879_v3 = vpack.c.bf16 %v4706_v8, %v4705_v58  ;;  %v4941_v58 = vld [vmem:[#allocation16 + $0x7c8] sm:$0xff]  ;;  %v4943_v8 = vld [vmem:[#allocation16 + $0x7d8] sm:$0xff] }
 0x5fe   : > { %10463 = vmatprep.mubr.f32.mxu1 %v14253_v0  ;;  %11870 = vmatpush3.bf16.msra.mxu1 %v11867_v26  ;;  %v4708_v0 = vld [vmem:[#allocation16 + $0x758] sm:$0xff]  ;;  %v4936_v26 = vld [vmem:[#allocation16 + $0x7a0] sm:$0xff] }
 0x5ff   : > { %11872 = vmatprep.subr.bf16.mxu1 %v11871_v30  ;;  %v11883_v39 = vpack.c.bf16 %v4708_v0, %v4707_v32  ;;  %v11919_v31 = vpack.c.bf16 %v4937_v29, %v4936_v26  ;;  %v4947_v0 = vld [vmem:[#allocation16 + $0x7f8] sm:$0xff]  ;;  %v5180_v26 = vld [vmem:[#allocation16 + $0x868] sm:$0xff] }
 0x601   : > { %10464 = vmatmul.mubr.f32.gmra.mrb[92].mxu1 %v14249_v55  ;;  %v4710_v55 = vld [vmem:[#allocation16 + $0x768] sm:$0xff] }
 0x602   : > { %10466 = vmatprep.mubr.f32.mxu1 %v14269_v14  ;;  %11874 = vmatpush3.bf16.msra.mxu1 %v11871_v30  ;;  %v11887_v36 = vpack.c.bf16 %v4710_v55, %v4709_v43  ;;  %v4711_v14 = vld [vmem:[#allocation16 + $0x770] sm:$0xff]  ;;  %v5168_v43 = vld [vmem:[#allocation16 + $0x808] sm:$0xff] }
 0x603   : > { %11876 = vmatprep.subr.bf16.mxu1 %v11875_v11  ;;  %v11891_v21 = vpack.c.bf16 %v4712_v9, %v4711_v14  ;;  %v4938_v30 = vld [vmem:[#allocation16 + $0x7b0] sm:$0xff]  ;;  %v5171_v14 = vld [vmem:[#allocation16 + $0x820] sm:$0xff]  ;;  %v5172_v9 = vld [vmem:[#allocation16 + $0x828] sm:$0xff] }
 0x604   : > { %v11923_v48 = vpack.c.bf16 %v4939_v38, %v4938_v30  ;;  %v5169_v55 = vld [vmem:[#allocation16 + $0x810] sm:$0xff]  ;;  %v5402_v30 = vld [vmem:[#allocation16 + $0x880] sm:$0xff]  ;;  %v5403_v38 = vld [vmem:[#allocation16 + $0x888] sm:$0xff] }
 0x605   : > { %10467 = vmatmul.mubr.f32.gmra.mrb[94].mxu1 %v14265_v13  ;;  %v11911_v13 = vpack.c.bf16 %v4933_v15, %v4932_v50  ;;  %v5173_v50 = vld [vmem:[#allocation16 + $0x830] sm:$0xff]  ;;  %v5174_v15 = vld [vmem:[#allocation16 + $0x838] sm:$0xff] }
 0x606   : > { %11878 = vmatpush3.bf16.msra.mxu1 %v11875_v11  ;;  %10529 = vmatprep.mubr.f32.mxu1 %v14517_v44  ;;  %v11915_v44 = vpack.c.bf16 %v4935_v16, %v4934_v61  ;;  %v4940_v11 = vld [vmem:[#allocation16 + $0x7c0] sm:$0xff]  ;;  %v5176_v16 = vld [vmem:[#allocation16 + $0x848] sm:$0xff] }
 0x607   : > { %11880 = vmatprep.subr.bf16.mxu1 %v11879_v3  ;;  %v5175_v61 = vld [vmem:[#allocation16 + $0x840] sm:$0xff] }
 0x60a   : > { %11882 = vmatpush3.bf16.msra.mxu1 %v11879_v3  ;;  %v4945_v3 = vld [vmem:[#allocation16 + $0x7e8] sm:$0xff] }
 0x60b   : > { %11884 = vmatprep.subr.bf16.mxu1 %v11883_v39 }
 0x60e   : > { %11886 = vmatpush3.bf16.msra.mxu1 %v11883_v39  ;;  %v5167_v39 = vld [vmem:[#allocation16 + $0x800] sm:$0xff] }
 0x60f   : > { %11888 = vmatprep.subr.bf16.mxu1 %v11887_v36 }
 0x612   : > { %11890 = vmatpush3.bf16.msra.mxu1 %v11887_v36  ;;  %v5170_v36 = vld [vmem:[#allocation16 + $0x818] sm:$0xff] }
 0x613   : > { %11892 = vmatprep.subr.bf16.mxu1 %v11891_v21 }
 0x616   : > { %11894 = vmatpush3.bf16.msra.mxu1 %v11891_v21  ;;  %v11967_v21 = vpack.c.bf16 %v5172_v9, %v5171_v14  ;;  %v5575_v14 = vld [vmem:[#allocation13 + $0xa8] sm:$0xff]  ;;  %v8563_v9 = vld [vmem:[#allocation12 + $0x1] ss:$0 sm:$0xff] }
 0x617   : > { %11912 = vmatprep.subr.bf16.mxu1 %v11911_v13 }
 0x619   : > { %10530 = vmatmul.mubr.f32.vlgmr.msra.gmra.mrb[88].mxu1 %v14515_v40  ;;  %v11927_v40 = vpack.c.bf16 %v4941_v58, %v4940_v11  ;;  %v5405_v11 = vld [vmem:[#allocation16 + $0x898] sm:$0xff]  ;;  %v5406_v58 = vld [vmem:[#allocation16 + $0x8a0] sm:$0xff] }
 0x61a   : > { %11914 = vmatpush3.bf16.msra.mxu1 %v11911_v13  ;;  %10532 = vmatprep.mubr.f32.mxu1 %v14521_v49  ;;  %v4942_v49 = vld [vmem:[#allocation16 + $0x7d0] sm:$0xff]  ;;  %v11971_v13 = vpack.c.bf16 %v5174_v15, %v5173_v50 }
 0x61b   : > { %11916 = vmatprep.subr.bf16.mxu1 %v11915_v44  ;;  %v5576_v50 = vld [vmem:[#allocation13 + $0xb0] sm:$0xff]  ;;  %v5577_v15 = vld [vmem:[#allocation13 + $0xb8] sm:$0xff] }
 0x61d   : > { %10533 = vmatmul.mubr.f32.gmra.mrb[90].mxu1 %v14519_v46  ;;  %v11931_v46 = vpack.c.bf16 %v4943_v8, %v4942_v49  ;;  %v5408_v8 = vld [vmem:[#allocation16 + $0x8b0] sm:$0xff] }
 0x61e   : > { %11918 = vmatpush3.bf16.msra.mxu1 %v11915_v44  ;;  %10535 = vmatprep.mubr.f32.mxu1 %v14525_v56  ;;  %v4944_v56 = vld [vmem:[#allocation16 + $0x7e0] sm:$0xff]  ;;  %v5178_v44 = vld [vmem:[#allocation16 + $0x858] sm:$0xff] }
 0x61f   : > { %11920 = vmatprep.subr.bf16.mxu1 %v11919_v31  ;;  %v11935_v32 = vpack.c.bf16 %v4945_v3, %v4944_v56  ;;  %v5410_v3 = vld [vmem:[#allocation16 + $0x8c0] sm:$0xff] }
 0x621   : > { %10536 = vmatmul.mubr.f32.gmra.mrb[92].mxu1 %v14523_v41  ;;  %v4946_v41 = vld [vmem:[#allocation16 + $0x7f0] sm:$0xff] }
 0x622   : > { %11922 = vmatpush3.bf16.msra.mxu1 %v11919_v31  ;;  %10538 = vmatprep.mubr.f32.mxu1 %v14529_v10  ;;  %v11939_v10 = vpack.c.bf16 %v4947_v0, %v4946_v41  ;;  %v5182_v31 = vld [vmem:[#allocation16 + $0x878] sm:$0xff]  ;;  %v5415_v0 = vld [vmem:[#allocation16 + $0x8e8] sm:$0xff] }
 0x623   : > { %11924 = vmatprep.subr.bf16.mxu1 %v11923_v48  ;;  %v5413_v41 = vld [vmem:[#allocation16 + $0x8d8] sm:$0xff] }
 0x625   : > { %10539 = vmatmul.mubr.f32.gmra.mrb[94].mxu1 %v14527_v12  ;;  %v11959_v12 = vpack.c.bf16 %v5168_v43, %v5167_v39  ;;  %v5417_v39 = vld [vmem:[#allocation16 + $0x8f8] sm:$0xff] }
 0x626   : > { %11926 = vmatpush3.bf16.msra.mxu1 %v11923_v48  ;;  %10601 = vmatprep.mubr.f32.mxu1 %v14533_v22  ;;  %v11963_v22 = vpack.c.bf16 %v5170_v36, %v5169_v55  ;;  %v5404_v48 = vld [vmem:[#allocation16 + $0x890] sm:$0xff]  ;;  %v5570_v43 = vld [vmem:[#allocation13 + $0x80] sm:$0xff] }
 0x627   : > { %11928 = vmatprep.subr.bf16.mxu1 %v11927_v40  ;;  %v5572_v55 = vld [vmem:[#allocation13 + $0x90] sm:$0xff]  ;;  %v5573_v36 = vld [vmem:[#allocation13 + $0x98] sm:$0xff] }
 0x62a   : > { %11930 = vmatpush3.bf16.msra.mxu1 %v11927_v40  ;;  %v5407_v40 = vld [vmem:[#allocation16 + $0x8a8] sm:$0xff] }
 0x62b   : > { %11932 = vmatprep.subr.bf16.mxu1 %v11931_v46  ;;  %v12015_v49 = vpack.c.bf16 %v5407_v40, %v5406_v58 }
 0x62e   : > { %11934 = vmatpush3.bf16.msra.mxu1 %v11931_v46  ;;  %v5409_v46 = vld [vmem:[#allocation16 + $0x8b8] sm:$0xff] }
 0x62f   : > { %11936 = vmatprep.subr.bf16.mxu1 %v11935_v32  ;;  %v12019_v56 = vpack.c.bf16 %v5409_v46, %v5408_v8  ;;  %v12847_v46 = vld [vmem:[#allocation2 + $0x140] sm:$0xff] }
 0x632   : > { %11938 = vmatpush3.bf16.msra.mxu1 %v11935_v32  ;;  %v5411_v32 = vld [vmem:[#allocation16 + $0x8c8] sm:$0xff] }
 0x633   : > { %11940 = vmatprep.subr.bf16.mxu1 %v11939_v10 }
 0x636   : > { %11942 = vmatpush3.bf16.msra.mxu1 %v11939_v10 }
 0x637   : > { %11960 = vmatprep.subr.bf16.mxu1 %v11959_v12 }
 0x639   : > { %10602 = vmatmul.mubr.f32.vlgmr.msra.gmra.mrb[88].mxu1 %v14531_v17  ;;  %v11975_v17 = vpack.c.bf16 %v5176_v16, %v5175_v61  ;;  %v12051_v61 = vpack.c.bf16 %v5577_v15, %v5576_v50  ;;  %v5578_v16 = vld [vmem:[#allocation13 + $0xc0] sm:$0xff] }
 0x63a   : > { %11962 = vmatpush3.bf16.msra.mxu1 %v11959_v12  ;;  %10604 = vmatprep.mubr.f32.mxu1 %v14545_v37  ;;  %v5177_v37 = vld [vmem:[#allocation16 + $0x850] sm:$0xff]  ;;  %v5571_v12 = vld [vmem:[#allocation13 + $0x88] sm:$0xff] }
 0x63b   : > { %11964 = vmatprep.subr.bf16.mxu1 %v11963_v22 }
 0x63d   : > { %10605 = vmatmul.mubr.f32.gmra.mrb[90].mxu1 %v14543_v54  ;;  %v11979_v54 = vpack.c.bf16 %v5178_v44, %v5177_v37  ;;  %v5580_v37 = vld [vmem:[#allocation13 + $0xd0] sm:$0xff]  ;;  %v5582_v44 = vld [vmem:[#allocation13 + $0xe0] sm:$0xff] }
 0x63e   : > { %11966 = vmatpush3.bf16.msra.mxu1 %v11963_v22  ;;  %10607 = vmatprep.mubr.f32.mxu1 %v14549_v45  ;;  %v5179_v45 = vld [vmem:[#allocation16 + $0x860] sm:$0xff] }
 0x63f   : > { %11968 = vmatprep.subr.bf16.mxu1 %v11967_v21  ;;  %v11983_v29 = vpack.c.bf16 %v5180_v26, %v5179_v45  ;;  %v5574_v22 = vld [vmem:[#allocation13 + $0xa0] sm:$0xff]  ;;  %v5584_v45 = vld [vmem:[#allocation13 + $0xf0] sm:$0xff]  ;;  %v5585_v26 = vld [vmem:[#allocation13 + $0xf8] sm:$0xff] }
 0x641   : > { %10608 = vmatmul.mubr.f32.gmra.mrb[92].mxu1 %v14547_v34  ;;  %v5181_v34 = vld [vmem:[#allocation16 + $0x870] sm:$0xff] }
 0x642   : > { %11970 = vmatpush3.bf16.msra.mxu1 %v11967_v21  ;;  %10610 = vmatprep.mubr.f32.mxu1 %v14553_v53  ;;  %v11987_v53 = vpack.c.bf16 %v5182_v31, %v5181_v34  ;;  %v12047_v21 = vpack.c.bf16 %v5575_v14, %v5574_v22  ;;  %v3353_v34 = vadd.f32 %v8563_v9, %v14460_v62 }
 0x643   : > { %11972 = vmatprep.subr.bf16.mxu1 %v11971_v13  ;;  %v3354_v31 = vadd.f32 %v14458_v6, %v8563_v9  ;;  %v3358_v6 = vadd.f32 %v14466_v24, %v8563_v9 }
 0x644   : > { %vm3361_vm15 = vcmp.ge.f32.partialorder %v3353_v34, 0.0 }
 0x645   : > { %10611 = vmatmul.mubr.f32.gmra.mrb[94].mxu1 %v14551_v51  ;;  %v12007_v51 = vpack.c.bf16 %v5403_v38, %v5402_v30  ;;  %v3355_v30 = vadd.f32 %v8563_v9, %v14464_v57  ;;  %vm3362_vm1 = vcmp.ge.f32.partialorder %v3354_v31, 0.0  ;;  %vm3366_vm5 = vcmp.ge.f32.partialorder %v3358_v6, 0.0 }
 0x646   : > { %11974 = vmatpush3.bf16.msra.mxu1 %v11971_v13  ;;  %10673 = vmatprep.mubr.f32.mxu1 %v14557_v20  ;;  %v12011_v20 = vpack.c.bf16 %v5405_v11, %v5404_v48  ;;  %v3351_v13 = vadd.f32 %v8563_v9, %v14456_v59  ;;  %v5581_v59 = vld [vmem:[#allocation13 + $0xd8] sm:$0xff]  ;;  %v3356_v48 = vadd.f32 %v14462_v60, %v8563_v9 }
 0x647   : > { %11976 = vmatprep.subr.bf16.mxu1 %v11975_v17  ;;  %v3371_v11 = vmul.f32 0.2, %v3355_v30  ;;  %vm3363_vm2 = vcmp.ge.f32.partialorder %v3355_v30, 0.0 }
 0x648   : > { %vm3359_vm13 = vcmp.ge.f32.partialorder %v3351_v13, 0.0  ;;  %vm3364_vm3 = vcmp.ge.f32.partialorder %v3356_v48, 0.0 }
 0x649   : > { %v3379_v57 = vsel %vm3363_vm2, %v3355_v30, %v3371_v11  ;;  %v12850_v30 = vld [vmem:[#allocation2 + $0x10] sm:$0xff]  ;;  %v12854_v11 = vld [vmem:[#allocation2 + $0x20] sm:$0xff] }
 0x64a   : > { %11978 = vmatpush3.bf16.msra.mxu1 %v11975_v17  ;;  %v5579_v17 = vld [vmem:[#allocation13 + $0xc8] sm:$0xff] }
 0x64b   : > { %11980 = vmatprep.subr.bf16.mxu1 %v11979_v54 }
 0x64e   : > { %11982 = vmatpush3.bf16.msra.mxu1 %v11979_v54  ;;  %v5583_v54 = vld [vmem:[#allocation13 + $0xe8] sm:$0xff] }
 0x64f   : > { %11984 = vmatprep.subr.bf16.mxu1 %v11983_v29 }
 0x652   : > { %11986 = vmatpush3.bf16.msra.mxu1 %v11983_v29  ;;  %v3352_v29 = vadd.f32 %v14454_v1, %v8563_v9  ;;  %v3357_v1 = vadd.f32 %v8563_v9, %v14468_v7 }
 0x653   : > { %11988 = vmatprep.subr.bf16.mxu1 %v11987_v53 }
 0x654   : > { %vm3360_vm14 = vcmp.ge.f32.partialorder %v3352_v29, 0.0  ;;  %v3373_v40 = vmul.f32 0.2, %v3357_v1  ;;  %vm3365_vm4 = vcmp.ge.f32.partialorder %v3357_v1, 0.0 }
 0x656   : > { %11990 = vmatpush3.bf16.msra.mxu1 %v11987_v53  ;;  %v3369_v53 = vmul.f32 0.2, %v3353_v34  ;;  %v3381_v8 = vsel %vm3365_vm4, %v3357_v1, %v3373_v40  ;;  %v12855_v1 = vld [vmem:[#allocation2 + $0x160] sm:$0xff]  ;;  %v12858_v40 = vld [vmem:[#allocation2 + $0x30] sm:$0xff] }
 0x657   : > { %12008 = vmatprep.subr.bf16.mxu1 %v12007_v51 }
 0x658   : > { %v3377_v62 = vsel %vm3361_vm15, %v3353_v34, %v3369_v53  ;;  %v12849_v53 = vld [vmem:[#allocation2 + $0x148] sm:$0xff] }
 0x659   : > { %10674 = vmatmul.mubr.f32.vlgmr.msra.gmra.mrb[88].mxu1 %v14555_v2  ;;  %v12023_v2 = vpack.c.bf16 %v5411_v32, %v5410_v3 }
 0x65a   : > { %12010 = vmatpush3.bf16.msra.mxu1 %v12007_v51  ;;  %10676 = vmatprep.mubr.f32.mxu1 %v14569_v27  ;;  %v5412_v27 = vld [vmem:[#allocation16 + $0x8d0] sm:$0xff]  ;;  %v3370_v51 = vmul.f32 0.2, %v3354_v31 }
 0x65b   : > { %12012 = vmatprep.subr.bf16.mxu1 %v12011_v20 }
 0x65c   : > { %v3378_v58 = vsel %vm3362_vm1, %v3354_v31, %v3370_v51  ;;  %v12848_v31 = vld [vmem:[#allocation2 + $0x8] sm:$0xff]  ;;  %v12852_v51 = vld [vmem:[#allocation2 + $0x18] sm:$0xff] }
 0x65d   : > { %10677 = vmatmul.mubr.f32.gmra.mrb[90].mxu1 %v14567_v25  ;;  %v12027_v25 = vpack.c.bf16 %v5413_v41, %v5412_v27 }
 0x65e   : > { %12014 = vmatpush3.bf16.msra.mxu1 %v12011_v20  ;;  %10679 = vmatprep.mubr.f32.mxu1 %v14573_v5  ;;  %v5414_v5 = vld [vmem:[#allocation16 + $0x8e0] sm:$0xff]  ;;  %v3372_v20 = vmul.f32 0.2, %v3356_v48 }
 0x65f   : > { %12016 = vmatprep.subr.bf16.mxu1 %v12015_v49  ;;  %v12031_v10 = vpack.c.bf16 %v5415_v0, %v5414_v5  ;;  %v8630_v5 = vld [vmem:[#allocation15 + $0x1] ss:$0 sm:$0xff] }
 0x660   : > { %v3380_v60 = vsel %vm3364_vm3, %v3356_v48, %v3372_v20  ;;  %v12853_v48 = vld [vmem:[#allocation2 + $0x158] sm:$0xff]  ;;  %v12857_v20 = vld [vmem:[#allocation2 + $0x168] sm:$0xff] }
 0x661   : > { %10680 = vmatmul.mubr.f32.gmra.mrb[92].mxu1 %v14571_v42  ;;  %v5416_v42 = vld [vmem:[#allocation16 + $0x8f0] sm:$0xff] }
 0x662   : > { %12018 = vmatpush3.bf16.msra.mxu1 %v12015_v49  ;;  %10682 = vmatprep.mubr.f32.mxu1 %v14577_v52  ;;  %v12035_v52 = vpack.c.bf16 %v5417_v39, %v5416_v42  ;;  %v3374_v49 = vmul.f32 0.2, %v3358_v6 }
 0x663   : > { %12020 = vmatprep.subr.bf16.mxu1 %v12019_v56 }
 0x664   : > { %v3382_v7 = vsel %vm3366_vm5, %v3358_v6, %v3374_v49  ;;  %v5953_v6 = vld [vmem:[#allocation16 + $0x980] sm:$0xff] }
 0x665   : > { %10683 = vmatmul.mubr.f32.gmra.mrb[94].mxu1 %v14575_v47  ;;  %v12039_v47 = vpack.c.bf16 %v5571_v12, %v5570_v43 }
 0x666   : > { %12022 = vmatpush3.bf16.msra.mxu1 %v12019_v56  ;;  %10745 = vmatprep.mubr.f32.mxu1 %v14581_v23  ;;  %v12043_v23 = vpack.c.bf16 %v5573_v36, %v5572_v55 }
 0x667   : > { %12024 = vmatprep.subr.bf16.mxu1 %v12023_v2 }
 0x66a   : > { %12026 = vmatpush3.bf16.msra.mxu1 %v12023_v2 }
 0x66b   : > { %12028 = vmatprep.subr.bf16.mxu1 %v12027_v25 }
 0x66e   : > { %12030 = vmatpush3.bf16.msra.mxu1 %v12027_v25 }
 0x66f   : > { %12032 = vmatprep.subr.bf16.mxu1 %v12031_v10 }
 0x672   : > { %12034 = vmatpush3.bf16.msra.mxu1 %v12031_v10 }
 0x673   : > { %12036 = vmatprep.subr.bf16.mxu1 %v12035_v52 }
 0x676   : > { %12038 = vmatpush3.bf16.msra.mxu1 %v12035_v52 }
 0x677   : > { %12040 = vmatprep.subr.bf16.mxu1 %v12039_v47 }
 0x679   : > { %10746 = vmatmul.mubr.f32.vlgmr.msra.gmra.mrb[88].mxu1 %v14579_v4  ;;  %v3367_v4 = vmul.f32 0.2, %v3351_v13 }
 0x67a   : > { %12042 = vmatpush3.bf16.msra.mxu1 %v12039_v47  ;;  %10748 = vmatprep.mubr.f32.mxu1 %v14587_v35  ;;  %v12055_v35 = vpack.c.bf16 %v5579_v17, %v5578_v16 }
 0x67b   : > { %12044 = vmatprep.subr.bf16.mxu1 %v12043_v23 }
 0x67d   : > { %10749 = vmatmul.mubr.f32.gmra.mrb[90].mxu1 %v14584_v33  ;;  %v3375_v33 = vsel %vm3359_vm13, %v3351_v13, %v3367_v4 }
 0x67e   : > { %12046 = vmatpush3.bf16.msra.mxu1 %v12043_v23  ;;  %10751 = vmatprep.mubr.f32.mxu1 %v14593_v28  ;;  %v12059_v28 = vpack.c.bf16 %v5581_v59, %v5580_v37 }
 0x67f   : > { %12048 = vmatprep.subr.bf16.mxu1 %v12047_v21 }
 0x681   : > { %10752 = vmatmul.mubr.f32.gmra.mrb[92].mxu1 %v14590_v18  ;;  %v12063_v18 = vpack.c.bf16 %v5583_v54, %v5582_v44 }
 0x682   : > { %12050 = vmatpush3.bf16.msra.mxu1 %v12047_v21  ;;  %10754 = vmatprep.mubr.f32.mxu1 %v14599_v63  ;;  %v12067_v63 = vpack.c.bf16 %v5585_v26, %v5584_v45 }
 0x683   : > { %12052 = vmatprep.subr.bf16.mxu1 %v12051_v61 }
 0x685   : > { %10755 = vmatmul.mubr.f32.gmra.mrb[94].mxu1 %v14596_v19  ;;  %v3368_v19 = vmul.f32 0.2, %v3352_v29 }
 0x686   : > { %12054 = vmatpush3.bf16.msra.mxu1 %v12051_v61  ;;  %10789 = vmatprep.mubr.f32.mxu1 %v3375_v33 }
 0x687   : > { %12056 = vmatprep.subr.bf16.mxu1 %v12055_v35  ;;  %v3376_v38 = vsel %vm3360_vm14, %v3352_v29, %v3368_v19 }
 0x68a   : > { %12058 = vmatpush3.bf16.msra.mxu1 %v12055_v35 }
 0x68b   : > { %12060 = vmatprep.subr.bf16.mxu1 %v12059_v28 }
 0x68e   : > { %12062 = vmatpush3.bf16.msra.mxu1 %v12059_v28 }
 0x68f   : > { %12064 = vmatprep.subr.bf16.mxu1 %v12063_v18 }
 0x692   : > { %12066 = vmatpush3.bf16.msra.mxu1 %v12063_v18 }
 0x693   : > { %12068 = vmatprep.subr.bf16.mxu1 %v12067_v63 }
 0x696   : > { %12070 = vmatpush3.bf16.msra.mxu1 %v12067_v63 }
 0x699   : > { %10790 = vmatmul.mubr.f32.vlgmr.msra.gmra.mrb[96].mxu1 %v3376_v38  ;;  %v12851_v38 = vld [vmem:[#allocation2 + $0x150] sm:$0xff] }
 0x69a   : > { %10792 = vmatprep.mubr.f32.mxu1 %v3377_v62  ;;  %v12856_v62 = vld [vmem:[#allocation2 + $0x28] sm:$0xff] }
 0x69d   : > { %10793 = vmatmul.mubr.f32.gmra.mrb[98].mxu1 %v3378_v58  ;;  %v5954_v58 = vld [vmem:[#allocation16 + $0x988] sm:$0xff] }
 0x69e   : > { %10795 = vmatprep.mubr.f32.mxu1 %v3379_v57  ;;  %v12859_v57 = vld [vmem:[#allocation2 + $0x170] sm:$0xff]  ;;  %v12103_v49 = vpack.c.bf16 %v5954_v58, %v5953_v6  ;;  %v8417_v58 = vld [vmem:[#allocation18] ss:$0 sm:$0xff] }
 0x69f   : > { %v12888_v6 = vld [vmem:[#allocation2 + $0x210] sm:$0xff]  ;;  %vm840_vm15 = vcmp.ge.f32.partialorder %v8417_v58, 0.0 }
 0x6a1   : > { %10796 = vmatmul.mubr.f32.gmra.mrb[100].mxu1 %v3380_v60  ;;  %v12860_v60 = vld [vmem:[#allocation2 + $0x38] sm:$0xff] }
 0x6a2   : > { %10798 = vmatprep.mubr.f32.mxu1 %v3381_v8  ;;  %v12861_v8 = vld [vmem:[#allocation2 + $0x178] sm:$0xff] }
 0x6a5   : > { %10799 = vmatmul.mubr.f32.gmra.mrb[102].mxu1 %v3382_v7  ;;  %v12862_v7 = vld [vmem:[#allocation2 + $0x40] sm:$0xff] }
 0x6a6   : > { %11149 = vmatprep.mubr.msk.f32.mxu1 %vm1014_vm9, %v12847_v46  ;;  %v12863_v46 = vld [vmem:[#allocation2 + $0x180] sm:$0xff] }
 0x74c   : > { %v14643_v56 = vpop.f32.mrb[88].mxu1 }
 0x74d   : > { %v14645_v24 = vpop.f32.mrb[89].mxu1 }
 0x750   : > { %v14647_v3 = vpop.f32.mrb[90].mxu1 }
 0x751   : > { %v14649_v32 = vpop.f32.mrb[91].mxu1 }
 0x754   : > { %v14651_v2 = vpop.f32.mrb[92].mxu1 }
 0x755   : > { %v14653_v27 = vpop.f32.mrb[93].mxu1 }
 0x758   : > { %v14655_v41 = vpop.f32.mrb[94].mxu1 }
 0x759   : > { %v14657_v25 = vpop.f32.mrb[95].mxu1 }
 0x76c   : > { %v10791_v0 = vpop.f32.mrb[96].mxu1 }
 0x76d   : > { %v5666_v10 = vadd.f32 %v10791_v0, %v8630_v5  ;;  %v5660_v42 = vpop.f32.mrb[97].mxu1  ;;  %v12865_v0 = vld [vmem:[#allocation2 + $0x188] sm:$0xff] }
 0x76e   : > { %v5661_v39 = vadd.f32 %v8630_v5, %v5660_v42  ;;  %v5956_v42 = vld [vmem:[#allocation16 + $0x998] sm:$0xff] }
 0x76f   : > { %vm5700_vm6 = vcmp.ge.f32.partialorder %v5666_v10, 0.0  ;;  %v5708_v52 = vmul.f32 0.2, %v5666_v10 }
 0x770   : > { %vm5699_vm7 = vcmp.ge.f32.partialorder %v5661_v39, 0.0  ;;  %v5707_v43 = vmul.f32 0.2, %v5661_v39  ;;  %v10794_v12 = vpop.f32.mrb[98].mxu1 }
 0x771   : > { %v14659_v47 = vsel %vm5700_vm6, %v5666_v10, %v5708_v52  ;;  %v5676_v55 = vadd.f32 %v10794_v12, %v8630_v5  ;;  %v5670_v36 = vpop.f32.mrb[99].mxu1  ;;  %v5955_v10 = vld [vmem:[#allocation16 + $0x990] sm:$0xff]  ;;  %v12868_v12 = vld [vmem:[#allocation2 + $0x58] sm:$0xff] }
 0x772   : > { %v14661_v23 = vsel %vm5699_vm7, %v5661_v39, %v5707_v43  ;;  %v5671_v22 = vadd.f32 %v8630_v5, %v5670_v36  ;;  %v12866_v39 = vld [vmem:[#allocation2 + $0x50] sm:$0xff]  ;;  %v12107_v43 = vpack.c.bf16 %v5956_v42, %v5955_v10  ;;  %v12870_v36 = vld [vmem:[#allocation2 + $0x60] sm:$0xff] }
 0x773   : > { %v14665_v14 = vpack.c.bf16 %v14659_v47, %v14661_v23  ;;  %vm5702_vm8 = vcmp.ge.f32.partialorder %v5676_v55, 0.0  ;;  %v5710_v9 = vmul.f32 0.2, %v5676_v55  ;;  %v12867_v52 = vld [vmem:[#allocation2 + $0x190] sm:$0xff] }
 0x774   : > { %vm5701_vm10 = vcmp.ge.f32.partialorder %v5671_v22, 0.0  ;;  %v5709_v21 = vmul.f32 0.2, %v5671_v22  ;;  %v10797_v50 = vpop.f32.mrb[100].mxu1 }
 0x775   : > { %v14667_v15 = vsel %vm5702_vm8, %v5676_v55, %v5710_v9  ;;  %v5686_v13 = vadd.f32 %v10797_v50, %v8630_v5  ;;  %v5680_v61 = vpop.f32.mrb[101].mxu1  ;;  %12072 = vmatprep.subr.bf16.mxu0 %v14665_v14  ;;  %12296 = vmatprep.subr.bf16.mxu1 %v14665_v14  ;;  %v12869_v55 = vld [vmem:[#allocation2 + $0x198] sm:$0xff]  ;;  %v12872_v50 = vld [vmem:[#allocation2 + $0x68] sm:$0xff] }
 0x776   : > { %v14671_v16 = vsel %vm5701_vm10, %v5671_v22, %v5709_v21  ;;  %v5681_v17 = vadd.f32 %v8630_v5, %v5680_v61  ;;  %12074 = vmatpush3.bf16.msra.mxu0 %v14665_v14  ;;  %12298 = vmatpush3.bf16.msra.mxu1 %v14665_v14  ;;  %v12871_v22 = vld [vmem:[#allocation2 + $0x1a0] sm:$0xff]  ;;  %v12874_v61 = vld [vmem:[#allocation2 + $0x70] sm:$0xff] }
 0x777   : > { %v14677_v4 = vpack.c.bf16 %v14667_v15, %v14671_v16  ;;  %vm5704_vm11 = vcmp.ge.f32.partialorder %v5686_v13, 0.0  ;;  %v5712_v35 = vmul.f32 0.2, %v5686_v13  ;;  %v5957_v9 = vld [vmem:[#allocation16 + $0x9a0] sm:$0xff]  ;;  %v5958_v21 = vld [vmem:[#allocation16 + $0x9a8] sm:$0xff] }
 0x778   : > { %vm5703_vm12 = vcmp.ge.f32.partialorder %v5681_v17, 0.0  ;;  %v5711_v37 = vmul.f32 0.2, %v5681_v17  ;;  %v10800_v59 = vpop.f32.mrb[102].mxu1 }
 0x779   : > { %v14679_v33 = vsel %vm5704_vm11, %v5686_v13, %v5712_v35  ;;  %v5696_v28 = vadd.f32 %v10800_v59, %v8630_v5  ;;  %v5690_v44 = vpop.f32.mrb[103].mxu1  ;;  %12076 = vmatprep.subr.bf16.mxu0 %v14677_v4  ;;  %12300 = vmatprep.subr.bf16.mxu1 %v14677_v4  ;;  %v12873_v13 = vld [vmem:[#allocation2 + $0x1a8] sm:$0xff]  ;;  %v5960_v35 = vld [vmem:[#allocation16 + $0x9b8] sm:$0xff]  ;;  %v12111_v59 = vpack.c.bf16 %v5958_v21, %v5957_v9 }
 0x77a   : > { %v14683_v54 = vsel %vm5703_vm12, %v5681_v17, %v5711_v37  ;;  %v5691_v18 = vadd.f32 %v8630_v5, %v5690_v44  ;;  %12078 = vmatpush3.bf16.msra.mxu0 %v14677_v4  ;;  %12302 = vmatpush3.bf16.msra.mxu1 %v14677_v4  ;;  %v12864_v5 = vld [vmem:[#allocation2 + $0x48] sm:$0xff]  ;;  %v12875_v37 = vld [vmem:[#allocation2 + $0x1b0] sm:$0xff]  ;;  %v12877_v44 = vld [vmem:[#allocation2 + $0x1b8] sm:$0xff] }
 0x77b   : > { %v14689_v45 = vpack.c.bf16 %v14679_v33, %v14683_v54  ;;  %vm5706_vm13 = vcmp.ge.f32.partialorder %v5696_v28, 0.0  ;;  %v5714_v26 = vmul.f32 0.2, %v5696_v28  ;;  %v5959_v17 = vld [vmem:[#allocation16 + $0x9b0] sm:$0xff]  ;;  %v5962_v21 = vld [vmem:[#allocation16 + $0x9c8] sm:$0xff] }
 0x77c   : > { %vm5705_vm14 = vcmp.ge.f32.partialorder %v5691_v18, 0.0  ;;  %v5713_v63 = vmul.f32 0.2, %v5691_v18 }
 0x77d   : > { %v14691_v29 = vsel %vm5706_vm13, %v5696_v28, %v5714_v26  ;;  %12080 = vmatprep.subr.bf16.mxu0 %v14689_v45  ;;  %12304 = vmatprep.subr.bf16.mxu1 %v14689_v45  ;;  %v12876_v28 = vld [vmem:[#allocation2 + $0x78] sm:$0xff]  ;;  %v12878_v26 = vld [vmem:[#allocation2 + $0x1c0] sm:$0xff] }
 0x77e   : > { %v14695_v34 = vsel %vm5705_vm14, %v5691_v18, %v5713_v63  ;;  %12082 = vmatpush3.bf16.msra.mxu0 %v14689_v45  ;;  %12306 = vmatpush3.bf16.msra.mxu1 %v14689_v45  ;;  %v12115_v18 = vpack.c.bf16 %v5960_v35, %v5959_v17  ;;  %v12879_v63 = vld [vmem:[#allocation2 + $0x1c8] sm:$0xff] }
 0x77f   : > { %v14701_v19 = vpack.c.bf16 %v14691_v29, %v14695_v34 }
 0x781   : > { %12084 = vmatprep.subr.bf16.mxu0 %v14701_v19  ;;  %12308 = vmatprep.subr.bf16.mxu1 %v14701_v19 }
 0x782   : > { %12086 = vmatpush3.bf16.msra.mxu0 %v14701_v19  ;;  %12310 = vmatpush3.bf16.msra.mxu1 %v14701_v19 }
 0x783   : > { %12088 = vmatprep.subr.bf16.mxu0 %v14665_v14  ;;  %12344 = vmatprep.subr.bf16.mxu1 %v14665_v14 }
 0x785   : > { %10818 = vmatmul.mubr.msk.f32.vlgmr.msra.gmra.mrb[72].mxu0 %vm1014_vm9, %v12848_v31  ;;  %11150 = vmatmul.mubr.msk.f32.vlgmr.msra.gmra.mrb[104].mxu1 %vm1014_vm9, %v12849_v53  ;;  %v12880_v31 = vld [vmem:[#allocation2 + $0x1d0] sm:$0xff]  ;;  %v12881_v53 = vld [vmem:[#allocation2 + $0x1d8] sm:$0xff] }
 0x786   : > { %12090 = vmatpush3.bf16.msra.mxu0 %v14665_v14  ;;  %12346 = vmatpush3.bf16.msra.mxu1 %v14665_v14 }
 0x787   : > { %12092 = vmatprep.subr.bf16.mxu0 %v14677_v4  ;;  %12348 = vmatprep.subr.bf16.mxu1 %v14677_v4 }
 0x788   : > { %10820 = vmatprep.mubr.msk.f32.mxu0 %vm1014_vm9, %v12850_v30  ;;  %11152 = vmatprep.mubr.msk.f32.mxu1 %vm1014_vm9, %v12851_v38  ;;  %v12882_v30 = vld [vmem:[#allocation2 + $0x1e0] sm:$0xff]  ;;  %v12883_v38 = vld [vmem:[#allocation2 + $0x1e8] sm:$0xff] }
 0x789   : > { %10821 = vmatmul.mubr.msk.f32.gmra.mrb[74].mxu0 %vm1014_vm9, %v12852_v51  ;;  %11153 = vmatmul.mubr.msk.f32.gmra.mrb[106].mxu1 %vm1014_vm9, %v12853_v48  ;;  %v12884_v51 = vld [vmem:[#allocation2 + $0x1f0] sm:$0xff]  ;;  %v7758_v48 = vld [vmem:[#allocation19] sm:$0xff] }
 0x78a   : > { %12094 = vmatpush3.bf16.msra.mxu0 %v14677_v4  ;;  %12350 = vmatpush3.bf16.msra.mxu1 %v14677_v4 }
 0x78b   : > { %12096 = vmatprep.subr.bf16.mxu0 %v14689_v45  ;;  %12352 = vmatprep.subr.bf16.mxu1 %v14689_v45 }
 0x78c   : > { %10823 = vmatprep.mubr.msk.f32.mxu0 %vm1014_vm9, %v12854_v11  ;;  %11155 = vmatprep.mubr.msk.f32.mxu1 %vm1014_vm9, %v12855_v1  ;;  %v12885_v11 = vld [vmem:[#allocation2 + $0x1f8] sm:$0xff]  ;;  %v12886_v1 = vld [vmem:[#allocation2 + $0x200] sm:$0xff] }
 0x78d   : > { %10824 = vmatmul.mubr.msk.f32.gmra.mrb[76].mxu0 %vm1014_vm9, %v12856_v62  ;;  %11156 = vmatmul.mubr.msk.f32.gmra.mrb[108].mxu1 %vm1014_vm9, %v12857_v20  ;;  %v7882_v62 = vld [vmem:[#allocation19 + $0x8] sm:$0xff] }
 0x78e   : > { %12098 = vmatpush3.bf16.msra.mxu0 %v14689_v45  ;;  %12354 = vmatpush3.bf16.msra.mxu1 %v14689_v45  ;;  %v12887_v20 = vld [vmem:[#allocation2 + $0x208] sm:$0xff] }
 0x78f   : > { %12100 = vmatprep.subr.bf16.mxu0 %v14701_v19  ;;  %12356 = vmatprep.subr.bf16.mxu1 %v14701_v19 }
 0x790   : > { %10826 = vmatprep.mubr.msk.f32.mxu0 %vm1014_vm9, %v12858_v40  ;;  %11158 = vmatprep.mubr.msk.f32.mxu1 %vm1014_vm9, %v12859_v57  ;;  %v12889_v40 = vld [vmem:[#allocation2 + $0x218] sm:$0xff]  ;;  %v12890_v57 = vld [vmem:[#allocation2 + $0x220] sm:$0xff] }
 0x791   : > { %10827 = vmatmul.mubr.msk.f32.gmra.mrb[78].mxu0 %vm1014_vm9, %v12860_v60  ;;  %11159 = vmatmul.mubr.msk.f32.gmra.mrb[110].mxu1 %vm1014_vm9, %v12861_v8  ;;  %v12891_v60 = vld [vmem:[#allocation2 + $0x228] sm:$0xff]  ;;  %v12892_v8 = vld [vmem:[#allocation2 + $0x230] sm:$0xff] }
 0x792   : > { %12102 = vmatpush3.bf16.msra.mxu0 %v14701_v19  ;;  %12358 = vmatpush3.bf16.msra.mxu1 %v14701_v19 }
 0x793   : > { %12392 = vmatprep.subr.bf16.mxu1 %v14665_v14  ;;  %10845 = vmatprep.mubr.msk.f32.mxu0 %vm1014_vm9, %v12862_v7 }
 0x794   : > { %11221 = vmatprep.mubr.msk.f32.mxu1 %vm1014_vm9, %v12863_v46  ;;  %12104 = vmatprep.subr.bf16.mxu0 %v12103_v49  ;;  %v12893_v46 = vld [vmem:[#allocation2 + $0x238] sm:$0xff] }
 0x795   : > { %10846 = vmatmul.mubr.msk.f32.vlgmr.msra.gmra.mrb[80].mxu0 %vm1014_vm9, %v12864_v5  ;;  %11222 = vmatmul.mubr.msk.f32.vlgmr.msra.gmra.mrb[112].mxu1 %vm1014_vm9, %v12865_v0  ;;  %v8629_v5 = vld [vmem:[#allocation18 + $0x1] ss:$0 sm:$0xff] }
 0x796   : > { %12394 = vmatpush3.bf16.msra.mxu1 %v14665_v14  ;;  %10848 = vmatprep.mubr.msk.f32.mxu0 %vm1014_vm9, %v12866_v39  ;;  %v5537_v0 = vadd.f32 %v8629_v5, %v14645_v24  ;;  %v5538_v10 = vadd.f32 %v14643_v56, %v8629_v5  ;;  %v5539_v39 = vadd.f32 %v8629_v5, %v14649_v32 }
 0x797   : > { %12396 = vmatprep.subr.bf16.mxu1 %v14677_v4  ;;  %11224 = vmatprep.mubr.msk.f32.mxu1 %vm1014_vm9, %v12867_v52  ;;  %v5541_v24 = vadd.f32 %v8629_v5, %v14653_v27  ;;  %v5543_v9 = vadd.f32 %v8629_v5, %v14657_v25  ;;  %v5961_v27 = vld [vmem:[#allocation16 + $0x9c0] sm:$0xff]  ;;  %v5963_v25 = vld [vmem:[#allocation16 + $0x9d0] sm:$0xff] }
 0x798   : > { %12106 = vmatpush3.bf16.msra.mxu0 %v12103_v49  ;;  %v841_v49 = vmul.f32 0.2, %v8417_v58  ;;  %v5553_v42 = vmul.f32 0.2, %v5537_v0  ;;  %vm5545_vm1 = vcmp.ge.f32.partialorder %v5537_v0, 0.0  ;;  %vm5546_vm2 = vcmp.ge.f32.partialorder %v5538_v10, 0.0 }
 0x799   : > { %10849 = vmatmul.mubr.msk.f32.gmra.mrb[82].mxu0 %vm1014_vm9, %v12868_v12  ;;  %11225 = vmatmul.mubr.msk.f32.gmra.mrb[114].mxu1 %vm1014_vm9, %v12869_v55  ;;  %v5554_v52 = vmul.f32 0.2, %v5538_v10  ;;  %v5555_v12 = vmul.f32 0.2, %v5539_v39  ;;  %vm5547_vm3 = vcmp.ge.f32.partialorder %v5539_v39, 0.0  ;;  %vm5549_vm5 = vcmp.ge.f32.partialorder %v5541_v24, 0.0 }
 0x79a   : > { %12398 = vmatpush3.bf16.msra.mxu1 %v14677_v4  ;;  %10851 = vmatprep.mubr.msk.f32.mxu0 %vm1014_vm9, %v12870_v36  ;;  %v842_v7 = vsel %vm840_vm15, %v8417_v58, %v841_v49  ;;  %v5561_v55 = vsel %vm5545_vm1, %v5537_v0, %v5553_v42  ;;  %v5542_v36 = vadd.f32 %v14651_v2, %v8629_v5  ;;  %v5559_v35 = vmul.f32 0.2, %v5543_v9  ;;  %v5835_v0 = vld [vmem:[#allocation16 + $0x920] sm:$0xff] }
 0x79b   : > { %12400 = vmatprep.subr.bf16.mxu1 %v14689_v45  ;;  %11227 = vmatprep.mubr.msk.f32.mxu1 %vm1014_vm9, %v12871_v22  ;;  %v5562_v56 = vsel %vm5546_vm2, %v5538_v10, %v5554_v52  ;;  %v5557_v22 = vmul.f32 0.2, %v5541_v24  ;;  %v12119_v17 = vpack.c.bf16 %v5962_v21, %v5961_v27  ;;  %vm5551_vm7 = vcmp.ge.f32.partialorder %v5543_v9, 0.0  ;;  %v5836_v10 = vld [vmem:[#allocation16 + $0x928] sm:$0xff]  ;;  %v5841_v27 = vld [vmem:[#allocation16 + $0x950] sm:$0xff]  ;;  %v5842_v21 = vld [vmem:[#allocation16 + $0x958] sm:$0xff] }
 0x79c   : > { %12108 = vmatprep.subr.bf16.mxu0 %v12107_v43  ;;  %vm5550_vm6 = vcmp.ge.f32.partialorder %v5542_v36, 0.0  ;;  %v12143_v52 = vpack.c.bf16 %v5836_v10, %v5835_v0  ;;  %v6299_v10 = vld [vmem:[#allocation16 + $0xa70] sm:$0xff] }
 0x79d   : > { %10852 = vmatmul.mubr.msk.f32.gmra.mrb[84].mxu0 %vm1014_vm9, %v12872_v50  ;;  %11228 = vmatmul.mubr.msk.f32.gmra.mrb[116].mxu1 %vm1014_vm9, %v12873_v13  ;;  %v5558_v50 = vmul.f32 0.2, %v5542_v36  ;;  %v5544_v13 = vadd.f32 %v14655_v41, %v8629_v5  ;;  %v5565_v2 = vsel %vm5549_vm5, %v5541_v24, %v5557_v22  ;;  %v5567_v41 = vsel %vm5551_vm7, %v5543_v9, %v5559_v35  ;;  %v5845_v35 = vld [vmem:[#allocation16 + $0x970] sm:$0xff] }
 0x79e   : > { %12402 = vmatpush3.bf16.msra.mxu1 %v14689_v45  ;;  %10854 = vmatprep.mubr.msk.f32.mxu0 %vm1014_vm9, %v12874_v61 }
 0x79f   : > { %12404 = vmatprep.subr.bf16.mxu1 %v14701_v19  ;;  %11230 = vmatprep.mubr.msk.f32.mxu1 %vm1014_vm9, %v12875_v37  ;;  %v5964_v37 = vld [vmem:[#allocation16 + $0x9d8] sm:$0xff]  ;;  %vm5552_vm8 = vcmp.ge.f32.partialorder %v5544_v13, 0.0 }
 0x7a0   : > { %12110 = vmatpush3.bf16.msra.mxu0 %v12107_v43  ;;  %v5540_v43 = vadd.f32 %v14647_v3, %v8629_v5  ;;  %v5563_v3 = vsel %vm5547_vm3, %v5539_v39, %v5555_v12  ;;  %v5838_v12 = vld [vmem:[#allocation16 + $0x938] sm:$0xff] }
 0x7a1   : > { %10855 = vmatmul.mubr.msk.f32.gmra.mrb[86].mxu0 %vm1014_vm9, %v12876_v28  ;;  %11231 = vmatmul.mubr.msk.f32.gmra.mrb[118].mxu1 %vm1014_vm9, %v12877_v44  ;;  %v5566_v28 = vsel %vm5550_vm6, %v5542_v36, %v5558_v50  ;;  %v12123_v44 = vpack.c.bf16 %v5964_v37, %v5963_v25  ;;  %v5840_v36 = vld [vmem:[#allocation16 + $0x948] sm:$0xff]  ;;  %v12155_v50 = vpack.c.bf16 %v5842_v21, %v5841_v27  ;;  %v6285_v37 = vld [vmem:[#allocation16 + $0xa00] sm:$0xff]  ;;  %v6523_v27 = vld [vmem:[#allocation16 + $0xa98] sm:$0xff] }
 0x7a2   : > { %12406 = vmatpush3.bf16.msra.mxu1 %v14701_v19  ;;  %11293 = vmatprep.mubr.msk.f32.mxu1 %vm1014_vm9, %v12878_v26  ;;  %v5556_v32 = vmul.f32 0.2, %v5540_v43  ;;  %vm5548_vm4 = vcmp.ge.f32.partialorder %v5540_v43, 0.0  ;;  %v5966_v26 = vld [vmem:[#allocation16 + $0x9e8] sm:$0xff] }
 0x7a3   : > { %12440 = vmatprep.subr.bf16.mxu1 %v14665_v14  ;;  %12112 = vmatprep.subr.bf16.mxu0 %v12111_v59 }
 0x7a4   : > { %12114 = vmatpush3.bf16.msra.mxu0 %v12111_v59  ;;  %v5564_v61 = vsel %vm5548_vm4, %v5540_v43, %v5556_v32  ;;  %v5560_v59 = vmul.f32 0.2, %v5544_v13  ;;  %v5837_v43 = vld [vmem:[#allocation16 + $0x930] sm:$0xff]  ;;  %v5839_v32 = vld [vmem:[#allocation16 + $0x940] sm:$0xff] }
 0x7a5   : > { %11294 = vmatmul.mubr.msk.f32.vlgmr.msra.gmra.mrb[120].mxu1 %vm1014_vm9, %v12879_v63  ;;  %12116 = vmatprep.subr.bf16.mxu0 %v12115_v18 }
 0x7a6   : > { %12442 = vmatpush3.bf16.msra.mxu1 %v14665_v14  ;;  %11296 = vmatprep.mubr.msk.f32.mxu1 %vm1014_vm9, %v12880_v31  ;;  %v5568_v63 = vsel %vm5552_vm8, %v5544_v13, %v5560_v59  ;;  %v5843_v13 = vld [vmem:[#allocation16 + $0x960] sm:$0xff]  ;;  %v6286_v59 = vld [vmem:[#allocation16 + $0xa08] sm:$0xff] }
 0x7a7   : > { %12444 = vmatprep.subr.bf16.mxu1 %v14677_v4 }
 0x7a8   : > { %12118 = vmatpush3.bf16.msra.mxu0 %v12115_v18  ;;  %v5965_v18 = vld [vmem:[#allocation16 + $0x9e0] sm:$0xff] }
 0x7a9   : > { %11297 = vmatmul.mubr.msk.f32.gmra.mrb[122].mxu1 %vm1014_vm9, %v12881_v53  ;;  %12120 = vmatprep.subr.bf16.mxu0 %v12119_v17  ;;  %v12127_v31 = vpack.c.bf16 %v5966_v26, %v5965_v18  ;;  %v5967_v53 = vld [vmem:[#allocation16 + $0x9f0] sm:$0xff]  ;;  %v12894_v18 = vld [vmem:[#allocation2 + $0x80] sm:$0xff] }
 0x7aa   : > { %12446 = vmatpush3.bf16.msra.mxu1 %v14677_v4  ;;  %11299 = vmatprep.mubr.msk.f32.mxu1 %vm1014_vm9, %v12882_v30  ;;  %v5968_v30 = vld [vmem:[#allocation16 + $0x9f8] sm:$0xff] }
 0x7ab   : > { %12448 = vmatprep.subr.bf16.mxu1 %v14689_v45 }
 0x7ac   : > { %12122 = vmatpush3.bf16.msra.mxu0 %v12119_v17 }
 0x7ad   : > { %11300 = vmatmul.mubr.msk.f32.gmra.mrb[124].mxu1 %vm1014_vm9, %v12883_v38  ;;  %12124 = vmatprep.subr.bf16.mxu0 %v12123_v44  ;;  %v12131_v38 = vpack.c.bf16 %v5968_v30, %v5967_v53  ;;  %v12895_v53 = vld [vmem:[#allocation2 + $0x88] sm:$0xff]  ;;  %v12896_v30 = vld [vmem:[#allocation2 + $0x90] sm:$0xff] }
 0x7ae   : > { %12450 = vmatpush3.bf16.msra.mxu1 %v14689_v45  ;;  %11302 = vmatprep.mubr.msk.f32.mxu1 %vm1014_vm9, %v12884_v51  ;;  %v5831_v51 = vld [vmem:[#allocation16 + $0x900] sm:$0xff] }
 0x7af   : > { %12452 = vmatprep.subr.bf16.mxu1 %v14701_v19 }
 0x7b0   : > { %12126 = vmatpush3.bf16.msra.mxu0 %v12123_v44  ;;  %v6287_v44 = vld [vmem:[#allocation16 + $0xa10] sm:$0xff] }
 0x7b1   : > { %11303 = vmatmul.mubr.msk.f32.gmra.mrb[126].mxu1 %vm1014_vm9, %v12885_v11  ;;  %12128 = vmatprep.subr.bf16.mxu0 %v12127_v31 }
 0x7b2   : > { %12454 = vmatpush3.bf16.msra.mxu1 %v14701_v19  ;;  %11365 = vmatprep.mubr.msk.f32.mxu1 %vm1014_vm9, %v12886_v1 }
 0x7b3   : > { %11421 = vmatprep.subr.mxu1 %v7758_v48 }
 0x7b4   : > { %12130 = vmatpush3.bf16.msra.mxu0 %v12127_v31  ;;  %v6290_v31 = vld [vmem:[#allocation16 + $0xa28] sm:$0xff] }
 0x7b5   : > { %11366 = vmatmul.mubr.msk.f32.vlgmr.msra.gmra.mrb[128].mxu1 %vm1014_vm9, %v12887_v20  ;;  %12132 = vmatprep.subr.bf16.mxu0 %v12131_v38 }
 0x7b6   : > { %11368 = vmatprep.mubr.msk.f32.mxu1 %vm1014_vm9, %v12888_v6  ;;  %11422 = vmatpush3.msra.mxu1 %v7758_v48  ;;  %v5832_v48 = vld [vmem:[#allocation16 + $0x908] sm:$0xff] }
 0x7b7   : > { %11435 = vmatprep.subr.mxu1 %v7882_v62  ;;  %v12135_v11 = vpack.c.bf16 %v5832_v48, %v5831_v51  ;;  %v6291_v51 = vld [vmem:[#allocation16 + $0xa30] sm:$0xff]  ;;  %v6292_v48 = vld [vmem:[#allocation16 + $0xa38] sm:$0xff] }
 0x7b8   : > { %12134 = vmatpush3.bf16.msra.mxu0 %v12131_v38 }
 0x7b9   : > { %11369 = vmatmul.mubr.msk.f32.gmra.mrb[130].mxu1 %vm1014_vm9, %v12889_v40  ;;  %12136 = vmatprep.subr.bf16.mxu0 %v12135_v11 }
 0x7ba   : > { %11371 = vmatprep.mubr.msk.f32.mxu1 %vm1014_vm9, %v12890_v57 }
 0x7bd   : > { %11372 = vmatmul.mubr.msk.f32.gmra.mrb[132].mxu1 %vm1014_vm9, %v12891_v60  ;;  %v5833_v60 = vld [vmem:[#allocation16 + $0x910] sm:$0xff] }
 0x7be   : > { %11374 = vmatprep.mubr.msk.f32.mxu1 %vm1014_vm9, %v12892_v8  ;;  %v5834_v8 = vld [vmem:[#allocation16 + $0x918] sm:$0xff] }
 0x7bf   : > { %v12139_v5 = vpack.c.bf16 %v5834_v8, %v5833_v60  ;;  %v6296_v60 = vld [vmem:[#allocation16 + $0xa58] sm:$0xff] }
 0x7c0   : > { %v12901_v8 = vld [vmem:[#allocation2 + $0xb8] sm:$0xff] }
 0x7c1   : > { %11375 = vmatmul.mubr.msk.f32.gmra.mrb[134].mxu1 %vm1014_vm9, %v12893_v46 }
 0x7c2   : > { %11423 = vmatprep.mubr.msk.f32.mxu1 %vm667_vm0, %v842_v7 }
 0x7c5   : > { %11424 = vmatmul.mubr.msk.f32.vlgmr.msra.gmra.mrb[136].mxu1 %vm667_vm0, %v842_v7 }
 0x7c6   : > { %11426 = vmatprep.mubr.msk.f32.mxu1 %vm667_vm0, %v842_v7  ;;  %11436 = vmatpush3.msra.mxu1 %v7882_v62 }
 0x7c9   : > { %11427 = vmatmul.mubr.msk.f32.gmra.mrb[138].mxu1 %vm667_vm0, %v842_v7 }
 0x7ca   : > { %11429 = vmatprep.mubr.msk.f32.mxu1 %vm667_vm0, %v842_v7 }
 0x7cd   : > { %11430 = vmatmul.mubr.msk.f32.gmra.mrb[140].mxu1 %vm667_vm0, %v842_v7 }
 0x7ce   : > { %11432 = vmatprep.mubr.msk.f32.mxu1 %vm667_vm0, %v842_v7 }
 0x7d1   : > { %11433 = vmatmul.mubr.msk.f32.gmra.mrb[142].mxu1 %vm667_vm0, %v842_v7 }
 0x7d2   : > { %11437 = vmatprep.mubr.msk.f32.mxu1 %vm667_vm0, %v5561_v55 }
 0x7d5   : > { %11438 = vmatmul.mubr.msk.f32.vlgmr.msra.gmra.mrb[136].mxu1 %vm667_vm0, %v5562_v56  ;;  %v12147_v56 = vpack.c.bf16 %v5838_v12, %v5837_v43 }
 0x7d6   : > { %11440 = vmatprep.mubr.msk.f32.mxu1 %vm667_vm0, %v5563_v3  ;;  %v12151_v3 = vpack.c.bf16 %v5840_v36, %v5839_v32  ;;  %v6520_v32 = vld [vmem:[#allocation16 + $0xa80] sm:$0xff]  ;;  %v6521_v36 = vld [vmem:[#allocation16 + $0xa88] sm:$0xff] }
 0x7d9   : > { %11441 = vmatmul.mubr.msk.f32.gmra.mrb[138].mxu1 %vm667_vm0, %v5564_v61  ;;  %v5844_v61 = vld [vmem:[#allocation16 + $0x968] sm:$0xff] }
 0x7da   : > { %11443 = vmatprep.mubr.msk.f32.mxu1 %vm667_vm0, %v5565_v2  ;;  %v12159_v17 = vpack.c.bf16 %v5844_v61, %v5843_v13  ;;  %v5846_v2 = vld [vmem:[#allocation16 + $0x978] sm:$0xff]  ;;  %v6525_v13 = vld [vmem:[#allocation16 + $0xaa8] sm:$0xff] }
 0x7db   : > { %v12163_v25 = vpack.c.bf16 %v5846_v2, %v5845_v35  ;;  %v12903_v61 = vld [vmem:[#allocation2 + $0xc8] sm:$0xff]  ;;  %v6527_v2 = vld [vmem:[#allocation16 + $0xab8] sm:$0xff] }
 0x7dc   : > { %v6526_v35 = vld [vmem:[#allocation16 + $0xab0] sm:$0xff] }
 0x7dd   : > { %11444 = vmatmul.mubr.msk.f32.gmra.mrb[140].mxu1 %vm667_vm0, %v5566_v28  ;;  %v12183_v28 = vpack.c.bf16 %v6286_v59, %v6285_v37  ;;  %v12243_v37 = vpack.c.bf16 %v6527_v2, %v6526_v35  ;;  %v6528_v59 = vld [vmem:[#allocation16 + $0xac0] sm:$0xff]  ;;  %v6659_v2 = vld [vmem:[#allocation16 + $0xb48] sm:$0xff] }
 0x7de   : > { %11446 = vmatprep.mubr.msk.f32.mxu1 %vm667_vm0, %v5567_v41  ;;  %v6288_v41 = vld [vmem:[#allocation16 + $0xa18] sm:$0xff]  ;;  %v6658_v35 = vld [vmem:[#allocation16 + $0xb40] sm:$0xff] }
 0x7df   : > { %v12187_v26 = vpack.c.bf16 %v6288_v41, %v6287_v44  ;;  %v12907_v44 = vld [vmem:[#allocation2 + $0xe8] sm:$0xff]  ;;  %v12908_v41 = vld [vmem:[#allocation2 + $0xf0] sm:$0xff] }
 0x7e1   : > { %11447 = vmatmul.mubr.msk.f32.gmra.mrb[142].mxu1 %vm667_vm0, %v5568_v63  ;;  %v6289_v63 = vld [vmem:[#allocation16 + $0xa20] sm:$0xff] }
 0x7e2   : > { %v12191_v38 = vpack.c.bf16 %v6290_v31, %v6289_v63  ;;  %v6531_v63 = vld [vmem:[#allocation16 + $0xad8] sm:$0xff] }
 0x7e3   : > { %v12909_v31 = vld [vmem:[#allocation2 + $0xf8] sm:$0xff] }
 0x858   : > { %v10819_v1 = vpop.f32.mrb[72].mxu0 }
 0x859   : > { %v5791_v62 = vpop.f32.mrb[73].mxu0 }
 0x85c   : > { %v14809_v20 = vpop.f32.mrb[74].mxu0 }
 0x85d   : > { %v5801_v6 = vpop.f32.mrb[75].mxu0 }
 0x860   : > { %v14811_v58 = vpop.f32.mrb[76].mxu0 }
 0x861   : > { %v5811_v40 = vpop.f32.mrb[77].mxu0 }
 0x864   : > { %v14813_v57 = vpop.f32.mrb[78].mxu0 }
 0x865   : > { %v14815_v49 = vpop.f32.mrb[79].mxu0 }
 0x868   : > { %v10847_v7 = vpop.f32.mrb[80].mxu0 }
 0x869   : > { %v5913_v46 = vpop.f32.mrb[81].mxu0 }
 0x86a   : > { %10889 = vmatprep.mubr.f32.mxu0 %v5913_v46  ;;  %v6297_v46 = vld [vmem:[#allocation16 + $0xa60] sm:$0xff] }
 0x86b   : > { %10890 = vmatmul.mubr.f32.vlgmr.msra.gmra.mrb[88].mxu0 %v10847_v7 }
 0x86c   : > { %12138 = vmatpush3.bf16.msra.mxu0 %v12135_v11  ;;  %v10850_v42 = vpop.f32.mrb[82].mxu0  ;;  %v12897_v11 = vld [vmem:[#allocation2 + $0x98] sm:$0xff] }
 0x86d   : > { %v5923_v39 = vpop.f32.mrb[83].mxu0  ;;  %12140 = vmatprep.subr.bf16.mxu0 %v12139_v5 }
 0x86e   : > { %10892 = vmatprep.mubr.f32.mxu0 %v5923_v39 }
 0x86f   : > { %10893 = vmatmul.mubr.f32.gmra.mrb[90].mxu0 %v10850_v42  ;;  %v6300_v42 = vld [vmem:[#allocation16 + $0xa78] sm:$0xff] }
 0x870   : > { %12142 = vmatpush3.bf16.msra.mxu0 %v12139_v5  ;;  %v10853_v24 = vpop.f32.mrb[84].mxu0  ;;  %v6298_v5 = vld [vmem:[#allocation16 + $0xa68] sm:$0xff]  ;;  %v12211_v39 = vpack.c.bf16 %v6300_v42, %v6299_v10 }
 0x871   : > { %v5933_v55 = vpop.f32.mrb[85].mxu0  ;;  %12144 = vmatprep.subr.bf16.mxu0 %v12143_v52  ;;  %v12207_v0 = vpack.c.bf16 %v6298_v5, %v6297_v46 }
 0x872   : > { %10895 = vmatprep.mubr.f32.mxu0 %v5933_v55 }
 0x873   : > { %10896 = vmatmul.mubr.f32.gmra.mrb[92].mxu0 %v10853_v24 }
 0x874   : > { %12146 = vmatpush3.bf16.msra.mxu0 %v12143_v52  ;;  %v10856_v22 = vpop.f32.mrb[86].mxu0 }
 0x875   : > { %v5943_v9 = vpop.f32.mrb[87].mxu0  ;;  %12148 = vmatprep.subr.bf16.mxu0 %v12147_v56 }
 0x876   : > { %10898 = vmatprep.mubr.f32.mxu0 %v5943_v9  ;;  %v12231_v9 = vpack.c.bf16 %v6521_v36, %v6520_v32 }
 0x877   : > { %10899 = vmatmul.mubr.f32.gmra.mrb[94].mxu0 %v10856_v22 }
 0x878   : > { %12150 = vmatpush3.bf16.msra.mxu0 %v12147_v56  ;;  %10933 = vmatprep.mubr.f32.mxu0 %v5791_v62  ;;  %v12195_v62 = vpack.c.bf16 %v6292_v48, %v6291_v51  ;;  %v6534_v48 = vld [vmem:[#allocation16 + $0xaf0] sm:$0xff] }
 0x879   : > { %12152 = vmatprep.subr.bf16.mxu0 %v12151_v3 }
 0x87c   : > { %12154 = vmatpush3.bf16.msra.mxu0 %v12151_v3  ;;  %v6522_v3 = vld [vmem:[#allocation16 + $0xa90] sm:$0xff] }
 0x87d   : > { %12156 = vmatprep.subr.bf16.mxu0 %v12155_v50  ;;  %v12235_v21 = vpack.c.bf16 %v6523_v27, %v6522_v3  ;;  %v6655_v3 = vld [vmem:[#allocation16 + $0xb28] sm:$0xff] }
 0x880   : > { %12158 = vmatpush3.bf16.msra.mxu0 %v12155_v50  ;;  %v6524_v50 = vld [vmem:[#allocation16 + $0xaa0] sm:$0xff] }
 0x881   : > { %12160 = vmatprep.subr.bf16.mxu0 %v12159_v17 }
 0x884   : > { %12162 = vmatpush3.bf16.msra.mxu0 %v12159_v17  ;;  %v12239_v17 = vpack.c.bf16 %v6525_v13, %v6524_v50  ;;  %v6656_v50 = vld [vmem:[#allocation16 + $0xb30] sm:$0xff]  ;;  %v6657_v13 = vld [vmem:[#allocation16 + $0xb38] sm:$0xff] }
 0x885   : > { %12164 = vmatprep.subr.bf16.mxu0 %v12163_v25 }
 0x888   : > { %12166 = vmatpush3.bf16.msra.mxu0 %v12163_v25  ;;  %v12905_v25 = vld [vmem:[#allocation2 + $0xd8] sm:$0xff] }
 0x889   : > { %12168 = vmatprep.subr.bf16.mxu0 %v14665_v14 }
 0x88b   : > { %10934 = vmatmul.mubr.f32.vlgmr.msra.gmra.mrb[88].mxu0 %v10819_v1  ;;  %v12898_v1 = vld [vmem:[#allocation2 + $0xa0] sm:$0xff] }
 0x88c   : > { %10936 = vmatprep.mubr.f32.mxu0 %v5801_v6  ;;  %12170 = vmatpush3.bf16.msra.mxu0 %v14665_v14  ;;  %v6294_v6 = vld [vmem:[#allocation16 + $0xa48] sm:$0xff] }
 0x88d   : > { %12172 = vmatprep.subr.bf16.mxu0 %v14677_v4 }
 0x88f   : > { %10937 = vmatmul.mubr.f32.gmra.mrb[90].mxu0 %v14809_v20  ;;  %v6293_v20 = vld [vmem:[#allocation16 + $0xa40] sm:$0xff] }
 0x890   : > { %10939 = vmatprep.mubr.f32.mxu0 %v5811_v40  ;;  %12174 = vmatpush3.bf16.msra.mxu0 %v14677_v4  ;;  %v12900_v40 = vld [vmem:[#allocation2 + $0xb0] sm:$0xff] }
 0x891   : > { %12176 = vmatprep.subr.bf16.mxu0 %v14689_v45 }
 0x893   : > { %10940 = vmatmul.mubr.f32.gmra.mrb[92].mxu0 %v14811_v58  ;;  %v12899_v58 = vld [vmem:[#allocation2 + $0xa8] sm:$0xff] }
 0x894   : > { %10942 = vmatprep.mubr.f32.mxu0 %v14815_v49  ;;  %12178 = vmatpush3.bf16.msra.mxu0 %v14689_v45  ;;  %v6295_v49 = vld [vmem:[#allocation16 + $0xa50] sm:$0xff] }
 0x895   : > { %12180 = vmatprep.subr.bf16.mxu0 %v14701_v19  ;;  %v12203_v7 = vpack.c.bf16 %v6296_v60, %v6295_v49 }
 0x897   : > { %10943 = vmatmul.mubr.f32.gmra.mrb[94].mxu0 %v14813_v57  ;;  %v12199_v57 = vpack.c.bf16 %v6294_v6, %v6293_v20  ;;  %v6651_v20 = vld [vmem:[#allocation16 + $0xb08] sm:$0xff] }
 0x898   : > { %12182 = vmatpush3.bf16.msra.mxu0 %v14701_v19  ;;  %10961 = vmatprep.mubr.msk.f32.mxu0 %vm1014_vm9, %v12894_v18 }
 0x899   : > { %12184 = vmatprep.subr.bf16.mxu0 %v12183_v28 }
 0x89b   : > { %10962 = vmatmul.mubr.msk.f32.vlgmr.msra.gmra.mrb[96].mxu0 %vm1014_vm9, %v12895_v53 }
 0x89c   : > { %12186 = vmatpush3.bf16.msra.mxu0 %v12183_v28  ;;  %10964 = vmatprep.mubr.msk.f32.mxu0 %vm1014_vm9, %v12896_v30  ;;  %v6529_v28 = vld [vmem:[#allocation16 + $0xac8] sm:$0xff]  ;;  %v6532_v30 = vld [vmem:[#allocation16 + $0xae0] sm:$0xff] }
 0x89d   : > { %12188 = vmatprep.subr.bf16.mxu0 %v12187_v26  ;;  %v12247_v18 = vpack.c.bf16 %v6529_v28, %v6528_v59  ;;  %v6660_v59 = vld [vmem:[#allocation16 + $0xb50] sm:$0xff]  ;;  %v6661_v28 = vld [vmem:[#allocation16 + $0xb58] sm:$0xff] }
 0x89f   : > { %10965 = vmatmul.mubr.msk.f32.gmra.mrb[98].mxu0 %vm1014_vm9, %v12897_v11  ;;  %v6535_v11 = vld [vmem:[#allocation16 + $0xaf8] sm:$0xff] }
 0x8a0   : > { %12190 = vmatpush3.bf16.msra.mxu0 %v12187_v26  ;;  %10967 = vmatprep.mubr.msk.f32.mxu0 %vm1014_vm9, %v12898_v1  ;;  %v6530_v26 = vld [vmem:[#allocation16 + $0xad0] sm:$0xff]  ;;  %v12259_v1 = vpack.c.bf16 %v6535_v11, %v6534_v48 }
 0x8a1   : > { %12192 = vmatprep.subr.bf16.mxu0 %v12191_v38  ;;  %v12251_v53 = vpack.c.bf16 %v6531_v63, %v6530_v26  ;;  %v6662_v26 = vld [vmem:[#allocation16 + $0xb60] sm:$0xff]  ;;  %v6663_v63 = vld [vmem:[#allocation16 + $0xb68] sm:$0xff] }
 0x8a3   : > { %10968 = vmatmul.mubr.msk.f32.gmra.mrb[100].mxu0 %vm1014_vm9, %v12899_v58  ;;  %v14853_v58 = vpop.f32.mrb[104].mxu1 }
 0x8a4   : > { %12194 = vmatpush3.bf16.msra.mxu0 %v12191_v38  ;;  %10970 = vmatprep.mubr.msk.f32.mxu0 %vm1014_vm9, %v12900_v40  ;;  %v6533_v38 = vld [vmem:[#allocation16 + $0xae8] sm:$0xff]  ;;  %v14855_v40 = vpop.f32.mrb[105].mxu1 }
 0x8a5   : > { %12196 = vmatprep.subr.bf16.mxu0 %v12195_v62  ;;  %v12255_v51 = vpack.c.bf16 %v6533_v38, %v6532_v30  ;;  %v6664_v38 = vld [vmem:[#allocation16 + $0xb70] sm:$0xff] }
 0x8a7   : > { %10971 = vmatmul.mubr.msk.f32.gmra.mrb[102].mxu0 %vm1014_vm9, %v12901_v8 }
 0x8a8   : > { %12198 = vmatpush3.bf16.msra.mxu0 %v12195_v62  ;;  %v6650_v62 = vld [vmem:[#allocation16 + $0xb00] sm:$0xff] }
 0x8a9   : > { %12200 = vmatprep.subr.bf16.mxu0 %v12199_v57  ;;  %v12263_v6 = vpack.c.bf16 %v6651_v20, %v6650_v62  ;;  %v6886_v62 = vld [vmem:[#allocation16 + $0xb88] sm:$0xff] }
 0x8ac   : > { %12202 = vmatpush3.bf16.msra.mxu0 %v12199_v57  ;;  %v14857_v57 = vpop.f32.mrb[106].mxu1 }
 0x8ad   : > { %12204 = vmatprep.subr.bf16.mxu0 %v12203_v7  ;;  %v14859_v49 = vpop.f32.mrb[107].mxu1 }
 0x8ae   : > { %v14861_v60 = vpop.f32.mrb[108].mxu1 }
 0x8af   : > { %v14863_v8 = vpop.f32.mrb[109].mxu1 }
 0x8b0   : > { %12206 = vmatpush3.bf16.msra.mxu0 %v12203_v7  ;;  %v14865_v7 = vpop.f32.mrb[110].mxu1 }
 0x8b1   : > { %12208 = vmatprep.subr.bf16.mxu0 %v12207_v0  ;;  %v14867_v46 = vpop.f32.mrb[111].mxu1 }
 0x8b2   : > { %v14869_v5 = vpop.f32.mrb[112].mxu1 }
 0x8b4   : > { %12210 = vmatpush3.bf16.msra.mxu0 %v12207_v0  ;;  %v14871_v0 = vpop.f32.mrb[113].mxu1 }
 0x8b5   : > { %12212 = vmatprep.subr.bf16.mxu0 %v12211_v39  ;;  %v14873_v10 = vpop.f32.mrb[114].mxu1 }
 0x8b6   : > { %v14875_v42 = vpop.f32.mrb[115].mxu1 }
 0x8b8   : > { %12214 = vmatpush3.bf16.msra.mxu0 %v12211_v39  ;;  %v14877_v39 = vpop.f32.mrb[116].mxu1 }
 0x8b9   : > { %12216 = vmatprep.subr.bf16.mxu0 %v14665_v14 }
 0x96e   : > { %v10963_v52 = vpop.f32.mrb[96].mxu0 }
 0x96f   : > { %v6245_v43 = vpop.f32.mrb[97].mxu0 }
 0x970   : > { %11005 = vmatprep.mubr.f32.mxu0 %v6245_v43 }
 0x971   : > { %11006 = vmatmul.mubr.f32.vlgmr.msra.gmra.mrb[88].mxu0 %v10963_v52  ;;  %v14879_v52 = vpop.f32.mrb[117].mxu1 }
 0x972   : > { %12218 = vmatpush3.bf16.msra.mxu0 %v14665_v14  ;;  %v10966_v12 = vpop.f32.mrb[98].mxu0  ;;  %v14881_v43 = vpop.f32.mrb[118].mxu1 }
 0x973   : > { %12220 = vmatprep.subr.bf16.mxu0 %v14677_v4  ;;  %v6255_v24 = vpop.f32.mrb[99].mxu0 }
 0x974   : > { %11008 = vmatprep.mubr.f32.mxu0 %v6255_v24 }
 0x975   : > { %11009 = vmatmul.mubr.f32.gmra.mrb[90].mxu0 %v10966_v12  ;;  %v14883_v12 = vpop.f32.mrb[119].mxu1 }
 0x976   : > { %12222 = vmatpush3.bf16.msra.mxu0 %v14677_v4  ;;  %v10969_v55 = vpop.f32.mrb[100].mxu0  ;;  %v12902_v4 = vld [vmem:[#allocation2 + $0xc0] sm:$0xff]  ;;  %v14885_v24 = vpop.f32.mrb[120].mxu1 }
 0x977   : > { %12224 = vmatprep.subr.bf16.mxu0 %v14689_v45  ;;  %v6265_v56 = vpop.f32.mrb[101].mxu0  ;;  %v14887_v36 = vpop.f32.mrb[121].mxu1 }
 0x978   : > { %11011 = vmatprep.mubr.f32.mxu0 %v6265_v56  ;;  %v6653_v56 = vld [vmem:[#allocation16 + $0xb18] sm:$0xff] }
 0x979   : > { %11012 = vmatmul.mubr.f32.gmra.mrb[92].mxu0 %v10969_v55  ;;  %v6652_v55 = vld [vmem:[#allocation16 + $0xb10] sm:$0xff] }
 0x97a   : > { %12226 = vmatpush3.bf16.msra.mxu0 %v14689_v45  ;;  %v10972_v22 = vpop.f32.mrb[102].mxu0  ;;  %v12904_v45 = vld [vmem:[#allocation2 + $0xd0] sm:$0xff] }
 0x97b   : > { %12228 = vmatprep.subr.bf16.mxu0 %v14701_v19  ;;  %v6275_v14 = vpop.f32.mrb[103].mxu0 }
 0x97c   : > { %11014 = vmatprep.mubr.f32.mxu0 %v6275_v14  ;;  %v12267_v14 = vpack.c.bf16 %v6653_v56, %v6652_v55  ;;  %v6887_v55 = vld [vmem:[#allocation16 + $0xb90] sm:$0xff]  ;;  %v6888_v56 = vld [vmem:[#allocation16 + $0xb98] sm:$0xff] }
 0x97d   : > { %11015 = vmatmul.mubr.f32.gmra.mrb[94].mxu0 %v10972_v22 }
 0x97e   : > { %12230 = vmatpush3.bf16.msra.mxu0 %v14701_v19  ;;  %11033 = vmatprep.mubr.msk.f32.mxu0 %vm1014_vm9, %v12902_v4  ;;  %v12906_v19 = vld [vmem:[#allocation2 + $0xe0] sm:$0xff] }
 0x97f   : > { %12232 = vmatprep.subr.bf16.mxu0 %v12231_v9 }
 0x981   : > { %11034 = vmatmul.mubr.msk.f32.vlgmr.msra.gmra.mrb[104].mxu0 %vm1014_vm9, %v12903_v61 }
 0x982   : > { %11036 = vmatprep.mubr.msk.f32.mxu0 %vm1014_vm9, %v12904_v45  ;;  %12234 = vmatpush3.bf16.msra.mxu0 %v12231_v9  ;;  %v6654_v9 = vld [vmem:[#allocation16 + $0xb20] sm:$0xff] }
 0x983   : > { %12236 = vmatprep.subr.bf16.mxu0 %v12235_v21 }
 0x985   : > { %11037 = vmatmul.mubr.msk.f32.gmra.mrb[106].mxu0 %vm1014_vm9, %v12905_v25 }
 0x986   : > { %11039 = vmatprep.mubr.msk.f32.mxu0 %vm1014_vm9, %v12906_v19  ;;  %12238 = vmatpush3.bf16.msra.mxu0 %v12235_v21  ;;  %v12271_v21 = vpack.c.bf16 %v6655_v3, %v6654_v9  ;;  %v6890_v9 = vld [vmem:[#allocation16 + $0xba8] sm:$0xff] }
 0x987   : > { %12240 = vmatprep.subr.bf16.mxu0 %v12239_v17 }
 0x989   : > { %11040 = vmatmul.mubr.msk.f32.gmra.mrb[108].mxu0 %vm1014_vm9, %v12907_v44  ;;  %v14890_v44 = vpop.f32.mrb[122].mxu1 }
 0x98a   : > { %11042 = vmatprep.mubr.msk.f32.mxu0 %vm1014_vm9, %v12908_v41  ;;  %12242 = vmatpush3.bf16.msra.mxu0 %v12239_v17  ;;  %v12275_v17 = vpack.c.bf16 %v6657_v13, %v6656_v50  ;;  %v12283_v41 = vpack.c.bf16 %v6661_v28, %v6660_v59  ;;  %v6892_v50 = vld [vmem:[#allocation16 + $0xbb8] sm:$0xff]  ;;  %v6899_v59 = vld [vmem:[#allocation16 + $0xbf0] sm:$0xff] }
 0x98b   : > { %12244 = vmatprep.subr.bf16.mxu0 %v12243_v37  ;;  %v6900_v28 = vld [vmem:[#allocation16 + $0xbf8] sm:$0xff] }
 0x98d   : > { %11043 = vmatmul.mubr.msk.f32.gmra.mrb[110].mxu0 %vm1014_vm9, %v12909_v31 }
 0x98e   : > { %12246 = vmatpush3.bf16.msra.mxu0 %v12243_v37  ;;  %v12279_v37 = vpack.c.bf16 %v6659_v2, %v6658_v35  ;;  %v6895_v2 = vld [vmem:[#allocation16 + $0xbd0] sm:$0xff] }
 0x98f   : > { %12248 = vmatprep.subr.bf16.mxu0 %v12247_v18 }
 0x992   : > { %12250 = vmatpush3.bf16.msra.mxu0 %v12247_v18  ;;  %v14892_v18 = vpop.f32.mrb[123].mxu1 }
 0x993   : > { %12252 = vmatprep.subr.bf16.mxu0 %v12251_v53  ;;  %v14894_v31 = vpop.f32.mrb[124].mxu1 }
 0x994   : > { %v14896_v30 = vpop.f32.mrb[125].mxu1 }
 0x995   : > { %v14898_v48 = vpop.f32.mrb[126].mxu1 }
 0x996   : > { %12254 = vmatpush3.bf16.msra.mxu0 %v12251_v53  ;;  %v12287_v53 = vpack.c.bf16 %v6663_v63, %v6662_v26  ;;  %v14900_v11 = vpop.f32.mrb[127].mxu1  ;;  %v7120_v26 = vld [vmem:[#allocation16 + $0xc00] sm:$0xff] }
 0x997   : > { %12256 = vmatprep.subr.bf16.mxu0 %v12255_v51 }
 0x99a   : > { %12258 = vmatpush3.bf16.msra.mxu0 %v12255_v51  ;;  %v6665_v51 = vld [vmem:[#allocation16 + $0xb78] sm:$0xff] }
 0x99b   : > { %12260 = vmatprep.subr.bf16.mxu0 %v12259_v1 }
 0x99e   : > { %12262 = vmatpush3.bf16.msra.mxu0 %v12259_v1  ;;  %v6885_v1 = vld [vmem:[#allocation16 + $0xb80] sm:$0xff] }
 0x99f   : > { %12264 = vmatprep.subr.bf16.mxu0 %v12263_v6  ;;  %v12311_v20 = vpack.c.bf16 %v6886_v62, %v6885_v1  ;;  %v7126_v62 = vld [vmem:[#allocation16 + $0xc30] sm:$0xff] }
 0xa54   : > { %v11035_v32 = vpop.f32.mrb[104].mxu0 }
 0xa55   : > { %v6480_v22 = vpop.f32.mrb[105].mxu0 }
 0xa56   : > { %11077 = vmatprep.mubr.f32.mxu0 %v6480_v22  ;;  %v12315_v22 = vpack.c.bf16 %v6888_v56, %v6887_v55  ;;  %v7128_v56 = vld [vmem:[#allocation16 + $0xc40] sm:$0xff] }
 0xa57   : > { %11078 = vmatmul.mubr.f32.vlgmr.msra.gmra.mrb[88].mxu0 %v11035_v32 }
 0xa58   : > { %12266 = vmatpush3.bf16.msra.mxu0 %v12263_v6  ;;  %v11038_v27 = vpop.f32.mrb[106].mxu0  ;;  %v14902_v6 = vpop.f32.mrb[128].mxu1 }
 0xa59   : > { %v6490_v4 = vpop.f32.mrb[107].mxu0  ;;  %12268 = vmatprep.subr.bf16.mxu0 %v12267_v14  ;;  %v14904_v32 = vpop.f32.mrb[129].mxu1 }
 0xa5a   : > { %11080 = vmatprep.mubr.f32.mxu0 %v6490_v4  ;;  %v14907_v3 = vpop.f32.mrb[130].mxu1 }
 0xa5b   : > { %11081 = vmatmul.mubr.f32.gmra.mrb[90].mxu0 %v11038_v27  ;;  %v14910_v27 = vpop.f32.mrb[131].mxu1 }
 0xa5c   : > { %12270 = vmatpush3.bf16.msra.mxu0 %v12267_v14  ;;  %v11041_v61 = vpop.f32.mrb[108].mxu0  ;;  %v6889_v14 = vld [vmem:[#allocation16 + $0xba0] sm:$0xff]  ;;  %v14913_v13 = vpop.f32.mrb[132].mxu1 }
 0xa5d   : > { %v6500_v45 = vpop.f32.mrb[109].mxu0  ;;  %12272 = vmatprep.subr.bf16.mxu0 %v12271_v21  ;;  %v12319_v4 = vpack.c.bf16 %v6890_v9, %v6889_v14  ;;  %v7131_v14 = vld [vmem:[#allocation16 + $0xc58] sm:$0xff]  ;;  %v7133_v9 = vld [vmem:[#allocation16 + $0xc68] sm:$0xff] }
 0xa5e   : > { %11083 = vmatprep.mubr.f32.mxu0 %v6500_v45  ;;  %v6893_v45 = vld [vmem:[#allocation16 + $0xbc0] sm:$0xff] }
 0xa5f   : > { %11084 = vmatmul.mubr.f32.gmra.mrb[92].mxu0 %v11041_v61  ;;  %v14916_v61 = vpop.f32.mrb[133].mxu1 }
 0xa60   : > { %12274 = vmatpush3.bf16.msra.mxu0 %v12271_v21  ;;  %v11044_v25 = vpop.f32.mrb[110].mxu0  ;;  %v6891_v21 = vld [vmem:[#allocation16 + $0xbb0] sm:$0xff] }
 0xa61   : > { %v6510_v19 = vpop.f32.mrb[111].mxu0  ;;  %12276 = vmatprep.subr.bf16.mxu0 %v12275_v17 }
 0xa62   : > { %11086 = vmatprep.mubr.f32.mxu0 %v6510_v19 }
 0xa63   : > { %11087 = vmatmul.mubr.f32.gmra.mrb[94].mxu0 %v11044_v25  ;;  %v8021_v25 = vld [vmem:[#allocation19 + $0x10] sm:$0xff] }
 0xa64   : > { %12278 = vmatpush3.bf16.msra.mxu0 %v12275_v17  ;;  %11121 = vmatprep.mubr.f32.mxu0 %v14661_v23  ;;  %v12291_v23 = vpack.c.bf16 %v6665_v51, %v6664_v38  ;;  %v14919_v17 = vpop.f32.mrb[134].mxu1  ;;  %v7124_v51 = vld [vmem:[#allocation16 + $0xc20] sm:$0xff] }
 0xa65   : > { %12280 = vmatprep.subr.bf16.mxu0 %v12279_v37  ;;  %v14922_v35 = vpop.f32.mrb[135].mxu1  ;;  %11449 = vmatprep.subr.mxu1 %v8021_v25 }
 0xa66   : > { %11450 = vmatpush3.msra.mxu1 %v8021_v25  ;;  %v7361_v25 = vld [vmem:[#allocation16 + $0xcb0] sm:$0xff] }
 0xa68   : > { %12282 = vmatpush3.bf16.msra.mxu0 %v12279_v37  ;;  %v6898_v37 = vld [vmem:[#allocation16 + $0xbe8] sm:$0xff] }
 0xa69   : > { %12284 = vmatprep.subr.bf16.mxu0 %v12283_v41 }
 0xa6c   : > { %12286 = vmatpush3.bf16.msra.mxu0 %v12283_v41  ;;  %v12339_v41 = vpack.c.bf16 %v6900_v28, %v6899_v59  ;;  %v7366_v59 = vld [vmem:[#allocation16 + $0xcd8] sm:$0xff]  ;;  %v7368_v28 = vld [vmem:[#allocation16 + $0xce8] sm:$0xff] }
 0xa6d   : > { %12288 = vmatprep.subr.bf16.mxu0 %v12287_v53 }
 0xa70   : > { %12290 = vmatpush3.bf16.msra.mxu0 %v12287_v53  ;;  %v7123_v53 = vld [vmem:[#allocation16 + $0xc18] sm:$0xff] }
 0xa71   : > { %12292 = vmatprep.subr.bf16.mxu0 %v12291_v23 }
 0xa74   : > { %12294 = vmatpush3.bf16.msra.mxu0 %v12291_v23  ;;  %v7125_v23 = vld [vmem:[#allocation16 + $0xc28] sm:$0xff] }
 0xa75   : > { %12312 = vmatprep.subr.bf16.mxu0 %v12311_v20  ;;  %v12367_v1 = vpack.c.bf16 %v7125_v23, %v7124_v51  ;;  %v7595_v51 = vld [vmem:[#allocation16 + $0xd28] sm:$0xff] }
 0xa77   : > { %11122 = vmatmul.mubr.f32.vlgmr.msra.gmra.mrb[88].mxu0 %v14659_v47  ;;  %v12323_v47 = vpack.c.bf16 %v6892_v50, %v6891_v21  ;;  %v7135_v21 = vld [vmem:[#allocation16 + $0xc78] sm:$0xff]  ;;  %v7355_v50 = vld [vmem:[#allocation16 + $0xc80] sm:$0xff] }
 0xa78   : > { %11124 = vmatprep.mubr.f32.mxu0 %v14671_v16  ;;  %12314 = vmatpush3.bf16.msra.mxu0 %v12311_v20  ;;  %v6894_v16 = vld [vmem:[#allocation16 + $0xbc8] sm:$0xff]  ;;  %v7127_v20 = vld [vmem:[#allocation16 + $0xc38] sm:$0xff] }
 0xa79   : > { %12316 = vmatprep.subr.bf16.mxu0 %v12315_v22  ;;  %v12371_v55 = vpack.c.bf16 %v7127_v20, %v7126_v62  ;;  %v7597_v62 = vld [vmem:[#allocation16 + $0xd38] sm:$0xff] }
 0xa7b   : > { %11125 = vmatmul.mubr.f32.gmra.mrb[90].mxu0 %v14667_v15  ;;  %v12327_v15 = vpack.c.bf16 %v6894_v16, %v6893_v45  ;;  %v7357_v45 = vld [vmem:[#allocation16 + $0xc90] sm:$0xff]  ;;  %v7358_v16 = vld [vmem:[#allocation16 + $0xc98] sm:$0xff] }
 0xa7c   : > { %11127 = vmatprep.mubr.f32.mxu0 %v14683_v54  ;;  %12318 = vmatpush3.bf16.msra.mxu0 %v12315_v22  ;;  %v6896_v54 = vld [vmem:[#allocation16 + $0xbd8] sm:$0xff]  ;;  %v7129_v22 = vld [vmem:[#allocation16 + $0xc48] sm:$0xff] }
 0xa7d   : > { %12320 = vmatprep.subr.bf16.mxu0 %v12319_v4  ;;  %v12331_v19 = vpack.c.bf16 %v6896_v54, %v6895_v2  ;;  %v7360_v2 = vld [vmem:[#allocation16 + $0xca8] sm:$0xff] }
 0xa7f   : > { %11128 = vmatmul.mubr.f32.gmra.mrb[92].mxu0 %v14679_v33  ;;  %v6897_v33 = vld [vmem:[#allocation16 + $0xbe0] sm:$0xff] }
 0xa80   : > { %11130 = vmatprep.mubr.f32.mxu0 %v14695_v34  ;;  %12322 = vmatpush3.bf16.msra.mxu0 %v12319_v4  ;;  %v12335_v34 = vpack.c.bf16 %v6898_v37, %v6897_v33  ;;  %v7363_v37 = vld [vmem:[#allocation16 + $0xcc0] sm:$0xff] }
 0xa81   : > { %12324 = vmatprep.subr.bf16.mxu0 %v12323_v47 }
 0xa83   : > { %11131 = vmatmul.mubr.f32.gmra.mrb[94].mxu0 %v14691_v29  ;;  %v7121_v29 = vld [vmem:[#allocation16 + $0xc08] sm:$0xff] }
 0xa84   : > { %12326 = vmatpush3.bf16.msra.mxu0 %v12323_v47  ;;  %11193 = vmatprep.mubr.f32.mxu0 %v14855_v40  ;;  %v12359_v63 = vpack.c.bf16 %v7121_v29, %v7120_v26  ;;  %v7122_v40 = vld [vmem:[#allocation16 + $0xc10] sm:$0xff]  ;;  %v7356_v47 = vld [vmem:[#allocation16 + $0xc88] sm:$0xff]  ;;  %v7370_v26 = vld [vmem:[#allocation16 + $0xcf8] sm:$0xff] }
 0xa85   : > { %12328 = vmatprep.subr.bf16.mxu0 %v12327_v15  ;;  %v12363_v38 = vpack.c.bf16 %v7123_v53, %v7122_v40  ;;  %v7590_v29 = vld [vmem:[#allocation16 + $0xd00] sm:$0xff]  ;;  %v7592_v40 = vld [vmem:[#allocation16 + $0xd10] sm:$0xff]  ;;  %v7593_v53 = vld [vmem:[#allocation16 + $0xd18] sm:$0xff] }
 0xa88   : > { %12330 = vmatpush3.bf16.msra.mxu0 %v12327_v15  ;;  %v7359_v15 = vld [vmem:[#allocation16 + $0xca0] sm:$0xff] }
 0xa89   : > { %12332 = vmatprep.subr.bf16.mxu0 %v12331_v19  ;;  %v12415_v54 = vpack.c.bf16 %v7360_v2, %v7359_v15 }
 0xa8c   : > { %12334 = vmatpush3.bf16.msra.mxu0 %v12331_v19  ;;  %v7362_v19 = vld [vmem:[#allocation16 + $0xcb8] sm:$0xff] }
 0xa8d   : > { %12336 = vmatprep.subr.bf16.mxu0 %v12335_v34  ;;  %v12419_v33 = vpack.c.bf16 %v7362_v19, %v7361_v25 }
 0xa90   : > { %12338 = vmatpush3.bf16.msra.mxu0 %v12335_v34  ;;  %v7364_v34 = vld [vmem:[#allocation16 + $0xcc8] sm:$0xff] }
 0xa91   : > { %12340 = vmatprep.subr.bf16.mxu0 %v12339_v41 }
 0xa94   : > { %12342 = vmatpush3.bf16.msra.mxu0 %v12339_v41 }
 0xa95   : > { %12360 = vmatprep.subr.bf16.mxu0 %v12359_v63 }
 0xa97   : > { %11194 = vmatmul.mubr.f32.vlgmr.msra.gmra.mrb[88].mxu0 %v14853_v58  ;;  %v12375_v58 = vpack.c.bf16 %v7129_v22, %v7128_v56  ;;  %v7599_v56 = vld [vmem:[#allocation16 + $0xd48] sm:$0xff]  ;;  %v7601_v22 = vld [vmem:[#allocation16 + $0xd58] sm:$0xff] }
 0xa98   : > { %12362 = vmatpush3.bf16.msra.mxu0 %v12359_v63  ;;  %11196 = vmatprep.mubr.f32.mxu0 %v14859_v49  ;;  %v7130_v49 = vld [vmem:[#allocation16 + $0xc50] sm:$0xff]  ;;  %v7591_v63 = vld [vmem:[#allocation16 + $0xd08] sm:$0xff] }
 0xa99   : > { %12364 = vmatprep.subr.bf16.mxu0 %v12363_v38 }
 0xa9b   : > { %11197 = vmatmul.mubr.f32.gmra.mrb[90].mxu0 %v14857_v57  ;;  %v12379_v57 = vpack.c.bf16 %v7131_v14, %v7130_v49  ;;  %v7605_v14 = vld [vmem:[#allocation16 + $0xd78] sm:$0xff] }
 0xa9c   : > { %12366 = vmatpush3.bf16.msra.mxu0 %v12363_v38  ;;  %11199 = vmatprep.mubr.f32.mxu0 %v14863_v8  ;;  %v7132_v8 = vld [vmem:[#allocation16 + $0xc60] sm:$0xff] }
 0xa9d   : > { %12368 = vmatprep.subr.bf16.mxu0 %v12367_v1  ;;  %v12383_v4 = vpack.c.bf16 %v7133_v9, %v7132_v8  ;;  %v7594_v38 = vld [vmem:[#allocation16 + $0xd20] sm:$0xff] }
 0xa9e   : > { %v12463_v23 = vpack.c.bf16 %v7595_v51, %v7594_v38 }
 0xa9f   : > { %11200 = vmatmul.mubr.f32.gmra.mrb[92].mxu0 %v14861_v60  ;;  %v7134_v60 = vld [vmem:[#allocation16 + $0xc70] sm:$0xff] }
 0xaa0   : > { %12370 = vmatpush3.bf16.msra.mxu0 %v12367_v1  ;;  %11202 = vmatprep.mubr.f32.mxu0 %v14867_v46  ;;  %v12387_v46 = vpack.c.bf16 %v7135_v21, %v7134_v60  ;;  %v7596_v1 = vld [vmem:[#allocation16 + $0xd30] sm:$0xff] }
 0xaa1   : > { %12372 = vmatprep.subr.bf16.mxu0 %v12371_v55  ;;  %v12467_v20 = vpack.c.bf16 %v7597_v62, %v7596_v1 }
 0xaa3   : > { %11203 = vmatmul.mubr.f32.gmra.mrb[94].mxu0 %v14865_v7  ;;  %v12407_v7 = vpack.c.bf16 %v7356_v47, %v7355_v50 }
 0xaa4   : > { %12374 = vmatpush3.bf16.msra.mxu0 %v12371_v55  ;;  %11265 = vmatprep.mubr.f32.mxu0 %v14871_v0  ;;  %v12411_v0 = vpack.c.bf16 %v7358_v16, %v7357_v45  ;;  %v7598_v55 = vld [vmem:[#allocation16 + $0xd40] sm:$0xff] }
 0xaa5   : > { %12376 = vmatprep.subr.bf16.mxu0 %v12375_v58 }
 0xaa8   : > { %12378 = vmatpush3.bf16.msra.mxu0 %v12375_v58  ;;  %v7603_v58 = vld [vmem:[#allocation16 + $0xd68] sm:$0xff] }
 0xaa9   : > { %12380 = vmatprep.subr.bf16.mxu0 %v12379_v57 }
 0xaac   : > { %12382 = vmatpush3.bf16.msra.mxu0 %v12379_v57 }
 0xaad   : > { %12384 = vmatprep.subr.bf16.mxu0 %v12383_v4 }
 0xab0   : > { %12386 = vmatpush3.bf16.msra.mxu0 %v12383_v4 }
 0xab1   : > { %12388 = vmatprep.subr.bf16.mxu0 %v12387_v46 }
 0xab4   : > { %12390 = vmatpush3.bf16.msra.mxu0 %v12387_v46 }
 0xab5   : > { %12408 = vmatprep.subr.bf16.mxu0 %v12407_v7 }
 0xab7   : > { %11266 = vmatmul.mubr.f32.vlgmr.msra.gmra.mrb[88].mxu0 %v14869_v5  ;;  %v12423_v5 = vpack.c.bf16 %v7364_v34, %v7363_v37 }
 0xab8   : > { %12410 = vmatpush3.bf16.msra.mxu0 %v12407_v7  ;;  %11268 = vmatprep.mubr.f32.mxu0 %v14875_v42  ;;  %v7365_v42 = vld [vmem:[#allocation16 + $0xcd0] sm:$0xff] }
 0xab9   : > { %12412 = vmatprep.subr.bf16.mxu0 %v12411_v0 }
 0xabb   : > { %11269 = vmatmul.mubr.f32.gmra.mrb[90].mxu0 %v14873_v10  ;;  %v12427_v10 = vpack.c.bf16 %v7366_v59, %v7365_v42 }
 0xabc   : > { %12414 = vmatpush3.bf16.msra.mxu0 %v12411_v0  ;;  %11271 = vmatprep.mubr.f32.mxu0 %v14879_v52  ;;  %v7367_v52 = vld [vmem:[#allocation16 + $0xce0] sm:$0xff] }
 0xabd   : > { %12416 = vmatprep.subr.bf16.mxu0 %v12415_v54  ;;  %v12431_v41 = vpack.c.bf16 %v7368_v28, %v7367_v52 }
 0xabf   : > { %11272 = vmatmul.mubr.f32.gmra.mrb[92].mxu0 %v14877_v39  ;;  %v7369_v39 = vld [vmem:[#allocation16 + $0xcf0] sm:$0xff] }
 0xac0   : > { %12418 = vmatpush3.bf16.msra.mxu0 %v12415_v54  ;;  %11274 = vmatprep.mubr.f32.mxu0 %v14883_v12  ;;  %v12435_v12 = vpack.c.bf16 %v7370_v26, %v7369_v39 }
 0xac1   : > { %12420 = vmatprep.subr.bf16.mxu0 %v12419_v33 }
 0xac3   : > { %11275 = vmatmul.mubr.f32.gmra.mrb[94].mxu0 %v14881_v43  ;;  %v12455_v43 = vpack.c.bf16 %v7591_v63, %v7590_v29 }
 0xac4   : > { %12422 = vmatpush3.bf16.msra.mxu0 %v12419_v33  ;;  %11337 = vmatprep.mubr.f32.mxu0 %v14887_v36  ;;  %v12459_v36 = vpack.c.bf16 %v7593_v53, %v7592_v40 }
 0xac5   : > { %12424 = vmatprep.subr.bf16.mxu0 %v12423_v5 }
 0xac8   : > { %12426 = vmatpush3.bf16.msra.mxu0 %v12423_v5 }
 0xac9   : > { %12428 = vmatprep.subr.bf16.mxu0 %v12427_v10 }
 0xacc   : > { %12430 = vmatpush3.bf16.msra.mxu0 %v12427_v10  ;;  %v8704_v10 = vld [vmem:[#allocation21] ss:$0 sm:$0xff] }
 0xacd   : > { %12432 = vmatprep.subr.bf16.mxu0 %v12431_v41 }
 0xad0   : > { %12434 = vmatpush3.bf16.msra.mxu0 %v12431_v41 }
 0xad1   : > { %12436 = vmatprep.subr.bf16.mxu0 %v12435_v12 }
 0xad4   : > { %12438 = vmatpush3.bf16.msra.mxu0 %v12435_v12 }
 0xad5   : > { %12456 = vmatprep.subr.bf16.mxu0 %v12455_v43 }
 0xad7   : > { %11338 = vmatmul.mubr.f32.vlgmr.msra.gmra.mrb[88].mxu0 %v14885_v24  ;;  %v12471_v24 = vpack.c.bf16 %v7599_v56, %v7598_v55 }
 0xad8   : > { %12458 = vmatpush3.bf16.msra.mxu0 %v12455_v43  ;;  %11340 = vmatprep.mubr.f32.mxu0 %v14892_v18  ;;  %v7600_v18 = vld [vmem:[#allocation16 + $0xd50] sm:$0xff] }
 0xad9   : > { %12460 = vmatprep.subr.bf16.mxu0 %v12459_v36 }
 0xadb   : > { %11341 = vmatmul.mubr.f32.gmra.mrb[90].mxu0 %v14890_v44  ;;  %v12475_v44 = vpack.c.bf16 %v7601_v22, %v7600_v18 }
 0xadc   : > { %12462 = vmatpush3.bf16.msra.mxu0 %v12459_v36  ;;  %11343 = vmatprep.mubr.f32.mxu0 %v14896_v30  ;;  %v7602_v30 = vld [vmem:[#allocation16 + $0xd60] sm:$0xff] }
 0xadd   : > { %12464 = vmatprep.subr.bf16.mxu0 %v12463_v23  ;;  %v12479_v49 = vpack.c.bf16 %v7603_v58, %v7602_v30 }
 0xadf   : > { %11344 = vmatmul.mubr.f32.gmra.mrb[92].mxu0 %v14894_v31  ;;  %v7604_v31 = vld [vmem:[#allocation16 + $0xd70] sm:$0xff] }
 0xae0   : > { %12466 = vmatpush3.bf16.msra.mxu0 %v12463_v23  ;;  %11346 = vmatprep.mubr.f32.mxu0 %v14900_v11  ;;  %v12483_v11 = vpack.c.bf16 %v7605_v14, %v7604_v31 }
 0xae1   : > { %12468 = vmatprep.subr.bf16.mxu0 %v12467_v20 }
 0xae3   : > { %11347 = vmatmul.mubr.f32.gmra.mrb[94].mxu0 %v14898_v48  ;;  %v8695_v48 = vld [vmem:[#allocation18 + $0x2] ss:$0 sm:$0xff] }
 0xae4   : > { %12470 = vmatpush3.bf16.msra.mxu0 %v12467_v20  ;;  %11409 = vmatprep.mubr.f32.mxu0 %v14904_v32 }
 0xae5   : > { %12472 = vmatprep.subr.bf16.mxu0 %v12471_v24 }
 0xae8   : > { %12474 = vmatpush3.bf16.msra.mxu0 %v12471_v24 }
 0xae9   : > { %12476 = vmatprep.subr.bf16.mxu0 %v12475_v44 }
 0xaec   : > { %12478 = vmatpush3.bf16.msra.mxu0 %v12475_v44 }
 0xaed   : > { %12480 = vmatprep.subr.bf16.mxu0 %v12479_v49 }
 0xaf0   : > { %12482 = vmatpush3.bf16.msra.mxu0 %v12479_v49 }
 0xaf1   : > { %12484 = vmatprep.subr.bf16.mxu0 %v12483_v11 }
 0xaf4   : > { %12486 = vmatpush3.bf16.msra.mxu0 %v12483_v11 }
 0xaf7   : > { %11410 = vmatmul.mubr.f32.vlgmr.msra.gmra.mrb[88].mxu0 %v14902_v6 }
 0xaf8   : > { %11412 = vmatprep.mubr.f32.mxu0 %v14910_v27 }
 0xafb   : > { %11413 = vmatmul.mubr.f32.gmra.mrb[90].mxu0 %v14907_v3 }
 0xafc   : > { %11415 = vmatprep.mubr.f32.mxu0 %v14916_v61 }
 0xaff   : > { %11416 = vmatmul.mubr.f32.gmra.mrb[92].mxu0 %v14913_v13 }
 0xb00   : > { %11418 = vmatprep.mubr.f32.mxu0 %v14922_v35 }
 0xb03   : > { %11419 = vmatmul.mubr.f32.gmra.mrb[94].mxu0 %v14919_v17 }
 0xbca   : > { %v11411_v32 = vpop.f32.mrb[88].mxu0 }
 0xbcb   : > { %v7726_v57 = vadd.f32 %v11411_v32, %v8695_v48  ;;  %v7672_v8 = vpop.f32.mrb[89].mxu0 }
 0xbcc   : > { %v7725_v9 = vadd.f32 %v8695_v48, %v7672_v8 }
 0xbcd   : > { %v7742_v4 = vmul.f32 0.2, %v7726_v57  ;;  %vm7734_vm9 = vcmp.ge.f32.partialorder %v7726_v57, 0.0 }
 0xbce   : > { %vm7733_vm10 = vcmp.ge.f32.partialorder %v7725_v9, 0.0  ;;  %v7741_v6 = vmul.f32 0.2, %v7725_v9  ;;  %v11414_v27 = vpop.f32.mrb[90].mxu0 }
 0xbcf   : > { %v7728_v60 = vadd.f32 %v11414_v27, %v8695_v48  ;;  %v7682_v3 = vpop.f32.mrb[91].mxu0  ;;  %v7750_v46 = vsel %vm7734_vm9, %v7726_v57, %v7742_v4 }
 0xbd0   : > { %v7727_v21 = vadd.f32 %v8695_v48, %v7682_v3  ;;  %v7749_v61 = vsel %vm7733_vm10, %v7725_v9, %v7741_v6 }
 0xbd1   : > { %v7744_v13 = vmul.f32 0.2, %v7728_v60  ;;  %11451 = vmatprep.mubr.msk.f32.mxu1 %vm667_vm0, %v7749_v61  ;;  %vm7736_vm11 = vcmp.ge.f32.partialorder %v7728_v60, 0.0 }
 0xbd2   : > { %vm7735_vm12 = vcmp.ge.f32.partialorder %v7727_v21, 0.0  ;;  %v7743_v17 = vmul.f32 0.2, %v7727_v21  ;;  %v11417_v35 = vpop.f32.mrb[92].mxu0  ;;  %11452 = vmatmul.mubr.msk.f32.vlgmr.msra.gmra.mrb[136].mxu1 %vm667_vm0, %v7750_v46 }
 0xbd3   : > { %v7730_v50 = vadd.f32 %v11417_v35, %v8695_v48  ;;  %v7692_v47 = vpop.f32.mrb[93].mxu0  ;;  %v7752_v0 = vsel %vm7736_vm11, %v7728_v60, %v7744_v13 }
 0xbd4   : > { %v7729_v7 = vadd.f32 %v8695_v48, %v7692_v47  ;;  %v7751_v45 = vsel %vm7735_vm12, %v7727_v21, %v7743_v17 }
 0xbd5   : > { %v7746_v16 = vmul.f32 0.2, %v7730_v50  ;;  %11454 = vmatprep.mubr.msk.f32.mxu1 %vm667_vm0, %v7751_v45  ;;  %vm7738_vm13 = vcmp.ge.f32.partialorder %v7730_v50, 0.0 }
 0xbd6   : > { %vm7737_vm14 = vcmp.ge.f32.partialorder %v7729_v7, 0.0  ;;  %v7745_v15 = vmul.f32 0.2, %v7729_v7  ;;  %v11420_v2 = vpop.f32.mrb[94].mxu0  ;;  %11455 = vmatmul.mubr.msk.f32.gmra.mrb[138].mxu1 %vm667_vm0, %v7752_v0 }
 0xbd7   : > { %v7732_v54 = vadd.f32 %v11420_v2, %v8695_v48  ;;  %v7702_v25 = vpop.f32.mrb[95].mxu0  ;;  %v7754_v34 = vsel %vm7738_vm13, %v7730_v50, %v7746_v16 }
 0xbd8   : > { %v7731_v19 = vadd.f32 %v8695_v48, %v7702_v25  ;;  %v7753_v33 = vsel %vm7737_vm14, %v7729_v7, %v7745_v15 }
 0xbd9   : > { %v7748_v37 = vmul.f32 0.2, %v7732_v54  ;;  %11457 = vmatprep.mubr.msk.f32.mxu1 %vm667_vm0, %v7753_v33  ;;  %vm7740_vm15 = vcmp.ge.f32.partialorder %v7732_v54, 0.0 }
 0xbda   : > { %vm7739_vm1 = vcmp.ge.f32.partialorder %v7731_v19, 0.0  ;;  %v7747_v5 = vmul.f32 0.2, %v7731_v19  ;;  %11458 = vmatmul.mubr.msk.f32.gmra.mrb[140].mxu1 %vm667_vm0, %v7754_v34 }
 0xbdb   : > { %v7756_v59 = vsel %vm7740_vm15, %v7732_v54, %v7748_v37 }
 0xbdc   : > { %v7755_v42 = vsel %vm7739_vm1, %v7731_v19, %v7747_v5 }
 0xbdd   : > { %11460 = vmatprep.mubr.msk.f32.mxu1 %vm667_vm0, %v7755_v42 }
 0xbde   : > { %11461 = vmatmul.mubr.msk.f32.gmra.mrb[142].mxu1 %vm667_vm0, %v7756_v59 }
 0xca5   : > { %v11453_v52 = vpop.f32.mrb[136].mxu1 }
 0xca6   : > { %v12487_v28 = vadd.f32 %v11453_v52, %v8704_v10  ;;  %v8112_v41 = vpop.f32.mrb[137].mxu1 }
 0xca7   : > { %v12488_v39 = vadd.f32 %v8704_v10, %v8112_v41 }
 0xca8   : > { %vm8160_vm2 = vcmp.ge.f32.partialorder %v12487_v28, 0.0  ;;  %v8168_v26 = vmul.f32 0.2, %v12487_v28 }
 0xca9   : > { %vm8159_vm3 = vcmp.ge.f32.partialorder %v12488_v39, 0.0  ;;  %v8167_v12 = vmul.f32 0.2, %v12488_v39  ;;  %v11456_v29 = vpop.f32.mrb[138].mxu1 }
 0xcaa   : > { %v8176_v63 = vsel %vm8160_vm2, %v12487_v28, %v8168_v26  ;;  %v12489_v43 = vadd.f32 %v11456_v29, %v8704_v10  ;;  %v8122_v40 = vpop.f32.mrb[139].mxu1 }
 0xcab   : > { %8184 = vst.msk [vmem:[%s14970_s25 + $0x8] sm:$0xff] %vm667_vm0, %v8176_v63  ;;  %v8175_v53 = vsel %vm8159_vm3, %v12488_v39, %v8167_v12  ;;  %v12490_v36 = vadd.f32 %v8704_v10, %v8122_v40 }
 0xcac   : > { %8183 = vst.msk [vmem:[%s14970_s25] sm:$0xff] %vm667_vm0, %v8175_v53  ;;  %vm8162_vm4 = vcmp.ge.f32.partialorder %v12489_v43, 0.0  ;;  %v8170_v38 = vmul.f32 0.2, %v12489_v43 }
 0xcad   : > { %vm8161_vm5 = vcmp.ge.f32.partialorder %v12490_v36, 0.0  ;;  %v8169_v51 = vmul.f32 0.2, %v12490_v36  ;;  %v11459_v23 = vpop.f32.mrb[140].mxu1 }
 0xcae   : > { %v8178_v1 = vsel %vm8162_vm4, %v12489_v43, %v8170_v38  ;;  %v12491_v62 = vadd.f32 %v11459_v23, %v8704_v10  ;;  %v8132_v20 = vpop.f32.mrb[141].mxu1 }
 0xcaf   : > { %8186 = vst.msk [vmem:[%s14970_s25 + $0x18] sm:$0xff] %vm667_vm0, %v8178_v1  ;;  %v8177_v55 = vsel %vm8161_vm5, %v12490_v36, %v8169_v51  ;;  %v12492_v56 = vadd.f32 %v8704_v10, %v8132_v20 }
 0xcb0   : > { %8185 = vst.msk [vmem:[%s14970_s25 + $0x10] sm:$0xff] %vm667_vm0, %v8177_v55  ;;  %vm8164_vm6 = vcmp.ge.f32.partialorder %v12491_v62, 0.0  ;;  %v8172_v24 = vmul.f32 0.2, %v12491_v62 }
 0xcb1   : > { %vm8163_vm7 = vcmp.ge.f32.partialorder %v12492_v56, 0.0  ;;  %v8171_v18 = vmul.f32 0.2, %v12492_v56  ;;  %v11462_v22 = vpop.f32.mrb[142].mxu1 }
 0xcb2   : > { %v8180_v44 = vsel %vm8164_vm6, %v12491_v62, %v8172_v24  ;;  %v12493_v30 = vadd.f32 %v11462_v22, %v8704_v10  ;;  %v8142_v58 = vpop.f32.mrb[143].mxu1 }
 0xcb3   : > { %8188 = vst.msk [vmem:[%s14970_s25 + $0x28] sm:$0xff] %vm667_vm0, %v8180_v44  ;;  %v8179_v49 = vsel %vm8163_vm7, %v12492_v56, %v8171_v18  ;;  %v12494_v31 = vadd.f32 %v8704_v10, %v8142_v58 }
 0xcb4   : > { %8187 = vst.msk [vmem:[%s14970_s25 + $0x20] sm:$0xff] %vm667_vm0, %v8179_v49  ;;  %vm8166_vm8 = vcmp.ge.f32.partialorder %v12493_v30, 0.0  ;;  %v8174_v14 = vmul.f32 0.2, %v12493_v30 }
 0xcb5   : > { %vm8165_vm9 = vcmp.ge.f32.partialorder %v12494_v31, 0.0  ;;  %v8173_v11 = vmul.f32 0.2, %v12494_v31 }
 0xcb6   : > { %v8182_v48 = vsel %vm8166_vm8, %v12493_v30, %v8174_v14 }
 0xcb7   : > { %8190 = vst.msk [vmem:[%s14970_s25 + $0x38] sm:$0xff] %vm667_vm0, %v8182_v48  ;;  %v8181_v32 = vsel %vm8165_vm9, %v12494_v31, %v8173_v11 }
 0xcb8   : > { %8189 = vst.msk [vmem:[%s14970_s25 + $0x30] sm:$0xff] %vm667_vm0, %v8181_v32 }
 0xcb9 PF: > { %s15109_s16 = sld [smem:[#allocation29_spill]] }
 0xcbf   : > { %s31_s29 = sadd.s32 1, %s15109_s16  }
 0xcc0   : > { %p28_p3 = scmp.ge.s32.totalorder %s31_s29, 4  }
 0xcc2   :  { %30 = sbr.rel (!%p28_p3) target bundleno = 11 (0xb), region = 200 }
 0xcc9   :  { %8212 = vsyncpa [#allocation3], 1 }
 0xcca   :  { %8214 = vsyncpa [#allocation3 + $0x1], 1 }
 0xccb   :  { %8215 = vsyncpa [#allocation5], 1 }
 0xccc   :  { %8216 = vsyncpa [#allocation8], 1 }
 0xccd   :  { %8217 = vsyncpa [#allocation11], 1 }
 0xcce   :  { %8218 = vsyncpa [#allocation14], 1 }
 0xccf   :  { %8219 = vsyncpa [#allocation17], 1 }
 0xcd0   :  { %8220 = vsyncpa [#allocation20], 1 }

</bundles_post_ra>
